<compile_context>
chip_gen: v5e
topology: v5e:2x2
jax: 0.10.0
libtpu: 0.0.40
codegen_flags: <defaults>
</compile_context>

<pallas_src>
import functools

import numpy as np
import jax
import jax.numpy as jnp
from jax.experimental import pallas as pl
from jax.experimental.pallas import tpu as pltpu


# ----------------------------------------------------------------------------
# Banded-weight construction (host-side, once at init)
# ----------------------------------------------------------------------------
def _band_stride2(w, scale, img_w, C):
    """Layer-1 (3x3, stride 2, pad 1, Cin=1) as two banded matrices.

    Input rows are the even/odd interleaved padded image rows
    (lanes 0..Wp-1 = even row, lanes Wp..2Wp-1 = odd row).
    Returns (2*L1, Wo*C): rows [0:L1) hold the kh=0 (even) + kh=1 (odd) bands,
    rows [L1:2*L1) hold the kh=2 band (even lanes only).
    """
    Wp = img_w + 2
    Wo = img_w // 2
    L1 = 2 * Wp
    B = np.zeros((2, L1, Wo * C), np.float32)
    ws = w[:, :, 0, :] * scale[None, None, :]           # (3, 3, C), BN scale folded
    for wo in range(Wo):
        for kw in range(3):
            wp = 2 * wo + kw
            B[0, wp, wo * C:(wo + 1) * C] += ws[0, kw]
            B[0, Wp + wp, wo * C:(wo + 1) * C] += ws[1, kw]
            B[1, wp, wo * C:(wo + 1) * C] += ws[2, kw]
    return B.reshape(2 * L1, Wo * C)


def _band_same(w, scale, Wo, C):
    """3x3 'same' conv (stride 1, pad 1) as 3 banded (Wo*C, Wo*C) matrices,
    one per kh, stacked along rows.  W-padding is realised by clipping the
    band at the edges; H-padding is handled by zero rows in the activation."""
    L = Wo * C
    B = np.zeros((3, L, L), np.float32)
    ws = w * scale[None, None, None, :]                 # (3, 3, C, C)
    for kh in range(3):
        for wo in range(Wo):
            for kw in range(3):
                wi = wo + kw - 1
                if 0 <= wi < Wo:
                    B[kh, wi * C:(wi + 1) * C, wo * C:(wo + 1) * C] += ws[kh, kw]
    return B.reshape(3 * L, L)


# ----------------------------------------------------------------------------
# Kernel 1: fused ConvBnRelu x4 (stride-2 first layer folded in)
# ----------------------------------------------------------------------------
def _cnn_kernel(x_ref, w1_ref, wc_ref, sh_ref, o_ref, p_ref,
                *, nb, ho, per, l1, lanes):
    # x_ref : (nb*per, l1)      interleaved even/odd padded input rows
    # w1_ref: (2*l1, lanes)     layer-1 banded weights (BN scale folded)
    # wc_ref: (9*lanes, lanes)  layer 2..4 banded weights, [layer, kh] row blocks
    # sh_ref: (4, lanes)        per-layer BN shift (broadcast over W)
    # o_ref : (nb*ho, lanes)    final activations, rows=(image,h), lanes=(w,c)
    # p_ref : (nb*per, lanes)   VMEM scratch: H-padded activations
    M = nb * per - 2
    p_ref[...] = jnp.zeros_like(p_ref)

    # ---- layer 1: stride-2 3x3 conv as two banded matmuls --------------------
    x = x_ref[...]
    acc = jnp.dot(x[0:M, :], w1_ref[0:l1, :], preferred_element_type=jnp.float32)
    acc = acc + jnp.dot(x[1:1 + M, :], w1_ref[l1:2 * l1, :],
                        preferred_element_type=jnp.float32)
    acc = jnp.maximum(acc + sh_ref[0:1, :], 0.0)
    for n in range(nb):                                  # keep only valid rows,
        p_ref[n * per + 1:n * per + 1 + ho, :] = acc[n * per:n * per + ho, :]

    # ---- layers 2..4: 'same' 3x3 conv = 3 banded matmuls each -----------------
    for l in range(3):
        p = p_ref[...]
        acc = jnp.dot(p[0:M, :], wc_ref[(l * 3 + 0) * lanes:(l * 3 + 1) * lanes, :],
                      preferred_element_type=jnp.float32)
        acc = acc + jnp.dot(p[1:1 + M, :],
                            wc_ref[(l * 3 + 1) * lanes:(l * 3 + 2) * lanes, :],
                            preferred_element_type=jnp.float32)
        acc = acc + jnp.dot(p[2:2 + M, :],
                            wc_ref[(l * 3 + 2) * lanes:(l * 3 + 3) * lanes, :],
                            preferred_element_type=jnp.float32)
        acc = jnp.maximum(acc + sh_ref[l + 1:l + 2, :], 0.0)
        if l < 2:
            for n in range(nb):
                p_ref[n * per + 1:n * per + 1 + ho, :] = acc[n * per:n * per + ho, :]
        else:
            for n in range(nb):
                o_ref[n * ho:(n + 1) * ho, :] = acc[n * per:n * per + ho, :]


def _pick_block(n, cap=8):
    nb = min(cap, n)
    while n % nb:
        nb -= 1
    return nb


def cnn_forward(x01, band1, bandc, shifts, *, n_img, ho, per, l1, lanes):
    nb = _pick_block(n_img, cap=8)
    nblk = n_img // nb
    m = nb * per - 2
    flops = int(nblk * 2 * m * (2 * l1 + 9 * lanes) * lanes)
    bytes_acc = int(4 * (x01.size + nblk * (band1.size + bandc.size + shifts.size)
                         + n_img * ho * lanes))
    kern = functools.partial(_cnn_kernel, nb=nb, ho=ho, per=per, l1=l1, lanes=lanes)
    return pl.pallas_call(
        kern,
        out_shape=jax.ShapeDtypeStruct((n_img * ho, lanes), jnp.float32),
        grid=(nblk,),
        in_specs=[
            pl.BlockSpec((nb * per, l1), lambda n: (n, 0)),
            pl.BlockSpec((2 * l1, lanes), lambda n: (0, 0)),
            pl.BlockSpec((9 * lanes, lanes), lambda n: (0, 0)),
            pl.BlockSpec((4, lanes), lambda n: (0, 0)),
        ],
        out_specs=pl.BlockSpec((nb * ho, lanes), lambda n: (n, 0)),
        scratch_shapes=[pltpu.VMEM((nb * per, lanes), jnp.float32)],
        compiler_params=pltpu.CompilerParams(dimension_semantics=("parallel",)),
        cost_estimate=pl.CostEstimate(flops=flops, transcendentals=0,
                                      bytes_accessed=bytes_acc),
    )(x01, band1, bandc, shifts)


# ----------------------------------------------------------------------------
# Kernel 2: Linear + ReLU head fused with the single-layer LSTM (last h)
# ----------------------------------------------------------------------------
def _head_lstm_kernel(feat_ref, wl_ref, lb_ref, wih_ref, whh_ref, bg_ref,
                      ga_ref, gb_ref, out_ref, *, batch, panels, nc, na, E):
    GE = 4 * E
    # Linear + ReLU once per panel (shared across answer sequences);
    # tag one-hots are folded into lb_ref (per-panel bias) -> K stays 512-aligned.
    emb = jnp.dot(feat_ref[...], wl_ref[...], preferred_element_type=jnp.float32)
    emb = jnp.maximum(emb + lb_ref[...], 0.0)                       # (B*P, E)

    # Hoisted LSTM input projection (+ combined gate bias), off the recurrence.
    gx = jnp.dot(emb, wih_ref[...], preferred_element_type=jnp.float32) + bg_ref[...]

    # Per-time-step gate inputs for the (b, a)-ordered sequences (static build).
    gx_t = []
    for t in range(nc):
        gx_t.append(jnp.concatenate(
            [jnp.broadcast_to(gx[b * panels + t:b * panels + t + 1, :], (na, GE))
             for b in range(batch)], axis=0))
    gx_t.append(jnp.concatenate(
        [gx[b * panels + nc:b * panels + nc + na, :] for b in range(batch)], axis=0))

    whh = whh_ref[...]
    ga = ga_ref[...]            # 0.5 on i/f/o lanes, 1.0 on g lanes
    gb = gb_ref[...]            # 0.5 on i/f/o lanes, 0.0 on g lanes
    Bn = batch * na
    h = jnp.zeros((Bn, E), jnp.float32)
    c = jnp.zeros((Bn, E), jnp.float32)
    for t in range(nc + 1):     # T is small & static: fully unrolled
        gates = gx_t[t] + jnp.dot(h, whh, preferred_element_type=jnp.float32)
        # one full-width EUP pass: i,f,o -> sigmoid (=0.5*tanh(x/2)+0.5), g -> tanh
        act = jnp.tanh(gates * ga) * ga + gb
        i = act[:, 0:E]
        f = act[:, E:2 * E]
        g = act[:, 2 * E:3 * E]
        o = act[:, 3 * E:4 * E]
        c = f * c + i * g
        h = o * jnp.tanh(c)
    out_ref[...] = h


def head_lstm(feat, w_lin, lbias, w_ih, w_hh, b_g, ga, gb, *, batch, panels, nc, na):
    E = w_lin.shape[1]
    GE = 4 * E
    Bn = batch * na
    T = nc + 1
    flops = int(2 * feat.shape[0] * (feat.shape[1] * E + E * GE)
                + T * 2 * Bn * E * GE)
    trans = int(T * Bn * (GE + E))
    bytes_acc = int(4 * (feat.size + w_lin.size + lbias.size + w_ih.size
                         + w_hh.size + b_g.size + ga.size + gb.size + Bn * E))
    vmem = pl.BlockSpec(memory_space=pltpu.MemorySpace.VMEM)
    kern = functools.partial(_head_lstm_kernel, batch=batch, panels=panels,
                             nc=nc, na=na, E=E)
    return pl.pallas_call(
        kern,
        out_shape=jax.ShapeDtypeStruct((Bn, E), jnp.float32),
        in_specs=[vmem] * 8,
        out_specs=vmem,
        cost_estimate=pl.CostEstimate(flops=flops, transcendentals=trans,
                                      bytes_accessed=bytes_acc),
    )(feat, w_lin, lbias, w_ih, w_hh, b_g, ga, gb)


# ----------------------------------------------------------------------------
# Parameter construction (deterministic, synthetic)
# ----------------------------------------------------------------------------
def init_params(key, *, num_channels, embedding_size, image_size):
    C, E = num_channels, embedding_size
    Himg = image_size
    Ho = Wo = Himg // 2
    conv_dim = C * Ho * Wo
    lanes = Wo * C
    eps = 1e-5

    keys = iter(jax.random.split(key, 32))

    def nrm(shape, scale):
        return np.asarray(jax.random.normal(next(keys), shape, jnp.float32)) * scale

    def conv_block(cin, cout):
        w = nrm((3, 3, cin, cout), 1.0 / np.sqrt(9.0 * cin))
        gamma = 1.0 + 0.01 * nrm((cout,), 1.0)
        beta = 0.01 * nrm((cout,), 1.0)
        # eval-mode BatchNorm with fresh stats (running_mean=0, running_var=1)
        return w, gamma / np.sqrt(1.0 + eps), beta

    blocks = [conv_block(1, C)] + [conv_block(C, C) for _ in range(3)]

    band1 = _band_stride2(blocks[0][0], blocks[0][1], Himg, C)           # (2*l1, lanes)
    bandc = np.concatenate([_band_same(w, s, Wo, C) for (w, s, _) in blocks[1:]],
                           axis=0)                                       # (9*lanes, lanes)
    shifts = np.stack([np.tile(sh, Wo) for (_, _, sh) in blocks])        # (4, lanes)

    # nn.Linear(conv_dim + 9, E): its conv-feature rows are permuted from
    # PyTorch's (C,H,W) flatten order into the kernels' (H,W,C) feature order.
    wlin_full = nrm((conv_dim + 9, E), 1.0 / np.sqrt(conv_dim + 9.0))
    b_lin = 0.01 * nrm((E,), 1.0)
    r = np.arange(conv_dim)
    h_, w_, c_ = r // lanes, (r % lanes) // C, r % C
    w_lin = wlin_full[:conv_dim][c_ * (Ho * Wo) + h_ * Wo + w_]
    w_tag = wlin_full[conv_dim:]                                         # (9, E)

    # nn.LSTM(E, E): weights stored transposed, gate order (i, f, g, o)
    w_ih = nrm((4 * E, E), 1.0 / np.sqrt(E)).T
    w_hh = nrm((4 * E, E), 1.0 / np.sqrt(E)).T
    b_g = (0.01 * nrm((4 * E,), 1.0) + 0.01 * nrm((4 * E,), 1.0)).reshape(1, 4 * E)

    # lane masks for the fused gate nonlinearity
    ga = np.full((1, 4 * E), 0.5, np.float32)
    ga[0, 2 * E:3 * E] = 1.0
    gb = np.full((1, 4 * E), 0.5, np.float32)
    gb[0, 2 * E:3 * E] = 0.0

    to = lambda a: jnp.asarray(a, jnp.float32)
    return {
        "band1": to(band1), "bandc": to(bandc), "shifts": to(shifts),
        "w_lin": to(w_lin), "w_tag": to(w_tag), "b_lin": to(b_lin).reshape(1, E),
        "w_ih": to(w_ih), "w_hh": to(w_hh), "b_g": to(b_g),
        "ga": to(ga), "gb": to(gb),
    }


# ----------------------------------------------------------------------------
# Full forward pass (wrapper glue + the two fused Pallas kernels)
# ----------------------------------------------------------------------------
@jax.jit
def cnn_lstm_forward(context, answers, params):
    # context: (B, nc, 1, H, W)   answers: (B, na, 1, H, W)  -- NCHW like PyTorch
    B, nc = context.shape[0], context.shape[1]
    na = answers.shape[1]
    panels = nc + na
    x = jnp.concatenate([context, answers], axis=1)          # (B, P, 1, H, W)
    Himg, Wimg = x.shape[-2], x.shape[-1]
    n_img = B * panels
    Ho, Wo = Himg // 2, Wimg // 2
    lanes = params["shifts"].shape[1]                        # Wo * C
    per = Ho + 2
    l1 = 2 * (Wimg + 2)

    # ---- layer-1 input prep: pad once, interleave even/odd rows along lanes ---
    x = x.reshape(n_img, Himg, Wimg)
    xp = jnp.pad(x, ((0, 0), (1, 1), (1, 1)))
    x01 = jnp.concatenate([xp[:, 0::2, :], xp[:, 1::2, :]], axis=-1)   # (N, Ho+1, l1)
    x01 = jnp.pad(x01, ((0, 0), (0, 1), (0, 0)))                       # (N, per, l1)
    x01 = x01.reshape(n_img * per, l1)

    # ---- fused ConvBnRelu x4 (stride-2 folded in, all activations in VMEM) ----
    feat = cnn_forward(x01, params["band1"], params["bandc"], params["shifts"],
                       n_img=n_img, ho=Ho, per=per, l1=l1, lanes=lanes)
    feat = feat.reshape(n_img, Ho * lanes)                   # (B*P, conv_dim), free

    # ---- TagPanelEmbeddings: one-hot tags folded into a per-panel bias --------
    tag_idx = jnp.concatenate([jnp.arange(nc, dtype=jnp.int32),
                               jnp.full((na,), nc, dtype=jnp.int32)])
    lbias = params["w_tag"][tag_idx] + params["b_lin"]       # (P, E)
    lbias = jnp.tile(lbias, (B, 1))                          # (B*P, E)

    # ---- fused Linear + ReLU (+ Identity) + LSTM, last hidden state -----------
    out = head_lstm(feat, params["w_lin"], lbias, params["w_ih"], params["w_hh"],
                    params["b_g"], params["ga"], params["gb"],
                    batch=B, panels=panels, nc=nc, na=na)    # (B*na, E)
    return out.reshape(B, na, -1)


# ----------------------------------------------------------------------------
if __name__ == "__main__":
    key = jax.random.PRNGKey(0)
    k_ctx, k_ans, k_par = jax.random.split(key, 3)

    # small shapes: batch=2, 8 context + 4 answer panels, 1x16x16 images,
    # num_channels=8, embedding_size=32
    B, NC, NA, H, W = 2, 8, 4, 16, 16
    NUM_CHANNELS, EMB = 8, 32

    context = jax.random.normal(k_ctx, (B, NC, 1, H, W), jnp.float32)
    answers = jax.random.normal(k_ans, (B, NA, 1, H, W), jnp.float32)

    params = init_params(k_par, num_channels=NUM_CHANNELS,
                         embedding_size=EMB, image_size=H)

    out = jax.block_until_ready(cnn_lstm_forward(context, answers, params))

    assert out.shape == (B, NA, EMB), out.shape
    assert bool(jnp.all(jnp.isfinite(out)))
    print("KERNEL_OK")
</pallas_src>

<mosaic_0001>
module attributes {stable_mosaic.version = 11 : i64} {
  func.func @_cnn_kernel(%arg0: i32, %arg1: memref<80x36xf32, #tpu.memory_space<vmem>>, %arg2: memref<72x64xf32, #tpu.memory_space<vmem>>, %arg3: memref<576x64xf32, #tpu.memory_space<vmem>>, %arg4: memref<4x64xf32, #tpu.memory_space<vmem>>, %arg5: memref<64x64xf32, #tpu.memory_space<vmem>>, %arg6: memref<80x64xf32, #tpu.memory_space<vmem>>) attributes {dimension_semantics = [#tpu.dimension_semantics<parallel>], iteration_bounds = array<i64: 3>, scalar_prefetch = 0 : i64, scratch_operands = 1 : i64, tpu.core_type = #tpu.core_type<tc>, window_params = [{transform_indices = @transform_0, window_bounds = array<i64: 80, 36>}, {pipeline_mode = #tpu.pipeline_mode<synchronous>, transform_indices = @transform_1, window_bounds = array<i64: 72, 64>}, {pipeline_mode = #tpu.pipeline_mode<synchronous>, transform_indices = @transform_2, window_bounds = array<i64: 576, 64>}, {pipeline_mode = #tpu.pipeline_mode<synchronous>, transform_indices = @transform_3, window_bounds = array<i64: 4, 64>}, {transform_indices = @transform_4, window_bounds = array<i64: 64, 64>}]} {
    %cst = arith.constant 0.000000e+00 : f32
    %0 = vector.broadcast %cst : f32 to vector<80x64xf32>
    %c0 = arith.constant 0 : index
    %c0_0 = arith.constant 0 : index
    %1 = vector.load %arg6[%c0, %c0_0] : memref<80x64xf32, #tpu.memory_space<vmem>>, vector<80x64xf32>
    tpu.vector_store %arg6[%c0, %c0_0], %0 {strides = array<i32>} : memref<80x64xf32, #tpu.memory_space<vmem>>, vector<80x64xf32>,
    %c0_1 = arith.constant 0 : index
    %c0_2 = arith.constant 0 : index
    %2 = vector.load %arg1[%c0_1, %c0_2] : memref<80x36xf32, #tpu.memory_space<vmem>>, vector<80x36xf32>
    %3 = vector.extract_strided_slice %2 {offsets = [0, 0], sizes = [78, 36], strides = [1, 1]} : vector<80x36xf32> to vector<78x36xf32>
    %c0_3 = arith.constant 0 : index
    %c0_4 = arith.constant 0 : index
    %4 = vector.load %arg2[%c0_3, %c0_4] : memref<72x64xf32, #tpu.memory_space<vmem>>, vector<36x64xf32>
    %cst_5 = arith.constant dense<0.000000e+00> : vector<78x64xf32>
    %5 = tpu.matmul %3, %4, %cst_5 {dimension_numbers = #tpu.dot_dimension_numbers<[1], [0], [0], [1], [0, 0, 1, 1], [], []>} : vector<78x36xf32>, vector<36x64xf32>, vector<78x64xf32> -> vector<78x64xf32>
    %6 = vector.extract_strided_slice %2 {offsets = [1, 0], sizes = [78, 36], strides = [1, 1]} : vector<80x36xf32> to vector<78x36xf32>
    %c36 = arith.constant 36 : index
    %c0_6 = arith.constant 0 : index
    %7 = vector.load %arg2[%c36, %c0_6] : memref<72x64xf32, #tpu.memory_space<vmem>>, vector<36x64xf32>
    %cst_7 = arith.constant dense<0.000000e+00> : vector<78x64xf32>
    %8 = tpu.matmul %6, %7, %cst_7 {dimension_numbers = #tpu.dot_dimension_numbers<[1], [0], [0], [1], [0, 0, 1, 1], [], []>} : vector<78x36xf32>, vector<36x64xf32>, vector<78x64xf32> -> vector<78x64xf32>
    %9 = arith.addf %5, %8 : vector<78x64xf32>
    %c0_8 = arith.constant 0 : index
    %c0_9 = arith.constant 0 : index
    %10 = vector.load %arg4[%c0_8, %c0_9] : memref<4x64xf32, #tpu.memory_space<vmem>>, vector<1x64xf32>
    %11 = vector.broadcast %10 : vector<1x64xf32> to vector<78x64xf32>
    %12 = arith.addf %9, %11 : vector<78x64xf32>
    %cst_10 = arith.constant 0.000000e+00 : f32
    %13 = vector.broadcast %cst_10 : f32 to vector<78x64xf32>
    %14 = arith.maximumf %12, %13 : vector<78x64xf32>
    %15 = vector.extract_strided_slice %14 {offsets = [0, 0], sizes = [8, 64], strides = [1, 1]} : vector<78x64xf32> to vector<8x64xf32>
    %c1 = arith.constant 1 : index
    %c0_11 = arith.constant 0 : index
    %16 = vector.load %arg6[%c1, %c0_11] : memref<80x64xf32, #tpu.memory_space<vmem>>, vector<8x64xf32>
    tpu.vector_store %arg6[%c1, %c0_11], %15 {strides = array<i32>} : memref<80x64xf32, #tpu.memory_space<vmem>>, vector<8x64xf32>,
    %17 = vector.extract_strided_slice %14 {offsets = [10, 0], sizes = [8, 64], strides = [1, 1]} : vector<78x64xf32> to vector<8x64xf32>
    %c11 = arith.constant 11 : index
    %c0_12 = arith.constant 0 : index
    %18 = vector.load %arg6[%c11, %c0_12] : memref<80x64xf32, #tpu.memory_space<vmem>>, vector<8x64xf32>
    tpu.vector_store %arg6[%c11, %c0_12], %17 {strides = array<i32>} : memref<80x64xf32, #tpu.memory_space<vmem>>, vector<8x64xf32>,
    %19 = vector.extract_strided_slice %14 {offsets = [20, 0], sizes = [8, 64], strides = [1, 1]} : vector<78x64xf32> to vector<8x64xf32>
    %c21 = arith.constant 21 : index
    %c0_13 = arith.constant 0 : index
    %20 = vector.load %arg6[%c21, %c0_13] : memref<80x64xf32, #tpu.memory_space<vmem>>, vector<8x64xf32>
    tpu.vector_store %arg6[%c21, %c0_13], %19 {strides = array<i32>} : memref<80x64xf32, #tpu.memory_space<vmem>>, vector<8x64xf32>,
    %21 = vector.extract_strided_slice %14 {offsets = [30, 0], sizes = [8, 64], strides = [1, 1]} : vector<78x64xf32> to vector<8x64xf32>
    %c31 = arith.constant 31 : index
    %c0_14 = arith.constant 0 : index
    %22 = vector.load %arg6[%c31, %c0_14] : memref<80x64xf32, #tpu.memory_space<vmem>>, vector<8x64xf32>
    tpu.vector_store %arg6[%c31, %c0_14], %21 {strides = array<i32>} : memref<80x64xf32, #tpu.memory_space<vmem>>, vector<8x64xf32>,
    %23 = vector.extract_strided_slice %14 {offsets = [40, 0], sizes = [8, 64], strides = [1, 1]} : vector<78x64xf32> to vector<8x64xf32>
    %c41 = arith.constant 41 : index
    %c0_15 = arith.constant 0 : index
    %24 = vector.load %arg6[%c41, %c0_15] : memref<80x64xf32, #tpu.memory_space<vmem>>, vector<8x64xf32>
    tpu.vector_store %arg6[%c41, %c0_15], %23 {strides = array<i32>} : memref<80x64xf32, #tpu.memory_space<vmem>>, vector<8x64xf32>,
    %25 = vector.extract_strided_slice %14 {offsets = [50, 0], sizes = [8, 64], strides = [1, 1]} : vector<78x64xf32> to vector<8x64xf32>
    %c51 = arith.constant 51 : index
    %c0_16 = arith.constant 0 : index
    %26 = vector.load %arg6[%c51, %c0_16] : memref<80x64xf32, #tpu.memory_space<vmem>>, vector<8x64xf32>
    tpu.vector_store %arg6[%c51, %c0_16], %25 {strides = array<i32>} : memref<80x64xf32, #tpu.memory_space<vmem>>, vector<8x64xf32>,
    %27 = vector.extract_strided_slice %14 {offsets = [60, 0], sizes = [8, 64], strides = [1, 1]} : vector<78x64xf32> to vector<8x64xf32>
    %c61 = arith.constant 61 : index
    %c0_17 = arith.constant 0 : index
    %28 = vector.load %arg6[%c61, %c0_17] : memref<80x64xf32, #tpu.memory_space<vmem>>, vector<8x64xf32>
    tpu.vector_store %arg6[%c61, %c0_17], %27 {strides = array<i32>} : memref<80x64xf32, #tpu.memory_space<vmem>>, vector<8x64xf32>,
    %29 = vector.extract_strided_slice %14 {offsets = [70, 0], sizes = [8, 64], strides = [1, 1]} : vector<78x64xf32> to vector<8x64xf32>
    %c71 = arith.constant 71 : index
    %c0_18 = arith.constant 0 : index
    %30 = vector.load %arg6[%c71, %c0_18] : memref<80x64xf32, #tpu.memory_space<vmem>>, vector<8x64xf32>
    tpu.vector_store %arg6[%c71, %c0_18], %29 {strides = array<i32>} : memref<80x64xf32, #tpu.memory_space<vmem>>, vector<8x64xf32>,
    %c0_19 = arith.constant 0 : index
    %c0_20 = arith.constant 0 : index
    %31 = vector.load %arg6[%c0_19, %c0_20] : memref<80x64xf32, #tpu.memory_space<vmem>>, vector<80x64xf32>
    %32 = vector.extract_strided_slice %31 {offsets = [0, 0], sizes = [78, 64], strides = [1, 1]} : vector<80x64xf32> to vector<78x64xf32>
    %c0_21 = arith.constant 0 : index
    %c0_22 = arith.constant 0 : index
    %33 = vector.load %arg3[%c0_21, %c0_22] : memref<576x64xf32, #tpu.memory_space<vmem>>, vector<64x64xf32>
    %cst_23 = arith.constant dense<0.000000e+00> : vector<78x64xf32>
    %34 = tpu.matmul %32, %33, %cst_23 {dimension_numbers = #tpu.dot_dimension_numbers<[1], [0], [0], [1], [0, 0, 1, 1], [], []>} : vector<78x64xf32>, vector<64x64xf32>, vector<78x64xf32> -> vector<78x64xf32>
    %35 = vector.extract_strided_slice %31 {offsets = [1, 0], sizes = [78, 64], strides = [1, 1]} : vector<80x64xf32> to vector<78x64xf32>
    %c64 = arith.constant 64 : index
    %c0_24 = arith.constant 0 : index
    %36 = vector.load %arg3[%c64, %c0_24] : memref<576x64xf32, #tpu.memory_space<vmem>>, vector<64x64xf32>
    %cst_25 = arith.constant dense<0.000000e+00> : vector<78x64xf32>
    %37 = tpu.matmul %35, %36, %cst_25 {dimension_numbers = #tpu.dot_dimension_numbers<[1], [0], [0], [1], [0, 0, 1, 1], [], []>} : vector<78x64xf32>, vector<64x64xf32>, vector<78x64xf32> -> vector<78x64xf32>
    %38 = arith.addf %34, %37 : vector<78x64xf32>
    %39 = vector.extract_strided_slice %31 {offsets = [2, 0], sizes = [78, 64], strides = [1, 1]} : vector<80x64xf32> to vector<78x64xf32>
    %c128 = arith.constant 128 : index
    %c0_26 = arith.constant 0 : index
    %40 = vector.load %arg3[%c128, %c0_26] : memref<576x64xf32, #tpu.memory_space<vmem>>, vector<64x64xf32>
    %cst_27 = arith.constant dense<0.000000e+00> : vector<78x64xf32>
    %41 = tpu.matmul %39, %40, %cst_27 {dimension_numbers = #tpu.dot_dimension_numbers<[1], [0], [0], [1], [0, 0, 1, 1], [], []>} : vector<78x64xf32>, vector<64x64xf32>, vector<78x64xf32> -> vector<78x64xf32>
    %42 = arith.addf %38, %41 : vector<78x64xf32>
    %c1_28 = arith.constant 1 : index
    %c0_29 = arith.constant 0 : index
    %43 = vector.load %arg4[%c1_28, %c0_29] : memref<4x64xf32, #tpu.memory_space<vmem>>, vector<1x64xf32>
    %44 = vector.broadcast %43 : vector<1x64xf32> to vector<78x64xf32>
    %45 = arith.addf %42, %44 : vector<78x64xf32>
    %cst_30 = arith.constant 0.000000e+00 : f32
    %46 = vector.broadcast %cst_30 : f32 to vector<78x64xf32>
    %47 = arith.maximumf %45, %46 : vector<78x64xf32>
    %48 = vector.extract_strided_slice %47 {offsets = [0, 0], sizes = [8, 64], strides = [1, 1]} : vector<78x64xf32> to vector<8x64xf32>
    %c1_31 = arith.constant 1 : index
    %c0_32 = arith.constant 0 : index
    %49 = vector.load %arg6[%c1_31, %c0_32] : memref<80x64xf32, #tpu.memory_space<vmem>>, vector<8x64xf32>
    tpu.vector_store %arg6[%c1_31, %c0_32], %48 {strides = array<i32>} : memref<80x64xf32, #tpu.memory_space<vmem>>, vector<8x64xf32>,
    %50 = vector.extract_strided_slice %47 {offsets = [10, 0], sizes = [8, 64], strides = [1, 1]} : vector<78x64xf32> to vector<8x64xf32>
    %c11_33 = arith.constant 11 : index
    %c0_34 = arith.constant 0 : index
    %51 = vector.load %arg6[%c11_33, %c0_34] : memref<80x64xf32, #tpu.memory_space<vmem>>, vector<8x64xf32>
    tpu.vector_store %arg6[%c11_33, %c0_34], %50 {strides = array<i32>} : memref<80x64xf32, #tpu.memory_space<vmem>>, vector<8x64xf32>,
    %52 = vector.extract_strided_slice %47 {offsets = [20, 0], sizes = [8, 64], strides = [1, 1]} : vector<78x64xf32> to vector<8x64xf32>
    %c21_35 = arith.constant 21 : index
    %c0_36 = arith.constant 0 : index
    %53 = vector.load %arg6[%c21_35, %c0_36] : memref<80x64xf32, #tpu.memory_space<vmem>>, vector<8x64xf32>
    tpu.vector_store %arg6[%c21_35, %c0_36], %52 {strides = array<i32>} : memref<80x64xf32, #tpu.memory_space<vmem>>, vector<8x64xf32>,
    %54 = vector.extract_strided_slice %47 {offsets = [30, 0], sizes = [8, 64], strides = [1, 1]} : vector<78x64xf32> to vector<8x64xf32>
    %c31_37 = arith.constant 31 : index
    %c0_38 = arith.constant 0 : index
    %55 = vector.load %arg6[%c31_37, %c0_38] : memref<80x64xf32, #tpu.memory_space<vmem>>, vector<8x64xf32>
    tpu.vector_store %arg6[%c31_37, %c0_38], %54 {strides = array<i32>} : memref<80x64xf32, #tpu.memory_space<vmem>>, vector<8x64xf32>,
    %56 = vector.extract_strided_slice %47 {offsets = [40, 0], sizes = [8, 64], strides = [1, 1]} : vector<78x64xf32> to vector<8x64xf32>
    %c41_39 = arith.constant 41 : index
    %c0_40 = arith.constant 0 : index
    %57 = vector.load %arg6[%c41_39, %c0_40] : memref<80x64xf32, #tpu.memory_space<vmem>>, vector<8x64xf32>
    tpu.vector_store %arg6[%c41_39, %c0_40], %56 {strides = array<i32>} : memref<80x64xf32, #tpu.memory_space<vmem>>, vector<8x64xf32>,
    %58 = vector.extract_strided_slice %47 {offsets = [50, 0], sizes = [8, 64], strides = [1, 1]} : vector<78x64xf32> to vector<8x64xf32>
    %c51_41 = arith.constant 51 : index
    %c0_42 = arith.constant 0 : index
    %59 = vector.load %arg6[%c51_41, %c0_42] : memref<80x64xf32, #tpu.memory_space<vmem>>, vector<8x64xf32>
    tpu.vector_store %arg6[%c51_41, %c0_42], %58 {strides = array<i32>} : memref<80x64xf32, #tpu.memory_space<vmem>>, vector<8x64xf32>,
    %60 = vector.extract_strided_slice %47 {offsets = [60, 0], sizes = [8, 64], strides = [1, 1]} : vector<78x64xf32> to vector<8x64xf32>
    %c61_43 = arith.constant 61 : index
    %c0_44 = arith.constant 0 : index
    %61 = vector.load %arg6[%c61_43, %c0_44] : memref<80x64xf32, #tpu.memory_space<vmem>>, vector<8x64xf32>
    tpu.vector_store %arg6[%c61_43, %c0_44], %60 {strides = array<i32>} : memref<80x64xf32, #tpu.memory_space<vmem>>, vector<8x64xf32>,
    %62 = vector.extract_strided_slice %47 {offsets = [70, 0], sizes = [8, 64], strides = [1, 1]} : vector<78x64xf32> to vector<8x64xf32>
    %c71_45 = arith.constant 71 : index
    %c0_46 = arith.constant 0 : index
    %63 = vector.load %arg6[%c71_45, %c0_46] : memref<80x64xf32, #tpu.memory_space<vmem>>, vector<8x64xf32>
    tpu.vector_store %arg6[%c71_45, %c0_46], %62 {strides = array<i32>} : memref<80x64xf32, #tpu.memory_space<vmem>>, vector<8x64xf32>,
    %c0_47 = arith.constant 0 : index
    %c0_48 = arith.constant 0 : index
    %64 = vector.load %arg6[%c0_47, %c0_48] : memref<80x64xf32, #tpu.memory_space<vmem>>, vector<80x64xf32>
    %65 = vector.extract_strided_slice %64 {offsets = [0, 0], sizes = [78, 64], strides = [1, 1]} : vector<80x64xf32> to vector<78x64xf32>
    %c192 = arith.constant 192 : index
    %c0_49 = arith.constant 0 : index
    %66 = vector.load %arg3[%c192, %c0_49] : memref<576x64xf32, #tpu.memory_space<vmem>>, vector<64x64xf32>
    %cst_50 = arith.constant dense<0.000000e+00> : vector<78x64xf32>
    %67 = tpu.matmul %65, %66, %cst_50 {dimension_numbers = #tpu.dot_dimension_numbers<[1], [0], [0], [1], [0, 0, 1, 1], [], []>} : vector<78x64xf32>, vector<64x64xf32>, vector<78x64xf32> -> vector<78x64xf32>
    %68 = vector.extract_strided_slice %64 {offsets = [1, 0], sizes = [78, 64], strides = [1, 1]} : vector<80x64xf32> to vector<78x64xf32>
    %c256 = arith.constant 256 : index
    %c0_51 = arith.constant 0 : index
    %69 = vector.load %arg3[%c256, %c0_51] : memref<576x64xf32, #tpu.memory_space<vmem>>, vector<64x64xf32>
    %cst_52 = arith.constant dense<0.000000e+00> : vector<78x64xf32>
    %70 = tpu.matmul %68, %69, %cst_52 {dimension_numbers = #tpu.dot_dimension_numbers<[1], [0], [0], [1], [0, 0, 1, 1], [], []>} : vector<78x64xf32>, vector<64x64xf32>, vector<78x64xf32> -> vector<78x64xf32>
    %71 = arith.addf %67, %70 : vector<78x64xf32>
    %72 = vector.extract_strided_slice %64 {offsets = [2, 0], sizes = [78, 64], strides = [1, 1]} : vector<80x64xf32> to vector<78x64xf32>
    %c320 = arith.constant 320 : index
    %c0_53 = arith.constant 0 : index
    %73 = vector.load %arg3[%c320, %c0_53] : memref<576x64xf32, #tpu.memory_space<vmem>>, vector<64x64xf32>
    %cst_54 = arith.constant dense<0.000000e+00> : vector<78x64xf32>
    %74 = tpu.matmul %72, %73, %cst_54 {dimension_numbers = #tpu.dot_dimension_numbers<[1], [0], [0], [1], [0, 0, 1, 1], [], []>} : vector<78x64xf32>, vector<64x64xf32>, vector<78x64xf32> -> vector<78x64xf32>
    %75 = arith.addf %71, %74 : vector<78x64xf32>
    %c2 = arith.constant 2 : index
    %c0_55 = arith.constant 0 : index
    %76 = vector.load %arg4[%c2, %c0_55] : memref<4x64xf32, #tpu.memory_space<vmem>>, vector<1x64xf32>
    %77 = vector.broadcast %76 : vector<1x64xf32> to vector<78x64xf32>
    %78 = arith.addf %75, %77 : vector<78x64xf32>
    %cst_56 = arith.constant 0.000000e+00 : f32
    %79 = vector.broadcast %cst_56 : f32 to vector<78x64xf32>
    %80 = arith.maximumf %78, %79 : vector<78x64xf32>
    %81 = vector.extract_strided_slice %80 {offsets = [0, 0], sizes = [8, 64], strides = [1, 1]} : vector<78x64xf32> to vector<8x64xf32>
    %c1_57 = arith.constant 1 : index
    %c0_58 = arith.constant 0 : index
    %82 = vector.load %arg6[%c1_57, %c0_58] : memref<80x64xf32, #tpu.memory_space<vmem>>, vector<8x64xf32>
    tpu.vector_store %arg6[%c1_57, %c0_58], %81 {strides = array<i32>} : memref<80x64xf32, #tpu.memory_space<vmem>>, vector<8x64xf32>,
    %83 = vector.extract_strided_slice %80 {offsets = [10, 0], sizes = [8, 64], strides = [1, 1]} : vector<78x64xf32> to vector<8x64xf32>
    %c11_59 = arith.constant 11 : index
    %c0_60 = arith.constant 0 : index
    %84 = vector.load %arg6[%c11_59, %c0_60] : memref<80x64xf32, #tpu.memory_space<vmem>>, vector<8x64xf32>
    tpu.vector_store %arg6[%c11_59, %c0_60], %83 {strides = array<i32>} : memref<80x64xf32, #tpu.memory_space<vmem>>, vector<8x64xf32>,
    %85 = vector.extract_strided_slice %80 {offsets = [20, 0], sizes = [8, 64], strides = [1, 1]} : vector<78x64xf32> to vector<8x64xf32>
    %c21_61 = arith.constant 21 : index
    %c0_62 = arith.constant 0 : index
    %86 = vector.load %arg6[%c21_61, %c0_62] : memref<80x64xf32, #tpu.memory_space<vmem>>, vector<8x64xf32>
    tpu.vector_store %arg6[%c21_61, %c0_62], %85 {strides = array<i32>} : memref<80x64xf32, #tpu.memory_space<vmem>>, vector<8x64xf32>,
    %87 = vector.extract_strided_slice %80 {offsets = [30, 0], sizes = [8, 64], strides = [1, 1]} : vector<78x64xf32> to vector<8x64xf32>
    %c31_63 = arith.constant 31 : index
    %c0_64 = arith.constant 0 : index
    %88 = vector.load %arg6[%c31_63, %c0_64] : memref<80x64xf32, #tpu.memory_space<vmem>>, vector<8x64xf32>
    tpu.vector_store %arg6[%c31_63, %c0_64], %87 {strides = array<i32>} : memref<80x64xf32, #tpu.memory_space<vmem>>, vector<8x64xf32>,
    %89 = vector.extract_strided_slice %80 {offsets = [40, 0], sizes = [8, 64], strides = [1, 1]} : vector<78x64xf32> to vector<8x64xf32>
    %c41_65 = arith.constant 41 : index
    %c0_66 = arith.constant 0 : index
    %90 = vector.load %arg6[%c41_65, %c0_66] : memref<80x64xf32, #tpu.memory_space<vmem>>, vector<8x64xf32>
    tpu.vector_store %arg6[%c41_65, %c0_66], %89 {strides = array<i32>} : memref<80x64xf32, #tpu.memory_space<vmem>>, vector<8x64xf32>,
    %91 = vector.extract_strided_slice %80 {offsets = [50, 0], sizes = [8, 64], strides = [1, 1]} : vector<78x64xf32> to vector<8x64xf32>
    %c51_67 = arith.constant 51 : index
    %c0_68 = arith.constant 0 : index
    %92 = vector.load %arg6[%c51_67, %c0_68] : memref<80x64xf32, #tpu.memory_space<vmem>>, vector<8x64xf32>
    tpu.vector_store %arg6[%c51_67, %c0_68], %91 {strides = array<i32>} : memref<80x64xf32, #tpu.memory_space<vmem>>, vector<8x64xf32>,
    %93 = vector.extract_strided_slice %80 {offsets = [60, 0], sizes = [8, 64], strides = [1, 1]} : vector<78x64xf32> to vector<8x64xf32>
    %c61_69 = arith.constant 61 : index
    %c0_70 = arith.constant 0 : index
    %94 = vector.load %arg6[%c61_69, %c0_70] : memref<80x64xf32, #tpu.memory_space<vmem>>, vector<8x64xf32>
    tpu.vector_store %arg6[%c61_69, %c0_70], %93 {strides = array<i32>} : memref<80x64xf32, #tpu.memory_space<vmem>>, vector<8x64xf32>,
    %95 = vector.extract_strided_slice %80 {offsets = [70, 0], sizes = [8, 64], strides = [1, 1]} : vector<78x64xf32> to vector<8x64xf32>
    %c71_71 = arith.constant 71 : index
    %c0_72 = arith.constant 0 : index
    %96 = vector.load %arg6[%c71_71, %c0_72] : memref<80x64xf32, #tpu.memory_space<vmem>>, vector<8x64xf32>
    tpu.vector_store %arg6[%c71_71, %c0_72], %95 {strides = array<i32>} : memref<80x64xf32, #tpu.memory_space<vmem>>, vector<8x64xf32>,
    %c0_73 = arith.constant 0 : index
    %c0_74 = arith.constant 0 : index
    %97 = vector.load %arg6[%c0_73, %c0_74] : memref<80x64xf32, #tpu.memory_space<vmem>>, vector<80x64xf32>
    %98 = vector.extract_strided_slice %97 {offsets = [0, 0], sizes = [78, 64], strides = [1, 1]} : vector<80x64xf32> to vector<78x64xf32>
    %c384 = arith.constant 384 : index
    %c0_75 = arith.constant 0 : index
    %99 = vector.load %arg3[%c384, %c0_75] : memref<576x64xf32, #tpu.memory_space<vmem>>, vector<64x64xf32>
    %cst_76 = arith.constant dense<0.000000e+00> : vector<78x64xf32>
    %100 = tpu.matmul %98, %99, %cst_76 {dimension_numbers = #tpu.dot_dimension_numbers<[1], [0], [0], [1], [0, 0, 1, 1], [], []>} : vector<78x64xf32>, vector<64x64xf32>, vector<78x64xf32> -> vector<78x64xf32>
    %101 = vector.extract_strided_slice %97 {offsets = [1, 0], sizes = [78, 64], strides = [1, 1]} : vector<80x64xf32> to vector<78x64xf32>
    %c448 = arith.constant 448 : index
    %c0_77 = arith.constant 0 : index
    %102 = vector.load %arg3[%c448, %c0_77] : memref<576x64xf32, #tpu.memory_space<vmem>>, vector<64x64xf32>
    %cst_78 = arith.constant dense<0.000000e+00> : vector<78x64xf32>
    %103 = tpu.matmul %101, %102, %cst_78 {dimension_numbers = #tpu.dot_dimension_numbers<[1], [0], [0], [1], [0, 0, 1, 1], [], []>} : vector<78x64xf32>, vector<64x64xf32>, vector<78x64xf32> -> vector<78x64xf32>
    %104 = arith.addf %100, %103 : vector<78x64xf32>
    %105 = vector.extract_strided_slice %97 {offsets = [2, 0], sizes = [78, 64], strides = [1, 1]} : vector<80x64xf32> to vector<78x64xf32>
    %c512 = arith.constant 512 : index
    %c0_79 = arith.constant 0 : index
    %106 = vector.load %arg3[%c512, %c0_79] : memref<576x64xf32, #tpu.memory_space<vmem>>, vector<64x64xf32>
    %cst_80 = arith.constant dense<0.000000e+00> : vector<78x64xf32>
    %107 = tpu.matmul %105, %106, %cst_80 {dimension_numbers = #tpu.dot_dimension_numbers<[1], [0], [0], [1], [0, 0, 1, 1], [], []>} : vector<78x64xf32>, vector<64x64xf32>, vector<78x64xf32> -> vector<78x64xf32>
    %108 = arith.addf %104, %107 : vector<78x64xf32>
    %c3 = arith.constant 3 : index
    %c0_81 = arith.constant 0 : index
    %109 = vector.load %arg4[%c3, %c0_81] : memref<4x64xf32, #tpu.memory_space<vmem>>, vector<1x64xf32>
    %110 = vector.broadcast %109 : vector<1x64xf32> to vector<78x64xf32>
    %111 = arith.addf %108, %110 : vector<78x64xf32>
    %cst_82 = arith.constant 0.000000e+00 : f32
    %112 = vector.broadcast %cst_82 : f32 to vector<78x64xf32>
    %113 = arith.maximumf %111, %112 : vector<78x64xf32>
    %114 = vector.extract_strided_slice %113 {offsets = [0, 0], sizes = [8, 64], strides = [1, 1]} : vector<78x64xf32> to vector<8x64xf32>
    %c0_83 = arith.constant 0 : index
    %c0_84 = arith.constant 0 : index
    %115 = vector.load %arg5[%c0_83, %c0_84] : memref<64x64xf32, #tpu.memory_space<vmem>>, vector<8x64xf32>
    tpu.vector_store %arg5[%c0_83, %c0_84], %114 {strides = array<i32>} : memref<64x64xf32, #tpu.memory_space<vmem>>, vector<8x64xf32>,
    %116 = vector.extract_strided_slice %113 {offsets = [10, 0], sizes = [8, 64], strides = [1, 1]} : vector<78x64xf32> to vector<8x64xf32>
    %c8 = arith.constant 8 : index
    %c0_85 = arith.constant 0 : index
    %117 = vector.load %arg5[%c8, %c0_85] : memref<64x64xf32, #tpu.memory_space<vmem>>, vector<8x64xf32>
    tpu.vector_store %arg5[%c8, %c0_85], %116 {strides = array<i32>} : memref<64x64xf32, #tpu.memory_space<vmem>>, vector<8x64xf32>,
    %118 = vector.extract_strided_slice %113 {offsets = [20, 0], sizes = [8, 64], strides = [1, 1]} : vector<78x64xf32> to vector<8x64xf32>
    %c16 = arith.constant 16 : index
    %c0_86 = arith.constant 0 : index
    %119 = vector.load %arg5[%c16, %c0_86] : memref<64x64xf32, #tpu.memory_space<vmem>>, vector<8x64xf32>
    tpu.vector_store %arg5[%c16, %c0_86], %118 {strides = array<i32>} : memref<64x64xf32, #tpu.memory_space<vmem>>, vector<8x64xf32>,
    %120 = vector.extract_strided_slice %113 {offsets = [30, 0], sizes = [8, 64], strides = [1, 1]} : vector<78x64xf32> to vector<8x64xf32>
    %c24 = arith.constant 24 : index
    %c0_87 = arith.constant 0 : index
    %121 = vector.load %arg5[%c24, %c0_87] : memref<64x64xf32, #tpu.memory_space<vmem>>, vector<8x64xf32>
    tpu.vector_store %arg5[%c24, %c0_87], %120 {strides = array<i32>} : memref<64x64xf32, #tpu.memory_space<vmem>>, vector<8x64xf32>,
    %122 = vector.extract_strided_slice %113 {offsets = [40, 0], sizes = [8, 64], strides = [1, 1]} : vector<78x64xf32> to vector<8x64xf32>
    %c32 = arith.constant 32 : index
    %c0_88 = arith.constant 0 : index
    %123 = vector.load %arg5[%c32, %c0_88] : memref<64x64xf32, #tpu.memory_space<vmem>>, vector<8x64xf32>
    tpu.vector_store %arg5[%c32, %c0_88], %122 {strides = array<i32>} : memref<64x64xf32, #tpu.memory_space<vmem>>, vector<8x64xf32>,
    %124 = vector.extract_strided_slice %113 {offsets = [50, 0], sizes = [8, 64], strides = [1, 1]} : vector<78x64xf32> to vector<8x64xf32>
    %c40 = arith.constant 40 : index
    %c0_89 = arith.constant 0 : index
    %125 = vector.load %arg5[%c40, %c0_89] : memref<64x64xf32, #tpu.memory_space<vmem>>, vector<8x64xf32>
    tpu.vector_store %arg5[%c40, %c0_89], %124 {strides = array<i32>} : memref<64x64xf32, #tpu.memory_space<vmem>>, vector<8x64xf32>,
    %126 = vector.extract_strided_slice %113 {offsets = [60, 0], sizes = [8, 64], strides = [1, 1]} : vector<78x64xf32> to vector<8x64xf32>
    %c48 = arith.constant 48 : index
    %c0_90 = arith.constant 0 : index
    %127 = vector.load %arg5[%c48, %c0_90] : memref<64x64xf32, #tpu.memory_space<vmem>>, vector<8x64xf32>
    tpu.vector_store %arg5[%c48, %c0_90], %126 {strides = array<i32>} : memref<64x64xf32, #tpu.memory_space<vmem>>, vector<8x64xf32>,
    %128 = vector.extract_strided_slice %113 {offsets = [70, 0], sizes = [8, 64], strides = [1, 1]} : vector<78x64xf32> to vector<8x64xf32>
    %c56 = arith.constant 56 : index
    %c0_91 = arith.constant 0 : index
    %129 = vector.load %arg5[%c56, %c0_91] : memref<64x64xf32, #tpu.memory_space<vmem>>, vector<8x64xf32>
    tpu.vector_store %arg5[%c56, %c0_91], %128 {strides = array<i32>} : memref<64x64xf32, #tpu.memory_space<vmem>>, vector<8x64xf32>,
    return
  }
  func.func @transform_0(%arg0: i32) -> (i32, i32) {
    %c0_i32 = arith.constant 0 : i32
    %c0_i32_0 = arith.constant 0 : i32
    return %arg0, %c0_i32 : i32, i32
  }
  func.func @transform_1(%arg0: i32) -> (i32, i32) {
    %c0_i32 = arith.constant 0 : i32
    %c0_i32_0 = arith.constant 0 : i32
    %c0_i32_1 = arith.constant 0 : i32
    return %c0_i32, %c0_i32_0 : i32, i32
  }
  func.func @transform_2(%arg0: i32) -> (i32, i32) {
    %c0_i32 = arith.constant 0 : i32
    %c0_i32_0 = arith.constant 0 : i32
    %c0_i32_1 = arith.constant 0 : i32
    return %c0_i32, %c0_i32_0 : i32, i32
  }
  func.func @transform_3(%arg0: i32) -> (i32, i32) {
    %c0_i32 = arith.constant 0 : i32
    %c0_i32_0 = arith.constant 0 : i32
    %c0_i32_1 = arith.constant 0 : i32
    return %c0_i32, %c0_i32_0 : i32, i32
  }
  func.func @transform_4(%arg0: i32) -> (i32, i32) {
    %c0_i32 = arith.constant 0 : i32
    %c0_i32_0 = arith.constant 0 : i32
    return %arg0, %c0_i32 : i32, i32
  }
}

module attributes {stable_mosaic.version = 11 : i64} {
  func.func @_head_lstm_kernel(%arg0: memref<24x512xf32, #tpu.memory_space<vmem>>, %arg1: memref<512x32xf32, #tpu.memory_space<vmem>>, %arg2: memref<24x32xf32, #tpu.memory_space<vmem>>, %arg3: memref<32x128xf32, #tpu.memory_space<vmem>>, %arg4: memref<32x128xf32, #tpu.memory_space<vmem>>, %arg5: memref<1x128xf32, #tpu.memory_space<vmem>>, %arg6: memref<1x128xf32, #tpu.memory_space<vmem>>, %arg7: memref<1x128xf32, #tpu.memory_space<vmem>>, %arg8: memref<8x32xf32, #tpu.memory_space<vmem>>) attributes {dimension_semantics = [], scalar_prefetch = 0 : i64, scratch_operands = 0 : i64, tpu.core_type = #tpu.core_type<tc>} {
    %c0 = arith.constant 0 : index
    %c0_0 = arith.constant 0 : index
    %0 = vector.load %arg0[%c0, %c0_0] : memref<24x512xf32, #tpu.memory_space<vmem>>, vector<24x512xf32>
    %c0_1 = arith.constant 0 : index
    %c0_2 = arith.constant 0 : index
    %1 = vector.load %arg1[%c0_1, %c0_2] : memref<512x32xf32, #tpu.memory_space<vmem>>, vector<512x32xf32>
    %cst = arith.constant dense<0.000000e+00> : vector<24x32xf32>
    %2 = tpu.matmul %0, %1, %cst {dimension_numbers = #tpu.dot_dimension_numbers<[1], [0], [0], [1], [0, 0, 1, 1], [], []>} : vector<24x512xf32>, vector<512x32xf32>, vector<24x32xf32> -> vector<24x32xf32>
    %c0_3 = arith.constant 0 : index
    %c0_4 = arith.constant 0 : index
    %3 = vector.load %arg2[%c0_3, %c0_4] : memref<24x32xf32, #tpu.memory_space<vmem>>, vector<24x32xf32>
    %4 = arith.addf %2, %3 : vector<24x32xf32>
    %cst_5 = arith.constant 0.000000e+00 : f32
    %5 = vector.broadcast %cst_5 : f32 to vector<24x32xf32>
    %6 = arith.maximumf %4, %5 : vector<24x32xf32>
    %c0_6 = arith.constant 0 : index
    %c0_7 = arith.constant 0 : index
    %7 = vector.load %arg3[%c0_6, %c0_7] : memref<32x128xf32, #tpu.memory_space<vmem>>, vector<32x128xf32>
    %cst_8 = arith.constant dense<0.000000e+00> : vector<24x128xf32>
    %8 = tpu.matmul %6, %7, %cst_8 {dimension_numbers = #tpu.dot_dimension_numbers<[1], [0], [0], [1], [0, 0, 1, 1], [], []>} : vector<24x32xf32>, vector<32x128xf32>, vector<24x128xf32> -> vector<24x128xf32>
    %c0_9 = arith.constant 0 : index
    %c0_10 = arith.constant 0 : index
    %9 = vector.load %arg5[%c0_9, %c0_10] : memref<1x128xf32, #tpu.memory_space<vmem>>, vector<1x128xf32>
    %10 = vector.broadcast %9 : vector<1x128xf32> to vector<24x128xf32>
    %11 = arith.addf %8, %10 : vector<24x128xf32>
    %12 = vector.extract_strided_slice %11 {offsets = [0, 0], sizes = [1, 128], strides = [1, 1]} : vector<24x128xf32> to vector<1x128xf32>
    %13 = vector.shape_cast %12 : vector<1x128xf32> to vector<1x128xf32>
    %14 = vector.broadcast %13 : vector<1x128xf32> to vector<4x128xf32>
    %15 = vector.extract_strided_slice %11 {offsets = [12, 0], sizes = [1, 128], strides = [1, 1]} : vector<24x128xf32> to vector<1x128xf32>
    %16 = vector.shape_cast %15 : vector<1x128xf32> to vector<1x128xf32>
    %17 = vector.broadcast %16 : vector<1x128xf32> to vector<4x128xf32>
    %18 = tpu.concatenate %14, %17 in 0 : vector<4x128xf32>, vector<4x128xf32> -> vector<8x128xf32>
    %19 = vector.extract_strided_slice %11 {offsets = [1, 0], sizes = [1, 128], strides = [1, 1]} : vector<24x128xf32> to vector<1x128xf32>
    %20 = vector.shape_cast %19 : vector<1x128xf32> to vector<1x128xf32>
    %21 = vector.broadcast %20 : vector<1x128xf32> to vector<4x128xf32>
    %22 = vector.extract_strided_slice %11 {offsets = [13, 0], sizes = [1, 128], strides = [1, 1]} : vector<24x128xf32> to vector<1x128xf32>
    %23 = vector.shape_cast %22 : vector<1x128xf32> to vector<1x128xf32>
    %24 = vector.broadcast %23 : vector<1x128xf32> to vector<4x128xf32>
    %25 = tpu.concatenate %21, %24 in 0 : vector<4x128xf32>, vector<4x128xf32> -> vector<8x128xf32>
    %26 = vector.extract_strided_slice %11 {offsets = [2, 0], sizes = [1, 128], strides = [1, 1]} : vector<24x128xf32> to vector<1x128xf32>
    %27 = vector.shape_cast %26 : vector<1x128xf32> to vector<1x128xf32>
    %28 = vector.broadcast %27 : vector<1x128xf32> to vector<4x128xf32>
    %29 = vector.extract_strided_slice %11 {offsets = [14, 0], sizes = [1, 128], strides = [1, 1]} : vector<24x128xf32> to vector<1x128xf32>
    %30 = vector.shape_cast %29 : vector<1x128xf32> to vector<1x128xf32>
    %31 = vector.broadcast %30 : vector<1x128xf32> to vector<4x128xf32>
    %32 = tpu.concatenate %28, %31 in 0 : vector<4x128xf32>, vector<4x128xf32> -> vector<8x128xf32>
    %33 = vector.extract_strided_slice %11 {offsets = [3, 0], sizes = [1, 128], strides = [1, 1]} : vector<24x128xf32> to vector<1x128xf32>
    %34 = vector.shape_cast %33 : vector<1x128xf32> to vector<1x128xf32>
    %35 = vector.broadcast %34 : vector<1x128xf32> to vector<4x128xf32>
    %36 = vector.extract_strided_slice %11 {offsets = [15, 0], sizes = [1, 128], strides = [1, 1]} : vector<24x128xf32> to vector<1x128xf32>
    %37 = vector.shape_cast %36 : vector<1x128xf32> to vector<1x128xf32>
    %38 = vector.broadcast %37 : vector<1x128xf32> to vector<4x128xf32>
    %39 = tpu.concatenate %35, %38 in 0 : vector<4x128xf32>, vector<4x128xf32> -> vector<8x128xf32>
    %40 = vector.extract_strided_slice %11 {offsets = [4, 0], sizes = [1, 128], strides = [1, 1]} : vector<24x128xf32> to vector<1x128xf32>
    %41 = vector.shape_cast %40 : vector<1x128xf32> to vector<1x128xf32>
    %42 = vector.broadcast %41 : vector<1x128xf32> to vector<4x128xf32>
    %43 = vector.extract_strided_slice %11 {offsets = [16, 0], sizes = [1, 128], strides = [1, 1]} : vector<24x128xf32> to vector<1x128xf32>
    %44 = vector.shape_cast %43 : vector<1x128xf32> to vector<1x128xf32>
    %45 = vector.broadcast %44 : vector<1x128xf32> to vector<4x128xf32>
    %46 = tpu.concatenate %42, %45 in 0 : vector<4x128xf32>, vector<4x128xf32> -> vector<8x128xf32>
    %47 = vector.extract_strided_slice %11 {offsets = [5, 0], sizes = [1, 128], strides = [1, 1]} : vector<24x128xf32> to vector<1x128xf32>
    %48 = vector.shape_cast %47 : vector<1x128xf32> to vector<1x128xf32>
    %49 = vector.broadcast %48 : vector<1x128xf32> to vector<4x128xf32>
    %50 = vector.extract_strided_slice %11 {offsets = [17, 0], sizes = [1, 128], strides = [1, 1]} : vector<24x128xf32> to vector<1x128xf32>
    %51 = vector.shape_cast %50 : vector<1x128xf32> to vector<1x128xf32>
    %52 = vector.broadcast %51 : vector<1x128xf32> to vector<4x128xf32>
    %53 = tpu.concatenate %49, %52 in 0 : vector<4x128xf32>, vector<4x128xf32> -> vector<8x128xf32>
    %54 = vector.extract_strided_slice %11 {offsets = [6, 0], sizes = [1, 128], strides = [1, 1]} : vector<24x128xf32> to vector<1x128xf32>
    %55 = vector.shape_cast %54 : vector<1x128xf32> to vector<1x128xf32>
    %56 = vector.broadcast %55 : vector<1x128xf32> to vector<4x128xf32>
    %57 = vector.extract_strided_slice %11 {offsets = [18, 0], sizes = [1, 128], strides = [1, 1]} : vector<24x128xf32> to vector<1x128xf32>
    %58 = vector.shape_cast %57 : vector<1x128xf32> to vector<1x128xf32>
    %59 = vector.broadcast %58 : vector<1x128xf32> to vector<4x128xf32>
    %60 = tpu.concatenate %56, %59 in 0 : vector<4x128xf32>, vector<4x128xf32> -> vector<8x128xf32>
    %61 = vector.extract_strided_slice %11 {offsets = [7, 0], sizes = [1, 128], strides = [1, 1]} : vector<24x128xf32> to vector<1x128xf32>
    %62 = vector.shape_cast %61 : vector<1x128xf32> to vector<1x128xf32>
    %63 = vector.broadcast %62 : vector<1x128xf32> to vector<4x128xf32>
    %64 = vector.extract_strided_slice %11 {offsets = [19, 0], sizes = [1, 128], strides = [1, 1]} : vector<24x128xf32> to vector<1x128xf32>
    %65 = vector.shape_cast %64 : vector<1x128xf32> to vector<1x128xf32>
    %66 = vector.broadcast %65 : vector<1x128xf32> to vector<4x128xf32>
    %67 = tpu.concatenate %63, %66 in 0 : vector<4x128xf32>, vector<4x128xf32> -> vector<8x128xf32>
    %68 = vector.extract_strided_slice %11 {offsets = [8, 0], sizes = [4, 128], strides = [1, 1]} : vector<24x128xf32> to vector<4x128xf32>
    %69 = vector.extract_strided_slice %11 {offsets = [20, 0], sizes = [4, 128], strides = [1, 1]} : vector<24x128xf32> to vector<4x128xf32>
    %70 = tpu.concatenate %68, %69 in 0 : vector<4x128xf32>, vector<4x128xf32> -> vector<8x128xf32>
    %c0_11 = arith.constant 0 : index
    %c0_12 = arith.constant 0 : index
    %71 = vector.load %arg4[%c0_11, %c0_12] : memref<32x128xf32, #tpu.memory_space<vmem>>, vector<32x128xf32>
    %c0_13 = arith.constant 0 : index
    %c0_14 = arith.constant 0 : index
    %72 = vector.load %arg6[%c0_13, %c0_14] : memref<1x128xf32, #tpu.memory_space<vmem>>, vector<1x128xf32>
    %c0_15 = arith.constant 0 : index
    %c0_16 = arith.constant 0 : index
    %73 = vector.load %arg7[%c0_15, %c0_16] : memref<1x128xf32, #tpu.memory_space<vmem>>, vector<1x128xf32>
    %cst_17 = arith.constant 0.000000e+00 : f32
    %74 = vector.broadcast %cst_17 : f32 to vector<8x32xf32>
    %cst_18 = arith.constant 0.000000e+00 : f32
    %75 = vector.broadcast %cst_18 : f32 to vector<8x32xf32>
    %cst_19 = arith.constant dense<0.000000e+00> : vector<8x128xf32>
    %76 = tpu.matmul %74, %71, %cst_19 {dimension_numbers = #tpu.dot_dimension_numbers<[1], [0], [0], [1], [0, 0, 1, 1], [], []>} : vector<8x32xf32>, vector<32x128xf32>, vector<8x128xf32> -> vector<8x128xf32>
    %77 = arith.addf %18, %76 : vector<8x128xf32>
    %78 = vector.broadcast %72 : vector<1x128xf32> to vector<8x128xf32>
    %79 = arith.mulf %77, %78 : vector<8x128xf32>
    %80 = math.tanh %79 : vector<8x128xf32>
    %81 = vector.broadcast %72 : vector<1x128xf32> to vector<8x128xf32>
    %82 = arith.mulf %80, %81 : vector<8x128xf32>
    %83 = vector.broadcast %73 : vector<1x128xf32> to vector<8x128xf32>
    %84 = arith.addf %82, %83 : vector<8x128xf32>
    %85 = vector.extract_strided_slice %84 {offsets = [0, 0], sizes = [8, 32], strides = [1, 1]} : vector<8x128xf32> to vector<8x32xf32>
    %86 = vector.extract_strided_slice %84 {offsets = [0, 32], sizes = [8, 32], strides = [1, 1]} : vector<8x128xf32> to vector<8x32xf32>
    %87 = vector.extract_strided_slice %84 {offsets = [0, 64], sizes = [8, 32], strides = [1, 1]} : vector<8x128xf32> to vector<8x32xf32>
    %88 = vector.extract_strided_slice %84 {offsets = [0, 96], sizes = [8, 32], strides = [1, 1]} : vector<8x128xf32> to vector<8x32xf32>
    %89 = arith.mulf %86, %75 : vector<8x32xf32>
    %90 = arith.mulf %85, %87 : vector<8x32xf32>
    %91 = arith.addf %89, %90 : vector<8x32xf32>
    %92 = math.tanh %91 : vector<8x32xf32>
    %93 = arith.mulf %88, %92 : vector<8x32xf32>
    %cst_20 = arith.constant dense<0.000000e+00> : vector<8x128xf32>
    %94 = tpu.matmul %93, %71, %cst_20 {dimension_numbers = #tpu.dot_dimension_numbers<[1], [0], [0], [1], [0, 0, 1, 1], [], []>} : vector<8x32xf32>, vector<32x128xf32>, vector<8x128xf32> -> vector<8x128xf32>
    %95 = arith.addf %25, %94 : vector<8x128xf32>
    %96 = vector.broadcast %72 : vector<1x128xf32> to vector<8x128xf32>
    %97 = arith.mulf %95, %96 : vector<8x128xf32>
    %98 = math.tanh %97 : vector<8x128xf32>
    %99 = vector.broadcast %72 : vector<1x128xf32> to vector<8x128xf32>
    %100 = arith.mulf %98, %99 : vector<8x128xf32>
    %101 = vector.broadcast %73 : vector<1x128xf32> to vector<8x128xf32>
    %102 = arith.addf %100, %101 : vector<8x128xf32>
    %103 = vector.extract_strided_slice %102 {offsets = [0, 0], sizes = [8, 32], strides = [1, 1]} : vector<8x128xf32> to vector<8x32xf32>
    %104 = vector.extract_strided_slice %102 {offsets = [0, 32], sizes = [8, 32], strides = [1, 1]} : vector<8x128xf32> to vector<8x32xf32>
    %105 = vector.extract_strided_slice %102 {offsets = [0, 64], sizes = [8, 32], strides = [1, 1]} : vector<8x128xf32> to vector<8x32xf32>
    %106 = vector.extract_strided_slice %102 {offsets = [0, 96], sizes = [8, 32], strides = [1, 1]} : vector<8x128xf32> to vector<8x32xf32>
    %107 = arith.mulf %104, %91 : vector<8x32xf32>
    %108 = arith.mulf %103, %105 : vector<8x32xf32>
    %109 = arith.addf %107, %108 : vector<8x32xf32>
    %110 = math.tanh %109 : vector<8x32xf32>
    %111 = arith.mulf %106, %110 : vector<8x32xf32>
    %cst_21 = arith.constant dense<0.000000e+00> : vector<8x128xf32>
    %112 = tpu.matmul %111, %71, %cst_21 {dimension_numbers = #tpu.dot_dimension_numbers<[1], [0], [0], [1], [0, 0, 1, 1], [], []>} : vector<8x32xf32>, vector<32x128xf32>, vector<8x128xf32> -> vector<8x128xf32>
    %113 = arith.addf %32, %112 : vector<8x128xf32>
    %114 = vector.broadcast %72 : vector<1x128xf32> to vector<8x128xf32>
    %115 = arith.mulf %113, %114 : vector<8x128xf32>
    %116 = math.tanh %115 : vector<8x128xf32>
    %117 = vector.broadcast %72 : vector<1x128xf32> to vector<8x128xf32>
    %118 = arith.mulf %116, %117 : vector<8x128xf32>
    %119 = vector.broadcast %73 : vector<1x128xf32> to vector<8x128xf32>
    %120 = arith.addf %118, %119 : vector<8x128xf32>
    %121 = vector.extract_strided_slice %120 {offsets = [0, 0], sizes = [8, 32], strides = [1, 1]} : vector<8x128xf32> to vector<8x32xf32>
    %122 = vector.extract_strided_slice %120 {offsets = [0, 32], sizes = [8, 32], strides = [1, 1]} : vector<8x128xf32> to vector<8x32xf32>
    %123 = vector.extract_strided_slice %120 {offsets = [0, 64], sizes = [8, 32], strides = [1, 1]} : vector<8x128xf32> to vector<8x32xf32>
    %124 = vector.extract_strided_slice %120 {offsets = [0, 96], sizes = [8, 32], strides = [1, 1]} : vector<8x128xf32> to vector<8x32xf32>
    %125 = arith.mulf %122, %109 : vector<8x32xf32>
    %126 = arith.mulf %121, %123 : vector<8x32xf32>
    %127 = arith.addf %125, %126 : vector<8x32xf32>
    %128 = math.tanh %127 : vector<8x32xf32>
    %129 = arith.mulf %124, %128 : vector<8x32xf32>
    %cst_22 = arith.constant dense<0.000000e+00> : vector<8x128xf32>
    %130 = tpu.matmul %129, %71, %cst_22 {dimension_numbers = #tpu.dot_dimension_numbers<[1], [0], [0], [1], [0, 0, 1, 1], [], []>} : vector<8x32xf32>, vector<32x128xf32>, vector<8x128xf32> -> vector<8x128xf32>
    %131 = arith.addf %39, %130 : vector<8x128xf32>
    %132 = vector.broadcast %72 : vector<1x128xf32> to vector<8x128xf32>
    %133 = arith.mulf %131, %132 : vector<8x128xf32>
    %134 = math.tanh %133 : vector<8x128xf32>
    %135 = vector.broadcast %72 : vector<1x128xf32> to vector<8x128xf32>
    %136 = arith.mulf %134, %135 : vector<8x128xf32>
    %137 = vector.broadcast %73 : vector<1x128xf32> to vector<8x128xf32>
    %138 = arith.addf %136, %137 : vector<8x128xf32>
    %139 = vector.extract_strided_slice %138 {offsets = [0, 0], sizes = [8, 32], strides = [1, 1]} : vector<8x128xf32> to vector<8x32xf32>
    %140 = vector.extract_strided_slice %138 {offsets = [0, 32], sizes = [8, 32], strides = [1, 1]} : vector<8x128xf32> to vector<8x32xf32>
    %141 = vector.extract_strided_slice %138 {offsets = [0, 64], sizes = [8, 32], strides = [1, 1]} : vector<8x128xf32> to vector<8x32xf32>
    %142 = vector.extract_strided_slice %138 {offsets = [0, 96], sizes = [8, 32], strides = [1, 1]} : vector<8x128xf32> to vector<8x32xf32>
    %143 = arith.mulf %140, %127 : vector<8x32xf32>
    %144 = arith.mulf %139, %141 : vector<8x32xf32>
    %145 = arith.addf %143, %144 : vector<8x32xf32>
    %146 = math.tanh %145 : vector<8x32xf32>
    %147 = arith.mulf %142, %146 : vector<8x32xf32>
    %cst_23 = arith.constant dense<0.000000e+00> : vector<8x128xf32>
    %148 = tpu.matmul %147, %71, %cst_23 {dimension_numbers = #tpu.dot_dimension_numbers<[1], [0], [0], [1], [0, 0, 1, 1], [], []>} : vector<8x32xf32>, vector<32x128xf32>, vector<8x128xf32> -> vector<8x128xf32>
    %149 = arith.addf %46, %148 : vector<8x128xf32>
    %150 = vector.broadcast %72 : vector<1x128xf32> to vector<8x128xf32>
    %151 = arith.mulf %149, %150 : vector<8x128xf32>
    %152 = math.tanh %151 : vector<8x128xf32>
    %153 = vector.broadcast %72 : vector<1x128xf32> to vector<8x128xf32>
    %154 = arith.mulf %152, %153 : vector<8x128xf32>
    %155 = vector.broadcast %73 : vector<1x128xf32> to vector<8x128xf32>
    %156 = arith.addf %154, %155 : vector<8x128xf32>
    %157 = vector.extract_strided_slice %156 {offsets = [0, 0], sizes = [8, 32], strides = [1, 1]} : vector<8x128xf32> to vector<8x32xf32>
    %158 = vector.extract_strided_slice %156 {offsets = [0, 32], sizes = [8, 32], strides = [1, 1]} : vector<8x128xf32> to vector<8x32xf32>
    %159 = vector.extract_strided_slice %156 {offsets = [0, 64], sizes = [8, 32], strides = [1, 1]} : vector<8x128xf32> to vector<8x32xf32>
    %160 = vector.extract_strided_slice %156 {offsets = [0, 96], sizes = [8, 32], strides = [1, 1]} : vector<8x128xf32> to vector<8x32xf32>
    %161 = arith.mulf %158, %145 : vector<8x32xf32>
    %162 = arith.mulf %157, %159 : vector<8x32xf32>
    %163 = arith.addf %161, %162 : vector<8x32xf32>
    %164 = math.tanh %163 : vector<8x32xf32>
    %165 = arith.mulf %160, %164 : vector<8x32xf32>
    %cst_24 = arith.constant dense<0.000000e+00> : vector<8x128xf32>
    %166 = tpu.matmul %165, %71, %cst_24 {dimension_numbers = #tpu.dot_dimension_numbers<[1], [0], [0], [1], [0, 0, 1, 1], [], []>} : vector<8x32xf32>, vector<32x128xf32>, vector<8x128xf32> -> vector<8x128xf32>
    %167 = arith.addf %53, %166 : vector<8x128xf32>
    %168 = vector.broadcast %72 : vector<1x128xf32> to vector<8x128xf32>
    %169 = arith.mulf %167, %168 : vector<8x128xf32>
    %170 = math.tanh %169 : vector<8x128xf32>
    %171 = vector.broadcast %72 : vector<1x128xf32> to vector<8x128xf32>
    %172 = arith.mulf %170, %171 : vector<8x128xf32>
    %173 = vector.broadcast %73 : vector<1x128xf32> to vector<8x128xf32>
    %174 = arith.addf %172, %173 : vector<8x128xf32>
    %175 = vector.extract_strided_slice %174 {offsets = [0, 0], sizes = [8, 32], strides = [1, 1]} : vector<8x128xf32> to vector<8x32xf32>
    %176 = vector.extract_strided_slice %174 {offsets = [0, 32], sizes = [8, 32], strides = [1, 1]} : vector<8x128xf32> to vector<8x32xf32>
    %177 = vector.extract_strided_slice %174 {offsets = [0, 64], sizes = [8, 32], strides = [1, 1]} : vector<8x128xf32> to vector<8x32xf32>
    %178 = vector.extract_strided_slice %174 {offsets = [0, 96], sizes = [8, 32], strides = [1, 1]} : vector<8x128xf32> to vector<8x32xf32>
    %179 = arith.mulf %176, %163 : vector<8x32xf32>
    %180 = arith.mulf %175, %177 : vector<8x32xf32>
    %181 = arith.addf %179, %180 : vector<8x32xf32>
    %182 = math.tanh %181 : vector<8x32xf32>
    %183 = arith.mulf %178, %182 : vector<8x32xf32>
    %cst_25 = arith.constant dense<0.000000e+00> : vector<8x128xf32>
    %184 = tpu.matmul %183, %71, %cst_25 {dimension_numbers = #tpu.dot_dimension_numbers<[1], [0], [0], [1], [0, 0, 1, 1], [], []>} : vector<8x32xf32>, vector<32x128xf32>, vector<8x128xf32> -> vector<8x128xf32>
    %185 = arith.addf %60, %184 : vector<8x128xf32>
    %186 = vector.broadcast %72 : vector<1x128xf32> to vector<8x128xf32>
    %187 = arith.mulf %185, %186 : vector<8x128xf32>
    %188 = math.tanh %187 : vector<8x128xf32>
    %189 = vector.broadcast %72 : vector<1x128xf32> to vector<8x128xf32>
    %190 = arith.mulf %188, %189 : vector<8x128xf32>
    %191 = vector.broadcast %73 : vector<1x128xf32> to vector<8x128xf32>
    %192 = arith.addf %190, %191 : vector<8x128xf32>
    %193 = vector.extract_strided_slice %192 {offsets = [0, 0], sizes = [8, 32], strides = [1, 1]} : vector<8x128xf32> to vector<8x32xf32>
    %194 = vector.extract_strided_slice %192 {offsets = [0, 32], sizes = [8, 32], strides = [1, 1]} : vector<8x128xf32> to vector<8x32xf32>
    %195 = vector.extract_strided_slice %192 {offsets = [0, 64], sizes = [8, 32], strides = [1, 1]} : vector<8x128xf32> to vector<8x32xf32>
    %196 = vector.extract_strided_slice %192 {offsets = [0, 96], sizes = [8, 32], strides = [1, 1]} : vector<8x128xf32> to vector<8x32xf32>
    %197 = arith.mulf %194, %181 : vector<8x32xf32>
    %198 = arith.mulf %193, %195 : vector<8x32xf32>
    %199 = arith.addf %197, %198 : vector<8x32xf32>
    %200 = math.tanh %199 : vector<8x32xf32>
    %201 = arith.mulf %196, %200 : vector<8x32xf32>
    %cst_26 = arith.constant dense<0.000000e+00> : vector<8x128xf32>
    %202 = tpu.matmul %201, %71, %cst_26 {dimension_numbers = #tpu.dot_dimension_numbers<[1], [0], [0], [1], [0, 0, 1, 1], [], []>} : vector<8x32xf32>, vector<32x128xf32>, vector<8x128xf32> -> vector<8x128xf32>
    %203 = arith.addf %67, %202 : vector<8x128xf32>
    %204 = vector.broadcast %72 : vector<1x128xf32> to vector<8x128xf32>
    %205 = arith.mulf %203, %204 : vector<8x128xf32>
    %206 = math.tanh %205 : vector<8x128xf32>
    %207 = vector.broadcast %72 : vector<1x128xf32> to vector<8x128xf32>
    %208 = arith.mulf %206, %207 : vector<8x128xf32>
    %209 = vector.broadcast %73 : vector<1x128xf32> to vector<8x128xf32>
    %210 = arith.addf %208, %209 : vector<8x128xf32>
    %211 = vector.extract_strided_slice %210 {offsets = [0, 0], sizes = [8, 32], strides = [1, 1]} : vector<8x128xf32> to vector<8x32xf32>
    %212 = vector.extract_strided_slice %210 {offsets = [0, 32], sizes = [8, 32], strides = [1, 1]} : vector<8x128xf32> to vector<8x32xf32>
    %213 = vector.extract_strided_slice %210 {offsets = [0, 64], sizes = [8, 32], strides = [1, 1]} : vector<8x128xf32> to vector<8x32xf32>
    %214 = vector.extract_strided_slice %210 {offsets = [0, 96], sizes = [8, 32], strides = [1, 1]} : vector<8x128xf32> to vector<8x32xf32>
    %215 = arith.mulf %212, %199 : vector<8x32xf32>
    %216 = arith.mulf %211, %213 : vector<8x32xf32>
    %217 = arith.addf %215, %216 : vector<8x32xf32>
    %218 = math.tanh %217 : vector<8x32xf32>
    %219 = arith.mulf %214, %218 : vector<8x32xf32>
    %cst_27 = arith.constant dense<0.000000e+00> : vector<8x128xf32>
    %220 = tpu.matmul %219, %71, %cst_27 {dimension_numbers = #tpu.dot_dimension_numbers<[1], [0], [0], [1], [0, 0, 1, 1], [], []>} : vector<8x32xf32>, vector<32x128xf32>, vector<8x128xf32> -> vector<8x128xf32>
    %221 = arith.addf %70, %220 : vector<8x128xf32>
    %222 = vector.broadcast %72 : vector<1x128xf32> to vector<8x128xf32>
    %223 = arith.mulf %221, %222 : vector<8x128xf32>
    %224 = math.tanh %223 : vector<8x128xf32>
    %225 = vector.broadcast %72 : vector<1x128xf32> to vector<8x128xf32>
    %226 = arith.mulf %224, %225 : vector<8x128xf32>
    %227 = vector.broadcast %73 : vector<1x128xf32> to vector<8x128xf32>
    %228 = arith.addf %226, %227 : vector<8x128xf32>
    %229 = vector.extract_strided_slice %228 {offsets = [0, 0], sizes = [8, 32], strides = [1, 1]} : vector<8x128xf32> to vector<8x32xf32>
    %230 = vector.extract_strided_slice %228 {offsets = [0, 32], sizes = [8, 32], strides = [1, 1]} : vector<8x128xf32> to vector<8x32xf32>
    %231 = vector.extract_strided_slice %228 {offsets = [0, 64], sizes = [8, 32], strides = [1, 1]} : vector<8x128xf32> to vector<8x32xf32>
    %232 = vector.extract_strided_slice %228 {offsets = [0, 96], sizes = [8, 32], strides = [1, 1]} : vector<8x128xf32> to vector<8x32xf32>
    %233 = arith.mulf %230, %217 : vector<8x32xf32>
    %234 = arith.mulf %229, %231 : vector<8x32xf32>
    %235 = arith.addf %233, %234 : vector<8x32xf32>
    %236 = math.tanh %235 : vector<8x32xf32>
    %237 = arith.mulf %232, %236 : vector<8x32xf32>
    %c0_28 = arith.constant 0 : index
    %c0_29 = arith.constant 0 : index
    %238 = vector.load %arg8[%c0_28, %c0_29] : memref<8x32xf32, #tpu.memory_space<vmem>>, vector<8x32xf32>
    tpu.vector_store %arg8[%c0_28, %c0_29], %237 {strides = array<i32>} : memref<8x32xf32, #tpu.memory_space<vmem>>, vector<8x32xf32>,
    return
  }
}

</mosaic_0001>

<bundles_post_ra>
// kernel: tile.9
= control target key start
LH: loop header
LB: loop body
LE: loop exit
PB: predicated region body
PF: predicated region fallthrough
CT: control target
= control target key end

     0   :  { %vm3_vm0 = vcmask 261120   ;;  %s60_s0 = inlined_call_operand.vmem [shape: f32[2,12,32], index: 0, kind: input, shape index: {}]   ;;  %s61_s1 = inlined_call_operand.vmem [shape: f32[24,32], index: 1, kind: output, shape index: {}]  }
   0x1   :  { %v2_v0 = vld [vmem:[%s60_s0] sm:$0xff]   ;;  %v20_v1 = vld [vmem:[%s60_s0 + $0x8] sm:$0xf]   ;;  %v22_v2 = vld [vmem:[%s60_s0 + $0x10] sm:$0xff]  }
   0x2   :  { %4 = vst.msk [vmem:[%s61_s1] sm:$0xff] %vm3_vm0, %v2_v0   ;;  %v24_v3 = vld [vmem:[%s60_s0 + $0x18] sm:$0xf]  }
   0x3   :  { %21 = vst.msk [vmem:[%s61_s1 + $0x8] sm:$0xf] %vm3_vm0, %v20_v1  }
   0x4   :  { %23 = vst.msk [vmem:[%s61_s1 + $0xc] sm:$0xff] %vm3_vm0, %v22_v2  }
   0x5   :  { %25 = vst.msk [vmem:[%s61_s1 + $0x14] sm:$0xf] %vm3_vm0, %v24_v3  }

// kernel: cnn_lstm_forward.3
= control target key start
LH: loop header
LB: loop body
LE: loop exit
PB: predicated region body
PF: predicated region fallthrough
CT: control target
= control target key end

     0   :  { %s1295_s0 = inlined_call_operand.vmem [shape: f32[24,512], index: 0, kind: input, shape index: {}]   ;;  %s1296_s1 = inlined_call_operand.vmem [shape: f32[512,32], index: 1, kind: input, shape index: {}]   ;;  %s1297_s2 = inlined_call_operand.vmem [shape: f32[24,32], index: 2, kind: input, shape index: {}]   ;;  %s1298_s3 = inlined_call_operand.vmem [shape: f32[32,128], index: 3, kind: input, shape index: {}]   ;;  %s1299_s4 = inlined_call_operand.vmem [shape: f32[32,128], index: 4, kind: input, shape index: {}]   ;;  %s1300_s5 = inlined_call_operand.vmem [shape: f32[1,128], index: 5, kind: input, shape index: {}]   ;;  %s1301_s6 = inlined_call_operand.vmem [shape: f32[1,128], index: 6, kind: input, shape index: {}]   ;;  %s1302_s7 = inlined_call_operand.vmem [shape: f32[1,128], index: 7, kind: input, shape index: {}]   ;;  %s1303_s8 = inlined_call_operand.hbm [shape: f32[8,32], index: 8, kind: output, shape index: {}]  }
   0x1   :  { %v89_v0 = vld [vmem:[%s1296_s1 + $0x178] sm:$0xff]  ;;  %v88_v2 = vld [vmem:[%s1296_s1 + $0x170] sm:$0xff]  ;;  %v87_v6 = vld [vmem:[%s1296_s1 + $0x168] sm:$0xff] }
   0x2   :  { %v57_v1 = vld [vmem:[%s1296_s1 + $0x78] sm:$0xff]  ;;  %161 = vmatpush.msra.mxu2 %v89_v0  ;;  %v56_v4 = vld [vmem:[%s1296_s1 + $0x70] sm:$0xff]  ;;  %v55_v8 = vld [vmem:[%s1296_s1 + $0x68] sm:$0xff] }
   0x3   :  { %109 = vmatpush.msra.mxu0 %v57_v1  ;;  %v105_v3 = vld [vmem:[%s1296_s1 + $0x1f8] sm:$0xff]  ;;  %v104_v7 = vld [vmem:[%s1296_s1 + $0x1f0] sm:$0xff]  ;;  %v103_v10 = vld [vmem:[%s1296_s1 + $0x1e8] sm:$0xff] }
   0x4   :  { %v73_v5 = vld [vmem:[%s1296_s1 + $0xf8] sm:$0xff]  ;;  %187 = vmatpush.msra.mxu3 %v105_v3  ;;  %162 = vmatpush.msra.mxu2 %v88_v2  ;;  %v72_v9 = vld [vmem:[%s1296_s1 + $0xf0] sm:$0xff]  ;;  %v86_v11 = vld [vmem:[%s1296_s1 + $0x160] sm:$0xff] }
   0x5   :  { %135 = vmatpush.msra.mxu1 %v73_v5  ;;  %110 = vmatpush.msra.mxu0 %v56_v4  ;;  %v54_v12 = vld [vmem:[%s1296_s1 + $0x60] sm:$0xff]  ;;  %v71_v13 = vld [vmem:[%s1296_s1 + $0xe8] sm:$0xff]  ;;  %v85_v16 = vld [vmem:[%s1296_s1 + $0x158] sm:$0xff] }
   0x6   :  { %188 = vmatpush.msra.mxu3 %v104_v7  ;;  %163 = vmatpush.msra.mxu2 %v87_v6  ;;  %v102_v14 = vld [vmem:[%s1296_s1 + $0x1e0] sm:$0xff]  ;;  %v53_v17 = vld [vmem:[%s1296_s1 + $0x58] sm:$0xff]  ;;  %v84_v20 = vld [vmem:[%s1296_s1 + $0x150] sm:$0xff] }
   0x7   :  { %136 = vmatpush.msra.mxu1 %v72_v9  ;;  %111 = vmatpush.msra.mxu0 %v55_v8  ;;  %v70_v15 = vld [vmem:[%s1296_s1 + $0xe0] sm:$0xff]  ;;  %v101_v18 = vld [vmem:[%s1296_s1 + $0x1d8] sm:$0xff]  ;;  %v52_v21 = vld [vmem:[%s1296_s1 + $0x50] sm:$0xff] }
   0x8   :  { %189 = vmatpush.msra.mxu3 %v103_v10  ;;  %164 = vmatpush.msra.mxu2 %v86_v11  ;;  %v69_v19 = vld [vmem:[%s1296_s1 + $0xd8] sm:$0xff]  ;;  %v100_v22 = vld [vmem:[%s1296_s1 + $0x1d0] sm:$0xff]  ;;  %v83_v24 = vld [vmem:[%s1296_s1 + $0x148] sm:$0xff] }
   0x9   :  { %137 = vmatpush.msra.mxu1 %v71_v13  ;;  %112 = vmatpush.msra.mxu0 %v54_v12  ;;  %v68_v23 = vld [vmem:[%s1296_s1 + $0xd0] sm:$0xff]  ;;  %v51_v25 = vld [vmem:[%s1296_s1 + $0x48] sm:$0xff]  ;;  %v82_v28 = vld [vmem:[%s1296_s1 + $0x140] sm:$0xff] }
   0xa   :  { %190 = vmatpush.msra.mxu3 %v102_v14  ;;  %165 = vmatpush.msra.mxu2 %v85_v16  ;;  %v99_v26 = vld [vmem:[%s1296_s1 + $0x1c8] sm:$0xff]  ;;  %v50_v29 = vld [vmem:[%s1296_s1 + $0x40] sm:$0xff]  ;;  %v81_v32 = vld [vmem:[%s1296_s1 + $0x138] sm:$0xff] }
   0xb   :  { %138 = vmatpush.msra.mxu1 %v70_v15  ;;  %113 = vmatpush.msra.mxu0 %v53_v17  ;;  %v67_v27 = vld [vmem:[%s1296_s1 + $0xc8] sm:$0xff]  ;;  %v98_v30 = vld [vmem:[%s1296_s1 + $0x1c0] sm:$0xff]  ;;  %v49_v33 = vld [vmem:[%s1296_s1 + $0x38] sm:$0xff] }
   0xc   :  { %191 = vmatpush.msra.mxu3 %v101_v18  ;;  %166 = vmatpush.msra.mxu2 %v84_v20  ;;  %v66_v31 = vld [vmem:[%s1296_s1 + $0xc0] sm:$0xff]  ;;  %v97_v34 = vld [vmem:[%s1296_s1 + $0x1b8] sm:$0xff]  ;;  %v80_v36 = vld [vmem:[%s1296_s1 + $0x130] sm:$0xff] }
   0xd   :  { %139 = vmatpush.msra.mxu1 %v69_v19  ;;  %114 = vmatpush.msra.mxu0 %v52_v21  ;;  %v65_v35 = vld [vmem:[%s1296_s1 + $0xb8] sm:$0xff]  ;;  %v48_v37 = vld [vmem:[%s1296_s1 + $0x30] sm:$0xff]  ;;  %v79_v40 = vld [vmem:[%s1296_s1 + $0x128] sm:$0xff] }
   0xe   :  { %192 = vmatpush.msra.mxu3 %v100_v22  ;;  %167 = vmatpush.msra.mxu2 %v83_v24  ;;  %v96_v38 = vld [vmem:[%s1296_s1 + $0x1b0] sm:$0xff]  ;;  %v47_v41 = vld [vmem:[%s1296_s1 + $0x28] sm:$0xff]  ;;  %v78_v44 = vld [vmem:[%s1296_s1 + $0x120] sm:$0xff] }
   0xf   :  { %140 = vmatpush.msra.mxu1 %v68_v23  ;;  %115 = vmatpush.msra.mxu0 %v51_v25  ;;  %v64_v39 = vld [vmem:[%s1296_s1 + $0xb0] sm:$0xff]  ;;  %v95_v42 = vld [vmem:[%s1296_s1 + $0x1a8] sm:$0xff]  ;;  %v46_v45 = vld [vmem:[%s1296_s1 + $0x20] sm:$0xff] }
  0x10   :  { %193 = vmatpush.msra.mxu3 %v99_v26  ;;  %168 = vmatpush.msra.mxu2 %v82_v28  ;;  %v63_v43 = vld [vmem:[%s1296_s1 + $0xa8] sm:$0xff]  ;;  %v94_v46 = vld [vmem:[%s1296_s1 + $0x1a0] sm:$0xff]  ;;  %v77_v48 = vld [vmem:[%s1296_s1 + $0x118] sm:$0xff] }
  0x11   :  { %141 = vmatpush.msra.mxu1 %v67_v27  ;;  %116 = vmatpush.msra.mxu0 %v50_v29  ;;  %v62_v47 = vld [vmem:[%s1296_s1 + $0xa0] sm:$0xff]  ;;  %v45_v49 = vld [vmem:[%s1296_s1 + $0x18] sm:$0xff]  ;;  %v76_v52 = vld [vmem:[%s1296_s1 + $0x110] sm:$0xff] }
  0x12   :  { %194 = vmatpush.msra.mxu3 %v98_v30  ;;  %169 = vmatpush.msra.mxu2 %v81_v32  ;;  %v93_v50 = vld [vmem:[%s1296_s1 + $0x198] sm:$0xff]  ;;  %v44_v53 = vld [vmem:[%s1296_s1 + $0x10] sm:$0xff]  ;;  %v75_v54 = vld [vmem:[%s1296_s1 + $0x108] sm:$0xff] }
  0x13   :  { %142 = vmatpush.msra.mxu1 %v66_v31  ;;  %117 = vmatpush.msra.mxu0 %v49_v33  ;;  %v61_v51 = vld [vmem:[%s1296_s1 + $0x98] sm:$0xff]  ;;  %v92_v55 = vld [vmem:[%s1296_s1 + $0x190] sm:$0xff]  ;;  %v43_v56 = vld [vmem:[%s1296_s1 + $0x8] sm:$0xff] }
  0x14   :  { %195 = vmatpush.msra.mxu3 %v97_v34  ;;  %170 = vmatpush.msra.mxu2 %v80_v36  ;;  %v60_v57 = vld [vmem:[%s1296_s1 + $0x90] sm:$0xff]  ;;  %v91_v58 = vld [vmem:[%s1296_s1 + $0x188] sm:$0xff] }
  0x15   :  { %143 = vmatpush.msra.mxu1 %v65_v35  ;;  %118 = vmatpush.msra.mxu0 %v48_v37  ;;  %v59_v59 = vld [vmem:[%s1296_s1 + $0x88] sm:$0xff] }
  0x16   :  { %196 = vmatpush.msra.mxu3 %v96_v38  ;;  %171 = vmatpush.msra.mxu2 %v79_v40 }
  0x17   :  { %144 = vmatpush.msra.mxu1 %v64_v39  ;;  %119 = vmatpush.msra.mxu0 %v47_v41 }
  0x18   :  { %197 = vmatpush.msra.mxu3 %v95_v42  ;;  %172 = vmatpush.msra.mxu2 %v78_v44 }
  0x19   :  { %145 = vmatpush.msra.mxu1 %v63_v43  ;;  %120 = vmatpush.msra.mxu0 %v46_v45 }
  0x1a   :  { %198 = vmatpush.msra.mxu3 %v94_v46  ;;  %173 = vmatpush.msra.mxu2 %v77_v48 }
  0x1b   :  { %146 = vmatpush.msra.mxu1 %v62_v47  ;;  %121 = vmatpush.msra.mxu0 %v45_v49 }
  0x1c   :  { %199 = vmatpush.msra.mxu3 %v93_v50  ;;  %174 = vmatpush.msra.mxu2 %v76_v52 }
  0x1d   :  { %147 = vmatpush.msra.mxu1 %v61_v51  ;;  %122 = vmatpush.msra.mxu0 %v44_v53 }
  0x1e   :  { %13 = vsyncpa [#allocation3], 0  ;;  %200 = vmatpush.msra.mxu3 %v92_v55  ;;  %v74_v60 = vld [vmem:[%s1296_s1 + $0x100] sm:$0xff]  ;;  %175 = vmatpush.msra.mxu2 %v75_v54  ;;  %v32_v62 = vld [vmem:[%s1295_s0 + $0x10] sm:$0xff]  ;;  %v820_v20 = vmov 0.0   ;;  %vm224_vm0 = vcmask 261120  }
  0x1f   :  { %148 = vmatpush.msra.mxu1 %v60_v57  ;;  %v42_v61 = vld [vmem:[%s1296_s1] sm:$0xff]  ;;  %123 = vmatpush.msra.mxu0 %v43_v56  ;;  %v33_v1 = vld [vmem:[%s1295_s0 + $0x18] sm:$0xff]  ;;  %v31_v4 = vld [vmem:[%s1295_s0 + $0x8] sm:$0xff]  ;;  %vm262_vm1 = vcmask 1043456   ;;  %s821_s23 = smov 64   ;;  %s822_s24 = smov 32  }
  0x20   :  { %v90_v63 = vld [vmem:[%s1296_s1 + $0x180] sm:$0xff]  ;;  %201 = vmatpush.msra.mxu3 %v91_v58  ;;  %176 = vmatpush.msra.mxu2 %v74_v60  ;;  %v219_v3 = vld [vmem:[%s1298_s3 + $0x18] sm:$0xff]  ;;  %v218_v5 = vld [vmem:[%s1298_s3 + $0x10] sm:$0xff]  ;;  %s731_s28 = sshll.u32 %s1303_s8, 4  ;;  %s732_s28 = int_to_ptr.hbm [resolvable:$true] %s731_s28 }
  0x21   :  { %149 = vmatpush.msra.mxu1 %v59_v59  ;;  %v30_v0 = vld [vmem:[%s1295_s0] sm:$0xff]  ;;  %124 = vmatpush.msra.mxu0 %v42_v61  ;;  %v217_v6 = vld [vmem:[%s1298_s3 + $0x8] sm:$0xff]  ;;  %v36_v7 = vld [vmem:[%s1295_s0 + $0x30] sm:$0xff] }
  0x22   :  { %v58_v2 = vld [vmem:[%s1296_s1 + $0x80] sm:$0xff]  ;;  %177 = vmatmul.f32.vlgmr.msra.gmra.mxu2 %v32_v62  ;;  %202 = vmatpush.msra.mxu3 %v90_v63  ;;  %v37_v9 = vld [vmem:[%s1295_s0 + $0x38] sm:$0xff]  ;;  %v35_v10 = vld [vmem:[%s1295_s0 + $0x28] sm:$0xff] }
  0x23   :  { %125 = vmatmul.f32.vlgmr.msra.gmra.mxu0 %v30_v0  ;;  %203 = vmatmul.f32.vlgmr.msra.gmra.mxu3 %v33_v1  ;;  %v34_v8 = vld [vmem:[%s1295_s0 + $0x20] sm:$0xff]  ;;  %v40_v11 = vld [vmem:[%s1295_s0 + $0x50] sm:$0xff]  ;;  %v41_v13 = vld [vmem:[%s1295_s0 + $0x58] sm:$0xff] }
  0x24   :  { %150 = vmatpush.msra.mxu1 %v58_v2  ;;  %246 = vmatpush.msrb.mxu0 %v219_v3  ;;  %v38_v12 = vld [vmem:[%s1295_s0 + $0x40] sm:$0xff]  ;;  %v39_v14 = vld [vmem:[%s1295_s0 + $0x48] sm:$0xff]  ;;  %v1109_v15 = vld [vmem:[%s1299_s4 + $0x18] sm:$0xff] }
  0x25   :  { %151 = vmatmul.f32.vlgmr.msra.gmra.mxu1 %v31_v4  ;;  %360 = vmatpush.msrb.mxu2 %v1109_v15  ;;  %v216_v16 = vld [vmem:[%s1298_s3] sm:$0xff]  ;;  %v1120_v17 = vld [vmem:[%s1299_s4 + $0x10] sm:$0xff]  ;;  %v1128_v18 = vld [vmem:[%s1299_s4 + $0x8] sm:$0xff] }
  0x26   :  { %247 = vmatpush.msrb.mxu0 %v218_v5  ;;  %307 = vmatpush.msrb.mxu1 %v1109_v15  ;;  %v1136_v19 = vld [vmem:[%s1299_s4] sm:$0xff]  ;;  %v107_v29 = vld [vmem:[%s1297_s2 + $0x8] sm:$0xff]  ;;  %v108_v39 = vld [vmem:[%s1297_s2 + $0x10] sm:$0xff] }
  0x27   :  { %407 = vmatpush.msrb.mxu3 %v1109_v15  ;;  %361 = vmatpush.msrb.mxu2 %v1120_v17  ;;  %v106_v21 = vld [vmem:[%s1297_s2] sm:$0xff] }
  0x28   :  { %248 = vmatpush.msrb.mxu0 %v217_v6  ;;  %308 = vmatpush.msrb.mxu1 %v1120_v17  ;;  %v755_v52 = vld [vmem:[%s1300_s5] ss:$0 sm:$0xff] }
  0x29   :  { %408 = vmatpush.msrb.mxu3 %v1120_v17  ;;  %362 = vmatpush.msrb.mxu2 %v1128_v18  ;;  %v1175_v1 = vld [vmem:[%s1301_s6] ss:$0 sm:$0xff] }
  0x2a   :  { %180 = vmatmul.f32.gmra.mxu2 %v36_v7  ;;  %249 = vmatpush.msrb.mxu0 %v216_v16 }
  0x2b   :  { %128 = vmatmul.f32.gmra.mxu0 %v34_v8  ;;  %206 = vmatmul.f32.gmra.mxu3 %v37_v9 }
  0x2c   :  { %309 = vmatpush.msrb.mxu1 %v1128_v18  ;;  %409 = vmatpush.msrb.mxu3 %v1128_v18 }
  0x2d   :  { %154 = vmatmul.f32.gmra.mxu1 %v35_v10  ;;  %363 = vmatpush.msrb.mxu2 %v1136_v19 }
  0x2e   :  { %310 = vmatpush.msrb.mxu1 %v1136_v19  ;;  %410 = vmatpush.msrb.mxu3 %v1136_v19 }
  0x2f   :  { %501 = vmatpush.msra.mxu2 %v1109_v15 }
  0x30   :  { %454 = vmatpush.msra.mxu1 %v1109_v15  ;;  %548 = vmatpush.msra.mxu3 %v1109_v15 }
  0x31   :  { %502 = vmatpush.msra.mxu2 %v1120_v17 }
  0x32   :  { %183 = vmatmul.f32.gmra.mxu2 %v40_v11  ;;  %455 = vmatpush.msra.mxu1 %v1120_v17 }
  0x33   :  { %131 = vmatmul.f32.gmra.mxu0 %v38_v12  ;;  %209 = vmatmul.f32.gmra.mxu3 %v41_v13 }
  0x34   :  { %549 = vmatpush.msra.mxu3 %v1120_v17  ;;  %456 = vmatpush.msra.mxu1 %v1128_v18 }
  0x35   :  { %157 = vmatmul.f32.gmra.mxu1 %v39_v14  ;;  %503 = vmatpush.msra.mxu2 %v1128_v18 }
  0x36   :  { %550 = vmatpush.msra.mxu3 %v1128_v18  ;;  %457 = vmatpush.msra.mxu1 %v1136_v19 }
  0x37   :  { %504 = vmatpush.msra.mxu2 %v1136_v19 }
  0x38   :  { %551 = vmatpush.msra.mxu3 %v1136_v19 }
  0x3d   :  { %311 = vmatmul.f32.vlgmr.msrb.gmra.mxu1 %v820_v20 }
  0x3e   :  { %595 = vmatpush.msrb.mxu1 %v1109_v15 }
  0x40   :  { %596 = vmatpush.msrb.mxu1 %v1120_v17 }
  0x42   :  { %597 = vmatpush.msrb.mxu1 %v1128_v18 }
  0x44   :  { %598 = vmatpush.msrb.mxu1 %v1136_v19 }
  0xa0   :  { %v126_v22 = vpop.f32.mrf.mxu0 }
  0xa1   :  { %v127_v23 = vadd.f32 %v126_v22, %v106_v21 }
  0xa2   :  { %v152_v24 = vpop.f32.mrf.mxu1 }
  0xa3   :  { %v153_v25 = vadd.f32 %v152_v24, %v127_v23 }
  0xa5   :  { %v178_v26 = vpop.f32.mrf.mxu2 }
  0xa6   :  { %v179_v27 = vadd.f32 %v178_v26, %v153_v25  ;;  %v204_v28 = vpop.f32.mrf.mxu3 }
  0xa8   :  { %v205_v30 = vadd.f32 %v204_v28, %v179_v27  ;;  %v129_v31 = vpop.f32.mrf.mxu0  ;;  %v1204_v27 = vld [vmem:[%s1302_s7] ss:$0 sm:$0xff]  ;;  %s823_s7 = smov [#allocation2]  }
  0xa9   :  { %v130_v32 = vadd.f32 %v129_v31, %v107_v29  ;;  %s729_s25 = sshll.u32 %s823_s7, 4  ;;  %s730_s25 = int_to_ptr.vmem [resolvable:$true] %s729_s25 }
  0xaa   :  { %v213_v33 = vmax.f32 %v205_v30, 0.0  ;;  %v155_v34 = vpop.f32.mrf.mxu1 }
  0xab   :  { %v156_v35 = vadd.f32 %v155_v34, %v130_v32 }
  0xac   :  { %740 = vmatmul.msk.f32.vlgmr.msrb.gmra.mxu0 %vm224_vm0, %v213_v33 }
  0xad   :  { %v181_v36 = vpop.f32.mrf.mxu2 }
  0xae   :  { %v182_v37 = vadd.f32 %v181_v36, %v156_v35  ;;  %v207_v38 = vpop.f32.mrf.mxu3 }
  0xb0   :  { %v208_v40 = vadd.f32 %v207_v38, %v182_v37  ;;  %v132_v41 = vpop.f32.mrf.mxu0 }
  0xb1   :  { %v133_v42 = vadd.f32 %v132_v41, %v108_v39 }
  0xb2   :  { %v214_v43 = vmax.f32 %v208_v40, 0.0  ;;  %v158_v44 = vpop.f32.mrf.mxu1 }
  0xb3   :  { %v159_v45 = vadd.f32 %v158_v44, %v133_v42 }
  0xb4   :  { %741 = vmatmul.msk.f32.gmra.mxu0 %vm224_vm0, %v214_v43 }
  0xb5   :  { %v184_v46 = vpop.f32.mrf.mxu2 }
  0xb6   :  { %v185_v47 = vadd.f32 %v184_v46, %v159_v45  ;;  %v210_v48 = vpop.f32.mrf.mxu3 }
  0xb8   :  { %v211_v49 = vadd.f32 %v210_v48, %v185_v47 }
  0xba   :  { %v215_v50 = vmax.f32 %v211_v49, 0.0  ;;  %v312_v61 = vpop.f32.mrf.mxu1 }
  0xbc   :  { %742 = vmatmul.msk.f32.gmra.mxu0 %vm224_vm0, %v215_v50 }
 0x129   :  { %v251_v51 = vpop.f32.mrf.mxu0 }
 0x12a   :  { %v252_v53 = vadd.f32 %v755_v52, %v251_v51 }
 0x12c   :  { %v260_v56 = vperm.slane %v252_v53, 0  ;;  %v264_v57 = vperm.slane %v252_v53, 1  ;;  %v267_v58 = vperm.slane %v252_v53, 2  ;;  %v270_v59 = vperm.slane %v252_v53, 3 }
 0x12d   :  { %v273_v10 = vperm.slane %v252_v53, 4  ;;  %v276_v11 = vperm.slane %v252_v53, 5  ;;  %v279_v12 = vperm.slane %v252_v53, 6  ;;  %v282_v13 = vperm.slane %v252_v53, 7 }
 0x131   :  { %v254_v54 = vpop.f32.mrf.mxu0 }
 0x132   :  { %v255_v55 = vadd.f32 %v755_v52, %v254_v54 }
 0x134   :  { %v261_v60 = vperm.slane %v255_v55, 4  ;;  %v265_v62 = vperm.slane %v255_v55, 5  ;;  %v268_v63 = vperm.slane %v255_v55, 6  ;;  %v271_v0 = vperm.slane %v255_v55, 7 }
 0x136   :  { %v263_v2 = vsel %vm262_vm1, %v260_v56, %v261_v60  ;;  %v266_v3 = vsel %vm262_vm1, %v264_v57, %v265_v62  ;;  %v1180_v4 = vsel %vm262_vm1, %v267_v58, %v268_v63  ;;  %v1183_v5 = vsel %vm262_vm1, %v270_v59, %v271_v0 }
 0x137   :  { %v315_v6 = vadd.f32 %v312_v61, %v263_v2 }
 0x139   :  { %v319_v7 = vmul.f32 %v1175_v1, %v315_v6  ;;  %v257_v8 = vpop.f32.mrf.mxu0 }
 0x13a   :  { %v258_v9 = vadd.f32 %v755_v52, %v257_v8 }
 0x13b   :  { %758 = vtanh.f32 %v319_v7 }
 0x13c   :  { %v274_v14 = vperm.slane %v258_v9, 0  ;;  %v277_v16 = vperm.slane %v258_v9, 1  ;;  %v280_v20 = vperm.slane %v258_v9, 2  ;;  %v283_v21 = vperm.slane %v258_v9, 3 }
 0x13d   :  { %v1187_v22 = vsel %vm262_vm1, %v255_v55, %v258_v9 }
 0x13e   :  { %v1190_v23 = vsel %vm262_vm1, %v273_v10, %v274_v14  ;;  %v1193_v24 = vsel %vm262_vm1, %v276_v11, %v277_v16  ;;  %v1196_v25 = vsel %vm262_vm1, %v279_v12, %v280_v20  ;;  %v1199_v26 = vsel %vm262_vm1, %v282_v13, %v283_v21 }
 0x141   :  { %v759_v28 = vpop.eup %758 }
 0x142   :  { %v321_v29 = vmul.f32 %v759_v28, %v1175_v1 }
 0x144   :  { %v325_v30 = vadd.f32 %v1204_v27, %v321_v29 }
 0x146   :  { %328 = vrot.lane.b32.xlu0 %v325_v30, %s821_s23  ;;  %v326_v33 = vmul.f32 0.0, %v325_v30 }
 0x1b8   :  { %v329_v31 = vpop.permute.xlu0 %328 }
 0x1b9   :  { %v331_v32 = vmul.f32 %v329_v31, %v325_v30 }
 0x1bb   :  { %333 = vrot.lane.b32.xlu0 %v331_v32, %s822_s24 }
 0x22d   :  { %v334_v34 = vpop.permute.xlu0 %333 }
 0x22e   :  { %v336_v35 = vadd.f32 %v334_v34, %v326_v33 }
 0x230   :  { %760 = vtanh.f32 %v336_v35 }
 0x236   :  { %v761_v36 = vpop.eup %760 }
 0x237   :  { %339 = vrot.lane.b32.xlu1 %v761_v36, %s821_s23 }
 0x2a9   :  { %v340_v37 = vpop.permute.xlu1 %339 }
 0x2aa   :  { %v342_v38 = vmul.f32 %v340_v37, %v325_v30 }
 0x2ac   :  { %344 = vrot.lane.b32.xlu1 %v342_v38, %s822_s24 }
 0x31e   :  { %v345_v39 = vpop.permute.xlu1 %344 }
 0x31f   :  { %743 = vmatmul.msk.f32.vlgmr.msrb.gmra.mxu2 %vm224_vm0, %v345_v39 }
 0x320   :  { %642 = vmatpush.msrb.mxu2 %v1109_v15 }
 0x322   :  { %643 = vmatpush.msrb.mxu2 %v1120_v17 }
 0x324   :  { %644 = vmatpush.msrb.mxu2 %v1128_v18 }
 0x326   :  { %645 = vmatpush.msrb.mxu2 %v1136_v19 }
 0x3a2   :  { %v365_v40 = vpop.f32.mrf.mxu2 }
 0x3a3   :  { %v368_v41 = vadd.f32 %v365_v40, %v266_v3 }
 0x3a5   :  { %v369_v42 = vmul.f32 %v1175_v1, %v368_v41 }
 0x3a7   :  { %762 = vtanh.f32 %v369_v42 }
 0x3ad   :  { %v763_v43 = vpop.eup %762 }
 0x3ae   :  { %v371_v44 = vmul.f32 %v763_v43, %v1175_v1 }
 0x3b0   :  { %v372_v45 = vadd.f32 %v1204_v27, %v371_v44 }
 0x3b2   :  { %375 = vrot.lane.b32.xlu2 %v372_v45, %s821_s23  ;;  %v373_v48 = vmul.f32 %v372_v45, %v336_v35 }
 0x40c   :  { %v376_v46 = vpop.permute.xlu2 %375 }
 0x40d   :  { %v378_v47 = vmul.f32 %v376_v46, %v372_v45 }
 0x40f   :  { %380 = vrot.lane.b32.xlu2 %v378_v47, %s822_s24 }
 0x469   :  { %v381_v49 = vpop.permute.xlu2 %380 }
 0x46a   :  { %v383_v50 = vadd.f32 %v381_v49, %v373_v48 }
 0x46c   :  { %764 = vtanh.f32 %v383_v50 }
 0x472   :  { %v765_v51 = vpop.eup %764 }
 0x473   :  { %386 = vrot.lane.b32.xlu0 %v765_v51, %s821_s23 }
 0x4e5   :  { %v387_v52 = vpop.permute.xlu0 %386 }
 0x4e6   :  { %v389_v53 = vmul.f32 %v387_v52, %v372_v45 }
 0x4e8   :  { %391 = vrot.lane.b32.xlu1 %v389_v53, %s822_s24 }
 0x55a   :  { %v392_v54 = vpop.permute.xlu1 %391 }
 0x55b   :  { %744 = vmatmul.msk.f32.vlgmr.msrb.gmra.mxu3 %vm224_vm0, %v392_v54 }
 0x55c   :  { %689 = vmatpush.msrb.mxu3 %v1109_v15 }
 0x55e   :  { %690 = vmatpush.msrb.mxu3 %v1120_v17 }
 0x560   :  { %691 = vmatpush.msrb.mxu3 %v1128_v18 }
 0x562   :  { %692 = vmatpush.msrb.mxu3 %v1136_v19 }
 0x5de   :  { %v412_v55 = vpop.f32.mrf.mxu3 }
 0x5df   :  { %v415_v56 = vadd.f32 %v412_v55, %v1180_v4 }
 0x5e1   :  { %v416_v57 = vmul.f32 %v1175_v1, %v415_v56 }
 0x5e3   :  { %766 = vtanh.f32 %v416_v57 }
 0x5e9   :  { %v767_v58 = vpop.eup %766 }
 0x5ea   :  { %v418_v59 = vmul.f32 %v767_v58, %v1175_v1 }
 0x5ec   :  { %v419_v60 = vadd.f32 %v1204_v27, %v418_v59 }
 0x5ee   :  { %422 = vrot.lane.b32.xlu2 %v419_v60, %s821_s23  ;;  %v420_v17 = vmul.f32 %v419_v60, %v383_v50 }
 0x648   :  { %v423_v15 = vpop.permute.xlu2 %422 }
 0x649   :  { %v425_v61 = vmul.f32 %v423_v15, %v419_v60 }
 0x64b   :  { %427 = vrot.lane.b32.xlu0 %v425_v61, %s822_s24 }
 0x6bd   :  { %v428_v18 = vpop.permute.xlu0 %427 }
 0x6be   :  { %v430_v19 = vadd.f32 %v428_v18, %v420_v17 }
 0x6c0   :  { %768 = vtanh.f32 %v430_v19 }
 0x6c6   :  { %v769_v62 = vpop.eup %768 }
 0x6c7   :  { %433 = vrot.lane.b32.xlu1 %v769_v62, %s821_s23 }
 0x739   :  { %v434_v63 = vpop.permute.xlu1 %433 }
 0x73a   :  { %v436_v0 = vmul.f32 %v434_v63, %v419_v60 }
 0x73c   :  { %438 = vrot.lane.b32.xlu2 %v436_v0, %s822_s24 }
 0x796   :  { %v439_v2 = vpop.permute.xlu2 %438 }
 0x797   :  { %745 = vmatmul.msk.f32.vlgmr.msra.gmra.mxu1 %vm224_vm0, %v439_v2 }
 0x814   :  { %v459_v3 = vpop.f32.mrf.mxu1 }
 0x815   :  { %v462_v4 = vadd.f32 %v459_v3, %v1183_v5 }
 0x817   :  { %v463_v6 = vmul.f32 %v1175_v1, %v462_v4 }
 0x819   :  { %770 = vtanh.f32 %v463_v6 }
 0x81f   :  { %v771_v7 = vpop.eup %770 }
 0x820   :  { %v465_v8 = vmul.f32 %v771_v7, %v1175_v1 }
 0x822   :  { %v466_v9 = vadd.f32 %v1204_v27, %v465_v8 }
 0x824   :  { %469 = vrot.lane.b32.xlu0 %v466_v9, %s821_s23  ;;  %v467_v12 = vmul.f32 %v466_v9, %v430_v19 }
 0x896   :  { %v470_v10 = vpop.permute.xlu0 %469 }
 0x897   :  { %v472_v11 = vmul.f32 %v470_v10, %v466_v9 }
 0x899   :  { %474 = vrot.lane.b32.xlu1 %v472_v11, %s822_s24 }
 0x90b   :  { %v475_v13 = vpop.permute.xlu1 %474 }
 0x90c   :  { %v477_v14 = vadd.f32 %v475_v13, %v467_v12 }
 0x90e   :  { %772 = vtanh.f32 %v477_v14 }
 0x914   :  { %v773_v16 = vpop.eup %772 }
 0x915   :  { %480 = vrot.lane.b32.xlu2 %v773_v16, %s821_s23 }
 0x96f   :  { %v481_v5 = vpop.permute.xlu2 %480 }
 0x970   :  { %v483_v20 = vmul.f32 %v481_v5, %v466_v9 }
 0x972   :  { %485 = vrot.lane.b32.xlu0 %v483_v20, %s822_s24 }
 0x9e4   :  { %v486_v21 = vpop.permute.xlu0 %485 }
 0x9e5   :  { %746 = vmatmul.msk.f32.vlgmr.msra.gmra.mxu2 %vm224_vm0, %v486_v21 }
 0xa68   :  { %v506_v28 = vpop.f32.mrf.mxu2 }
 0xa69   :  { %v509_v29 = vadd.f32 %v506_v28, %v1190_v23 }
 0xa6b   :  { %v510_v30 = vmul.f32 %v1175_v1, %v509_v29 }
 0xa6d   :  { %774 = vtanh.f32 %v510_v30 }
 0xa73   :  { %v775_v31 = vpop.eup %774 }
 0xa74   :  { %v512_v32 = vmul.f32 %v775_v31, %v1175_v1 }
 0xa76   :  { %v513_v33 = vadd.f32 %v1204_v27, %v512_v32 }
 0xa78   :  { %516 = vrot.lane.b32.xlu1 %v513_v33, %s821_s23  ;;  %v514_v36 = vmul.f32 %v513_v33, %v477_v14 }
 0xaea   :  { %v517_v34 = vpop.permute.xlu1 %516 }
 0xaeb   :  { %v519_v35 = vmul.f32 %v517_v34, %v513_v33 }
 0xaed   :  { %521 = vrot.lane.b32.xlu2 %v519_v35, %s822_s24 }
 0xb47   :  { %v522_v37 = vpop.permute.xlu2 %521 }
 0xb48   :  { %v524_v38 = vadd.f32 %v522_v37, %v514_v36 }
 0xb4a   :  { %776 = vtanh.f32 %v524_v38 }
 0xb50   :  { %v777_v39 = vpop.eup %776 }
 0xb51   :  { %527 = vrot.lane.b32.xlu0 %v777_v39, %s821_s23 }
 0xbc3   :  { %v528_v23 = vpop.permute.xlu0 %527 }
 0xbc4   :  { %v530_v40 = vmul.f32 %v528_v23, %v513_v33 }
 0xbc6   :  { %532 = vrot.lane.b32.xlu1 %v530_v40, %s822_s24 }
 0xc38   :  { %v533_v41 = vpop.permute.xlu1 %532 }
 0xc39   :  { %747 = vmatmul.msk.f32.vlgmr.msra.gmra.mxu3 %vm224_vm0, %v533_v41 }
 0xcbc   :  { %v553_v42 = vpop.f32.mrf.mxu3 }
 0xcbd   :  { %v556_v43 = vadd.f32 %v553_v42, %v1193_v24 }
 0xcbf   :  { %v557_v44 = vmul.f32 %v1175_v1, %v556_v43 }
 0xcc1   :  { %778 = vtanh.f32 %v557_v44 }
 0xcc7   :  { %v779_v45 = vpop.eup %778 }
 0xcc8   :  { %v559_v46 = vmul.f32 %v779_v45, %v1175_v1 }
 0xcca   :  { %v560_v47 = vadd.f32 %v1204_v27, %v559_v46 }
 0xccc   :  { %563 = vrot.lane.b32.xlu2 %v560_v47, %s821_s23  ;;  %v561_v50 = vmul.f32 %v560_v47, %v524_v38 }
 0xd26   :  { %v564_v48 = vpop.permute.xlu2 %563 }
 0xd27   :  { %v566_v49 = vmul.f32 %v564_v48, %v560_v47 }
 0xd29   :  { %568 = vrot.lane.b32.xlu0 %v566_v49, %s822_s24 }
 0xd9b   :  { %v569_v51 = vpop.permute.xlu0 %568 }
 0xd9c   :  { %v571_v52 = vadd.f32 %v569_v51, %v561_v50 }
 0xd9e   :  { %780 = vtanh.f32 %v571_v52 }
 0xda4   :  { %v781_v53 = vpop.eup %780 }
 0xda5   :  { %574 = vrot.lane.b32.xlu1 %v781_v53, %s821_s23 }
 0xe17   :  { %v575_v24 = vpop.permute.xlu1 %574 }
 0xe18   :  { %v577_v54 = vmul.f32 %v575_v24, %v560_v47 }
 0xe1a   :  { %579 = vrot.lane.b32.xlu2 %v577_v54, %s822_s24 }
 0xe74   :  { %v580_v55 = vpop.permute.xlu2 %579 }
 0xe75   :  { %748 = vmatmul.msk.f32.vlgmr.msrb.gmra.mxu1 %vm224_vm0, %v580_v55 }
 0xef2   :  { %v600_v56 = vpop.f32.mrf.mxu1 }
 0xef3   :  { %v603_v57 = vadd.f32 %v600_v56, %v1196_v25 }
 0xef5   :  { %v604_v58 = vmul.f32 %v1175_v1, %v603_v57 }
 0xef7   :  { %782 = vtanh.f32 %v604_v58 }
 0xefd   :  { %v783_v59 = vpop.eup %782 }
 0xefe   :  { %v606_v60 = vmul.f32 %v783_v59, %v1175_v1 }
 0xf00   :  { %v607_v15 = vadd.f32 %v1204_v27, %v606_v60 }
 0xf02   :  { %610 = vrot.lane.b32.xlu0 %v607_v15, %s821_s23  ;;  %v608_v18 = vmul.f32 %v607_v15, %v571_v52 }
 0xf74   :  { %v611_v61 = vpop.permute.xlu0 %610 }
 0xf75   :  { %v613_v17 = vmul.f32 %v611_v61, %v607_v15 }
 0xf77   :  { %615 = vrot.lane.b32.xlu1 %v613_v17, %s822_s24 }
 0xfe9   :  { %v616_v19 = vpop.permute.xlu1 %615 }
 0xfea   :  { %v618_v62 = vadd.f32 %v616_v19, %v608_v18 }
 0xfec   :  { %784 = vtanh.f32 %v618_v62 }
 0xff2   :  { %v785_v63 = vpop.eup %784 }
 0xff3   :  { %621 = vrot.lane.b32.xlu2 %v785_v63, %s821_s23 }
0x104d   :  { %v622_v25 = vpop.permute.xlu2 %621 }
0x104e   :  { %v624_v0 = vmul.f32 %v622_v25, %v607_v15 }
0x1050   :  { %626 = vrot.lane.b32.xlu0 %v624_v0, %s822_s24 }
0x10c2   :  { %v627_v2 = vpop.permute.xlu0 %626 }
0x10c3   :  { %749 = vmatmul.msk.f32.vlgmr.msrb.gmra.mxu2 %vm224_vm0, %v627_v2 }
0x1146   :  { %v647_v3 = vpop.f32.mrf.mxu2 }
0x1147   :  { %v650_v4 = vadd.f32 %v647_v3, %v1199_v26 }
0x1149   :  { %v651_v6 = vmul.f32 %v1175_v1, %v650_v4 }
0x114b   :  { %786 = vtanh.f32 %v651_v6 }
0x1151   :  { %v787_v7 = vpop.eup %786 }
0x1152   :  { %v653_v8 = vmul.f32 %v787_v7, %v1175_v1 }
0x1154   :  { %v654_v9 = vadd.f32 %v1204_v27, %v653_v8 }
0x1156   :  { %657 = vrot.lane.b32.xlu1 %v654_v9, %s821_s23  ;;  %v655_v12 = vmul.f32 %v654_v9, %v618_v62 }
0x11c8   :  { %v658_v10 = vpop.permute.xlu1 %657 }
0x11c9   :  { %v660_v11 = vmul.f32 %v658_v10, %v654_v9 }
0x11cb   :  { %662 = vrot.lane.b32.xlu2 %v660_v11, %s822_s24 }
0x1225   :  { %v663_v13 = vpop.permute.xlu2 %662 }
0x1226   :  { %v665_v14 = vadd.f32 %v663_v13, %v655_v12 }
0x1228   :  { %788 = vtanh.f32 %v665_v14 }
0x122e   :  { %v789_v16 = vpop.eup %788 }
0x122f   :  { %668 = vrot.lane.b32.xlu0 %v789_v16, %s821_s23 }
0x12a1   :  { %v669_v26 = vpop.permute.xlu0 %668 }
0x12a2   :  { %v671_v5 = vmul.f32 %v669_v26, %v654_v9 }
0x12a4   :  { %673 = vrot.lane.b32.xlu1 %v671_v5, %s822_s24 }
0x1316   :  { %v674_v20 = vpop.permute.xlu1 %673 }
0x1317   :  { %750 = vmatmul.msk.f32.vlgmr.msrb.gmra.mxu3 %vm224_vm0, %v674_v20 }
0x139a   :  { %v694_v21 = vpop.f32.mrf.mxu3 }
0x139b   :  { %v697_v28 = vadd.f32 %v694_v21, %v1187_v22 }
0x139d   :  { %v698_v29 = vmul.f32 %v1175_v1, %v697_v28 }
0x139f   :  { %790 = vtanh.f32 %v698_v29 }
0x13a5   :  { %v791_v30 = vpop.eup %790 }
0x13a6   :  { %v700_v31 = vmul.f32 %v791_v30, %v1175_v1 }
0x13a8   :  { %v701_v32 = vadd.f32 %v1204_v27, %v700_v31 }
0x13aa   :  { %704 = vrot.lane.b32.xlu2 %v701_v32, %s821_s23  ;;  %v702_v35 = vmul.f32 %v701_v32, %v665_v14 }
0x1404   :  { %v705_v33 = vpop.permute.xlu2 %704 }
0x1405   :  { %v707_v34 = vmul.f32 %v705_v33, %v701_v32 }
0x1407   :  { %709 = vrot.lane.b32.xlu0 %v707_v34, %s822_s24 }
0x1479   :  { %v710_v36 = vpop.permute.xlu0 %709 }
0x147a   :  { %v712_v37 = vadd.f32 %v710_v36, %v702_v35 }
0x147c   :  { %792 = vtanh.f32 %v712_v37 }
0x1482   :  { %v793_v38 = vpop.eup %792 }
0x1483   :  { %715 = vrot.lane.b32.xlu1 %v793_v38, %s821_s23 }
0x14f5   :  { %v716_v22 = vpop.permute.xlu1 %715 }
0x14f6   :  { %v718_v39 = vmul.f32 %v716_v22, %v701_v32 }
0x14f8   :  { %720 = vrot.lane.b32.xlu2 %v718_v39, %s822_s24 }
0x1552   :  { %v721_v1 = vpop.permute.xlu2 %720 }
0x1553   :  { %723 = vst.msk [vmem:[#allocation2] sm:$0xff] %vm224_vm0, %v721_v1 }
0x1554   :  { %734 = dma.vmem_to_hbm [thread:$0]  %s730_s25, 128, %s732_s28, [#allocation3]  }
0x1555   :  { %818 = dma.done.wait [#allocation3], 128  }
0x1556   :  { %819 = vsyncadd [#allocation3], 4294967168 }
0x1557   :  { %739 = vsyncpa [#allocation3], 1 }

// kernel: cnn_lstm_forward.2
= control target key start
LH: loop header
LB: loop body
LE: loop exit
PB: predicated region body
PF: predicated region fallthrough
CT: control target
= control target key end

     0   :  { %s1677_s15 = smov 0   ;;  %s2324_s0 = inlined_call_operand.vmem [shape: f32[240,36], index: 0, kind: input, shape index: {}]   ;;  %s2325_s1 = inlined_call_operand.vmem [shape: f32[72,64], index: 1, kind: input, shape index: {}]   ;;  %s2326_s2 = inlined_call_operand.vmem [shape: f32[576,64], index: 2, kind: input, shape index: {}]   ;;  %s2327_s3 = inlined_call_operand.vmem [shape: f32[4,64], index: 3, kind: input, shape index: {}]   ;;  %s2328_s4 = inlined_call_operand.vmem [shape: f32[192,64], index: 4, kind: output, shape index: {}]  }
   0x1 LB: > { %s1490_s16 = sadd.s32 4294967295, %s1649_s15   ;;  %p1494_p0 = scmp.ge.s32.totalorder %s1649_s15, 1  ;;  %s1649_s15 = sphi %s1677_s15, %s14_s15  }
   0x2   : > { %p163_p1 = scmp.lt.s32.totalorder %s1649_s15, 4 }
   0x4   : > { %p164_p2 = pnand %p1494_p0, %p163_p1 }
   0x5   : > { %s189_s25 = smul.u32 (!%p164_p2), 10, %s1490_s16  ;;  %s1496_s24 = sshll.u32 (!%p164_p2), %s1490_s16, 3 }
   0x6   : > { %167 = sbr.rel (%p164_p2) target bundleno = 783 (0x30f), region = 36  ;;  %p196_p4 = scmp.lt.s32.totalorder (!%p164_p2), %s1496_s24, 23 }
   0x7   : > { %p190_p3 = scmp.lt.s32.totalorder (!%p164_p2), %s189_s25, 29 }
   0xb   : > { %v231_v0 = vld [vmem:[%s2325_s1 + $0x44] sm:$0xf]  ;;  %vm283_vm0 = vcmask 1043456   ;;  %v226_v1 = vld [vmem:[%s2325_s1 + $0x20] sm:$0xf]  ;;  %v225_v3 = vld [vmem:[%s2325_s1 + $0x18] sm:$0xff] }
   0xc   : > { %v230_v2 = vld [vmem:[%s2325_s1 + $0x3c] sm:$0xff]  ;;  %1498 = vmatpush.msk.msra.mxu0 %vm283_vm0, %v231_v0  ;;  %1509 = vmatpush.msk.msra.mxu1 %vm283_vm0, %v226_v1  ;;  %v229_v4 = vld [vmem:[%s2325_s1 + $0x34] sm:$0xff]  ;;  %v228_v6 = vld [vmem:[%s2325_s1 + $0x2c] sm:$0xff]  ;;  %s2330_s25 = smov (!%p190_p3, %s189_s25), 29  ;;  %vm262_vm1 = vcmask 293888   ;;  %vm242_vm2 = vcmask 1046528  }
   0xd   : > { %v224_v5 = vld [vmem:[%s2325_s1 + $0x10] sm:$0xff]  ;;  %1612 = vmatpush.msk.msra.mxu2 %vm283_vm0, %v231_v0  ;;  %v223_v7 = vld [vmem:[%s2325_s1 + $0x8] sm:$0xff]  ;;  %v222_v9 = vld [vmem:[%s2325_s1] sm:$0xff]  ;;  %s1495_s12 = sshll.u32 %s2330_s25, 3  ;;  %vm201_vm3 = vcmask 523264   ;;  %v1651_v39 = vmov 0.0  }
   0xe   : > { %299 = vmatpush.msra.mxu0 %v230_v2  ;;  %369 = vmatpush.msra.mxu1 %v225_v3  ;;  %v227_v8 = vld [vmem:[%s2325_s1 + $0x24] sm:$0xff]  ;;  %s1723_s17 = scalar_lea.vmem %s2324_s0, %s1495_s12  ;;  %202 = vst.msk [vmem:[#allocation2] sm:$0xff] %vm201_vm3, %v1651_v39  ;;  %v471_v40 = vld [vmem:[%s2326_s2 + $0x78] sm:$0xff]  ;;  %v470_v42 = vld [vmem:[%s2326_s2 + $0x70] sm:$0xff]  ;;  %vm427_vm4 = vcmask 523266   ;;  %vm429_vm5 = vcmask 517120  }
   0xf   : > { %1613 = vmatpush.msra.mxu2 %v230_v2  ;;  %v212_v10 = vld [vmem:[%s1723_s17] sm:$0xff]  ;;  %v213_v11 = vld [vmem:[%s1723_s17 + $0x8] sm:$0xff]  ;;  %v214_v16 = vld [vmem:[%s1723_s17 + $0x10] sm:$0xff]  ;;  %203 = vst.msk [vmem:[#allocation2 + $0x8] sm:$0xff] %vm201_vm3, %v1651_v39  ;;  %1622 = vmatpush.msra.mxu3 %v471_v40  ;;  %vm431_vm6 = vcmask 523268   ;;  %vm643_vm7 = vcmask 1045504  }
  0x10   : > { %300 = vmatpush.msra.mxu0 %v229_v4  ;;  %370 = vmatpush.msra.mxu1 %v224_v5  ;;  %v243_v12 = vrot.slane %v212_v10, 1  ;;  %v244_v13 = vrot.slane %v213_v11, 1  ;;  %v220_v14 = vld [vmem:[%s1723_s17 + $0x40] sm:$0xff]  ;;  %v221_v15 = vld [vmem:[%s1723_s17 + $0x48] sm:$0xff]  ;;  %v246_v21 = vrot.slane %v214_v16, 1  ;;  %v215_v23 = vld [vmem:[%s1723_s17 + $0x18] sm:$0xff] }
  0x11   : > { %1614 = vmatpush.msra.mxu2 %v229_v4  ;;  %v258_v17 = vrot.slane %v220_v14, 1  ;;  %v260_v18 = vrot.slane %v221_v15, 1  ;;  %v248_v24 = vrot.slane %v215_v23, 1  ;;  %v216_v26 = vld [vmem:[%s1723_s17 + $0x20] sm:$0xff]  ;;  %v217_v29 = vld [vmem:[%s1723_s17 + $0x28] sm:$0xff]  ;;  %v218_v32 = vld [vmem:[%s1723_s17 + $0x30] sm:$0xff]  ;;  %1623 = vmatpush.msra.mxu3 %v470_v42 }
  0x12   : > { %301 = vmatpush.msra.mxu0 %v228_v6  ;;  %371 = vmatpush.msra.mxu1 %v223_v7  ;;  %v245_v19 = vsel %vm242_vm2, %v243_v12, %v244_v13  ;;  %v247_v22 = vsel %vm242_vm2, %v244_v13, %v246_v21  ;;  %v250_v27 = vrot.slane %v216_v26, 1  ;;  %v252_v30 = vrot.slane %v217_v29, 1  ;;  %v219_v35 = vld [vmem:[%s1723_s17 + $0x38] sm:$0xff]  ;;  %204 = vst.msk [vmem:[#allocation2 + $0x10] sm:$0xff] %vm201_vm3, %v1651_v39  ;;  %v641_v43 = vld [vmem:[%s2326_s2 + $0xb0] sm:$0xff]  ;;  %v469_v44 = vld [vmem:[%s2326_s2 + $0x68] sm:$0xff] }
  0x13   : > { %1615 = vmatpush.msra.mxu2 %v228_v6  ;;  %v261_v20 = vsel %vm242_vm2, %v258_v17, %v260_v18  ;;  %v249_v25 = vsel %vm242_vm2, %v246_v21, %v248_v24  ;;  %v254_v33 = vrot.slane %v218_v32, 1  ;;  %v256_v36 = vrot.slane %v219_v35, 1  ;;  %205 = vst.msk [vmem:[#allocation2 + $0x18] sm:$0xff] %vm201_vm3, %v1651_v39  ;;  %v642_v41 = vld [vmem:[%s2326_s2 + $0xb8] sm:$0xff]  ;;  %v640_v45 = vld [vmem:[%s2326_s2 + $0xa8] sm:$0xff]  ;;  %1624 = vmatpush.msra.mxu3 %v469_v44  ;;  %v468_v46 = vld [vmem:[%s2326_s2 + $0x60] sm:$0xff] }
  0x14   : > { %302 = vmatpush.msra.mxu0 %v227_v8  ;;  %372 = vmatpush.msra.mxu1 %v222_v9  ;;  %v251_v28 = vsel %vm242_vm2, %v248_v24, %v250_v27  ;;  %v253_v31 = vsel %vm242_vm2, %v250_v27, %v252_v30  ;;  %206 = vst.msk [vmem:[#allocation2 + $0x20] sm:$0xff] %vm201_vm3, %v1651_v39  ;;  %v639_v47 = vld [vmem:[%s2326_s2 + $0xa0] sm:$0xff]  ;;  %v467_v48 = vld [vmem:[%s2326_s2 + $0x58] sm:$0xff]  ;;  %v466_v50 = vld [vmem:[%s2326_s2 + $0x50] sm:$0xff]  ;;  %vm433_vm8 = vcmask 519168   ;;  %vm435_vm9 = vcmask 523270  }
  0x15   : > { %1510 = vmatmul.msk.f32.vlgmr.msra.gmra.mxu1 %vm262_vm1, %v212_v10  ;;  %1616 = vmatpush.msra.mxu2 %v227_v8  ;;  %v255_v34 = vsel %vm242_vm2, %v252_v30, %v254_v33  ;;  %v257_v37 = vsel %vm242_vm2, %v254_v33, %v256_v36  ;;  %v259_v38 = vsel %vm242_vm2, %v256_v36, %v258_v17  ;;  %v638_v49 = vld [vmem:[%s2326_s2 + $0x98] sm:$0xff]  ;;  %v637_v51 = vld [vmem:[%s2326_s2 + $0x90] sm:$0xff]  ;;  %v465_v52 = vld [vmem:[%s2326_s2 + $0x48] sm:$0xff]  ;;  %vm437_vm10 = vcmask 521216   ;;  %s2332_s24 = smov (!%p196_p4, %s1496_s24), 23 }
  0x16   : > { %1499 = vmatmul.msk.f32.vlgmr.msra.gmra.mxu0 %vm262_vm1, %v245_v19  ;;  %1507 = vmatmul.msk.f32.vlgmr.msra.gmra.mxu2 %vm262_vm1, %v261_v20  ;;  %207 = vst.msk [vmem:[#allocation2 + $0x28] sm:$0xff] %vm201_vm3, %v1651_v39  ;;  %v636_v53 = vld [vmem:[%s2326_s2 + $0x88] sm:$0xff]  ;;  %v464_v54 = vld [vmem:[%s2326_s2 + $0x40] sm:$0xff]  ;;  %v463_v6 = vld [vmem:[%s2326_s2 + $0x38] sm:$0xff]  ;;  %s1497_s27 = sshll.u32 %s2332_s24, 3 }
  0x17   : > { %1617 = vmatpush.msk.msrb.mxu2 %vm283_vm0, %v226_v1  ;;  %208 = vst.msk [vmem:[#allocation2 + $0x30] sm:$0xff] %vm201_vm3, %v1651_v39  ;;  %691 = vmatpush.msrb.mxu0 %v642_v41  ;;  %v635_v55 = vld [vmem:[%s2326_s2 + $0x80] sm:$0xff]  ;;  %v462_v19 = vld [vmem:[%s2326_s2 + $0x30] sm:$0xff]  ;;  %v461_v36 = vld [vmem:[%s2326_s2 + $0x28] sm:$0xff]  ;;  %s2282_s16 = scalar_lea.vmem %s2328_s4, %s1497_s27 }
  0x18   : > { %209 = vst.msk [vmem:[#allocation2 + $0x38] sm:$0xff] %vm201_vm3, %v1651_v39  ;;  %1625 = vmatpush.msra.mxu3 %v468_v46  ;;  %v1826_v57 = vld [vmem:[%s2327_s3] ss:$0 sm:$0xff] }
  0x19   : > { %1618 = vmatpush.msrb.mxu2 %v225_v3  ;;  %210 = vst.msk [vmem:[#allocation2 + $0x40] sm:$0xff] %vm201_vm3, %v1651_v39  ;;  %692 = vmatpush.msrb.mxu0 %v641_v43 }
  0x1a   : > { %211 = vst.msk [vmem:[#allocation2 + $0x48] sm:$0xff] %vm201_vm3, %v1651_v39  ;;  %1626 = vmatpush.msra.mxu3 %v467_v48 }
  0x1b   : > { %1619 = vmatpush.msrb.mxu2 %v224_v5  ;;  %693 = vmatpush.msrb.mxu0 %v640_v45 }
  0x1c   : > { %1627 = vmatpush.msra.mxu3 %v466_v50 }
  0x1d   : > { %1620 = vmatpush.msrb.mxu2 %v223_v7  ;;  %1511 = vmatmul.msk.f32.gmra.mxu1 %vm262_vm1, %v213_v11 }
  0x1e   : > { %1500 = vmatmul.msk.f32.gmra.mxu0 %vm262_vm1, %v247_v22  ;;  %1508 = vmatmul.msk.f32.gmra.mxu2 %vm262_vm1, %v260_v18 }
  0x1f   : > { %1621 = vmatpush.msrb.mxu2 %v222_v9  ;;  %694 = vmatpush.msrb.mxu0 %v639_v47 }
  0x20   : > { %1628 = vmatpush.msra.mxu3 %v465_v52 }
  0x21   : > { %529 = vmatpush.msra.mxu2 %v471_v40  ;;  %695 = vmatpush.msrb.mxu0 %v638_v49 }
  0x22   : > { %1629 = vmatpush.msra.mxu3 %v464_v54 }
  0x23   : > { %530 = vmatpush.msra.mxu2 %v470_v42  ;;  %696 = vmatpush.msrb.mxu0 %v637_v51  ;;  %v460_v42 = vld [vmem:[%s2326_s2 + $0x20] sm:$0xff] }
  0x24   : > { %596 = vmatpush.msrb.mxu3 %v463_v6 }
  0x25   : > { %1512 = vmatmul.msk.f32.gmra.mxu1 %vm262_vm1, %v214_v16  ;;  %531 = vmatpush.msra.mxu2 %v469_v44 }
  0x26   : > { %1501 = vmatmul.msk.f32.gmra.mxu0 %vm262_vm1, %v249_v25  ;;  %1518 = vmatmul.msk.f32.vlgmr.msrb.gmra.mxu2 %vm262_vm1, %v220_v14 }
  0x27   : > { %532 = vmatpush.msra.mxu2 %v468_v46  ;;  %697 = vmatpush.msrb.mxu0 %v636_v53 }
  0x28   : > { %597 = vmatpush.msrb.mxu3 %v462_v19 }
  0x29   : > { %533 = vmatpush.msra.mxu2 %v467_v48  ;;  %698 = vmatpush.msrb.mxu0 %v635_v55 }
  0x2a   : > { %598 = vmatpush.msrb.mxu3 %v461_v36 }
  0x2b   : > { %534 = vmatpush.msra.mxu2 %v466_v50 }
  0x2c   : > { %599 = vmatpush.msrb.mxu3 %v460_v42  ;;  %v969_v42 = vld [vmem:[%s2326_s2 + $0x160] sm:$0xff] }
  0x2d   : > { %1513 = vmatmul.msk.f32.gmra.mxu1 %vm262_vm1, %v215_v23  ;;  %535 = vmatpush.msra.mxu2 %v465_v52 }
  0x2e   : > { %1502 = vmatmul.msk.f32.gmra.mxu0 %vm262_vm1, %v251_v28  ;;  %1519 = vmatmul.msk.f32.gmra.mxu2 %vm262_vm1, %v221_v15 }
  0x2f   : > { %536 = vmatpush.msra.mxu2 %v464_v54  ;;  %v459_v54 = vld [vmem:[%s2326_s2 + $0x18] sm:$0xff] }
  0x30   : > { %600 = vmatpush.msrb.mxu3 %v459_v54  ;;  %v790_v54 = vld [vmem:[%s2326_s2 + $0xe0] sm:$0xff] }
  0x35   : > { %1514 = vmatmul.msk.f32.gmra.mxu1 %vm262_vm1, %v216_v26 }
  0x36   : > { %1503 = vmatmul.msk.f32.gmra.mxu0 %vm262_vm1, %v253_v31 }
  0x3d   : > { %1515 = vmatmul.msk.f32.gmra.mxu1 %vm262_vm1, %v217_v29 }
  0x3e   : > { %1504 = vmatmul.msk.f32.gmra.mxu0 %vm262_vm1, %v255_v34 }
  0x45   : > { %1516 = vmatmul.msk.f32.gmra.mxu1 %vm262_vm1, %v218_v32 }
  0x46   : > { %1505 = vmatmul.msk.f32.gmra.mxu0 %vm262_vm1, %v257_v37 }
  0x4d   : > { %1517 = vmatmul.msk.f32.gmra.mxu1 %vm262_vm1, %v219_v35 }
  0x4e   : > { %1506 = vmatmul.msk.f32.gmra.mxu0 %vm262_vm1, %v259_v38 }
  0x92   : > { %v374_v56 = vpop.f32.mrf.mxu1 }
  0x93   : > { %v304_v58 = vpop.f32.mrf.mxu0 }
  0x94   : > { %v375_v59 = vadd.f32 %v374_v56, %v304_v58 }
  0x96   : > { %v406_v60 = vadd.f32 %v1826_v57, %v375_v59 }
  0x98   : > { %v416_v61 = vmax.f32 %v406_v60, 0.0 }
  0x99   : > { %v328_v63 = vpop.f32.mrf.mxu2 }
  0x9a   : > { %v377_v62 = vpop.f32.mrf.mxu1  ;;  %426 = vst.msk [vmem:[#allocation2 + $0x1] sm:$0xff] %vm201_vm3, %v416_v61 }
  0x9b   : > { %v307_v0 = vpop.f32.mrf.mxu0 }
  0x9c   : > { %v378_v1 = vadd.f32 %v377_v62, %v307_v0 }
  0x9e   : > { %v407_v2 = vadd.f32 %v1826_v57, %v378_v1 }
  0xa0   : > { %v417_v3 = vmax.f32 %v407_v2, 0.0  ;;  %v458_v2 = vld [vmem:[%s2326_s2 + $0x10] sm:$0xff] }
  0xa1   : > { %v331_v5 = vpop.f32.mrf.mxu2  ;;  %v1836_v10 = vld [vmem:[#allocation2] sm:$0xff]  ;;  %601 = vmatpush.msrb.mxu3 %v458_v2  ;;  %v795_v2 = vld [vmem:[%s2326_s2 + $0x108] sm:$0xff] }
  0xa2   : > { %v380_v4 = vpop.f32.mrf.mxu1  ;;  %428 = vst.msk [vmem:[#allocation2 + $0x9] sm:$0xfc] %vm427_vm4, %v417_v3  ;;  %v482_v14 = vrot.slane %v1836_v10, 1  ;;  %v644_v16 = vrot.slane %v1836_v10, 2 }
  0xa3   : > { %v310_v7 = vpop.f32.mrf.mxu0 }
  0xa4   : > { %v381_v8 = vadd.f32 %v380_v4, %v310_v7 }
  0xa6   : > { %v408_v9 = vadd.f32 %v1826_v57, %v381_v8 }
  0xa8   : > { %v418_v11 = vmax.f32 %v408_v9, 0.0 }
  0xa9   : > { %v1838_v13 = vld [vmem:[#allocation2 + $0x8] sm:$0xff]  ;;  %v398_v18 = vpop.f32.mrf.mxu2 }
  0xaa   : > { %v383_v12 = vpop.f32.mrf.mxu1  ;;  %430 = vst.msk [vmem:[#allocation2 + $0x11] sm:$0x3] %vm429_vm5, %v418_v11  ;;  %v483_v15 = vrot.slane %v1838_v13, 1  ;;  %v645_v17 = vrot.slane %v1838_v13, 2  ;;  %v399_v21 = vadd.f32 %v398_v18, %v328_v63 }
  0xab   : > { %432 = vst.msk [vmem:[#allocation2 + $0x11] sm:$0xf0] %vm431_vm6, %v418_v11  ;;  %v313_v20 = vpop.f32.mrf.mxu0 }
  0xac   : > { %v384_v22 = vadd.f32 %v383_v12, %v313_v20  ;;  %v484_v23 = vsel %vm242_vm2, %v482_v14, %v483_v15  ;;  %v646_v24 = vsel %vm643_vm7, %v644_v16, %v645_v17  ;;  %v414_v25 = vadd.f32 %v1826_v57, %v399_v21  ;;  %v456_v21 = vld [vmem:[%s2326_s2] sm:$0xff] }
  0xad   : > { %1520 = vmatmul.msk.f32.vlgmr.msra.gmra.mxu2 %vm201_vm3, %v484_v23  ;;  %1540 = vmatmul.msk.f32.vlgmr.msrb.gmra.mxu0 %vm201_vm3, %v646_v24 }
  0xae   : > { %v409_v26 = vadd.f32 %v1826_v57, %v384_v22  ;;  %v424_v27 = vmax.f32 %v414_v25, 0.0 }
  0xb0   : > { %v419_v28 = vmax.f32 %v409_v26, 0.0  ;;  %443 = vst.msk [vmem:[#allocation2 + $0x41] sm:$0xf] %vm433_vm8, %v424_v27 }
  0xb1   : > { %v401_v31 = vpop.f32.mrf.mxu2  ;;  %444 = vst.msk [vmem:[#allocation2 + $0x41] sm:$0xc0] %vm435_vm9, %v424_v27 }
  0xb2   : > { %v386_v29 = vpop.f32.mrf.mxu1  ;;  %434 = vst.msk [vmem:[#allocation2 + $0x19] sm:$0xf] %vm433_vm8, %v419_v28  ;;  %v1857_v30 = vld [vmem:[#allocation2 + $0x10] sm:$0xff]  ;;  %v402_v35 = vadd.f32 %v401_v31, %v331_v5 }
  0xb3   : > { %436 = vst.msk [vmem:[#allocation2 + $0x19] sm:$0xc0] %vm435_vm9, %v419_v28  ;;  %v316_v32 = vpop.f32.mrf.mxu0  ;;  %v485_v33 = vrot.slane %v1857_v30, 1  ;;  %v647_v34 = vrot.slane %v1857_v30, 2 }
  0xb4   : > { %v387_v37 = vadd.f32 %v386_v29, %v316_v32  ;;  %v415_v40 = vadd.f32 %v1826_v57, %v402_v35 }
  0xb5   : > { %v486_v38 = vsel %vm242_vm2, %v483_v15, %v485_v33  ;;  %v648_v39 = vsel %vm643_vm7, %v645_v17, %v647_v34  ;;  %v457_v15 = vld [vmem:[%s2326_s2 + $0x8] sm:$0xff] }
  0xb6   : > { %v410_v41 = vadd.f32 %v1826_v57, %v387_v37  ;;  %1521 = vmatmul.msk.f32.gmra.mxu2 %vm201_vm3, %v486_v38  ;;  %1541 = vmatmul.msk.f32.gmra.mxu0 %vm201_vm3, %v648_v39  ;;  %v425_v43 = vmax.f32 %v415_v40, 0.0  ;;  %v972_v38 = vld [vmem:[%s2326_s2 + $0x178] sm:$0xff]  ;;  %v970_v39 = vld [vmem:[%s2326_s2 + $0x168] sm:$0xff] }
  0xb7   : > { %602 = vmatpush.msrb.mxu3 %v457_v15 }
  0xb8   : > { %v420_v44 = vmax.f32 %v410_v41, 0.0  ;;  %445 = vst.msk [vmem:[#allocation2 + $0x49] sm:$0x3f] %vm437_vm10, %v425_v43  ;;  %v800_v41 = vld [vmem:[%s2326_s2 + $0x130] sm:$0xff] }
  0xb9   : > { %603 = vmatpush.msrb.mxu3 %v456_v21 }
  0xba   : > { %v389_v45 = vpop.f32.mrf.mxu1  ;;  %438 = vst.msk [vmem:[#allocation2 + $0x21] sm:$0x3f] %vm437_vm10, %v420_v44  ;;  %v1877_v46 = vld [vmem:[#allocation2 + $0x18] sm:$0xff]  ;;  %v799_v44 = vld [vmem:[%s2326_s2 + $0x128] sm:$0xff] }
  0xbb   : > { %v319_v47 = vpop.f32.mrf.mxu0  ;;  %v487_v48 = vrot.slane %v1877_v46, 1  ;;  %v649_v49 = vrot.slane %v1877_v46, 2 }
  0xbc   : > { %v390_v50 = vadd.f32 %v389_v45, %v319_v47  ;;  %v968_v45 = vld [vmem:[%s2326_s2 + $0x158] sm:$0xff]  ;;  %v798_v47 = vld [vmem:[%s2326_s2 + $0x120] sm:$0xff] }
  0xbd   : > { %v488_v51 = vsel %vm242_vm2, %v485_v33, %v487_v48  ;;  %v650_v52 = vsel %vm643_vm7, %v647_v34, %v649_v49 }
  0xbe   : > { %v411_v53 = vadd.f32 %v1826_v57, %v390_v50  ;;  %1522 = vmatmul.msk.f32.vlgmr.msra.gmra.mxu3 %vm201_vm3, %v488_v51  ;;  %1542 = vmatmul.msk.f32.gmra.mxu0 %vm201_vm3, %v650_v52  ;;  %v793_v50 = vld [vmem:[%s2326_s2 + $0xf8] sm:$0xff]  ;;  %v792_v51 = vld [vmem:[%s2326_s2 + $0xf0] sm:$0xff]  ;;  %v791_v52 = vld [vmem:[%s2326_s2 + $0xe8] sm:$0xff] }
  0xbf   : > { %v455_v33 = vld [vmem:[#allocation2 + $0x48] sm:$0xff]  ;;  %1020 = vmatpush.msra.mxu3 %v972_v38  ;;  %926 = vmatpush.msrb.mxu2 %v793_v50 }
  0xc0   : > { %v421_v55 = vmax.f32 %v411_v53, 0.0  ;;  %v499_v34 = vrot.slane %v455_v33, 1  ;;  %v661_v35 = vrot.slane %v455_v33, 2 }
  0xc1   : > { %v1889_v58 = vld [vmem:[#allocation2 + $0x20] sm:$0xff]  ;;  %927 = vmatpush.msrb.mxu2 %v792_v51 }
  0xc2   : > { %v392_v56 = vpop.f32.mrf.mxu1  ;;  %439 = vst.msk [vmem:[#allocation2 + $0x29] sm:$0xff] %vm201_vm3, %v421_v55  ;;  %v489_v59 = vrot.slane %v1889_v58, 1  ;;  %v651_v60 = vrot.slane %v1889_v58, 2  ;;  %v797_v55 = vld [vmem:[%s2326_s2 + $0x118] sm:$0xff] }
  0xc3   : > { %v322_v61 = vpop.f32.mrf.mxu0  ;;  %928 = vmatpush.msrb.mxu2 %v791_v52 }
  0xc4   : > { %v393_v62 = vadd.f32 %v392_v56, %v322_v61  ;;  %v490_v63 = vsel %vm242_vm2, %v487_v48, %v489_v59  ;;  %v652_v0 = vsel %vm643_vm7, %v649_v49, %v651_v60  ;;  %v967_v48 = vld [vmem:[%s2326_s2 + $0x150] sm:$0xff]  ;;  %v789_v56 = vld [vmem:[%s2326_s2 + $0xd8] sm:$0xff] }
  0xc5   : > { %929 = vmatpush.msrb.mxu2 %v790_v54 }
  0xc6   : > { %v412_v1 = vadd.f32 %v1826_v57, %v393_v62  ;;  %1523 = vmatmul.msk.f32.gmra.mxu3 %vm201_vm3, %v490_v63  ;;  %1543 = vmatmul.msk.f32.gmra.mxu0 %vm201_vm3, %v652_v0  ;;  %v786_v62 = vld [vmem:[%s2326_s2 + $0xc0] sm:$0xff]  ;;  %v796_v63 = vld [vmem:[%s2326_s2 + $0x110] sm:$0xff]  ;;  %v966_v0 = vld [vmem:[%s2326_s2 + $0x148] sm:$0xff] }
  0xc7   : > { %930 = vmatpush.msrb.mxu2 %v789_v56 }
  0xc8   : > { %v422_v3 = vmax.f32 %v412_v1, 0.0 }
  0xc9   : > { %v451_v5 = vld [vmem:[#allocation2 + $0x28] sm:$0xff] }
  0xca   : > { %v395_v4 = vpop.f32.mrf.mxu1  ;;  %440 = vst.msk [vmem:[#allocation2 + $0x31] sm:$0xfc] %vm427_vm4, %v422_v3  ;;  %v491_v6 = vrot.slane %v451_v5, 1  ;;  %v653_v7 = vrot.slane %v451_v5, 2 }
  0xcb   : > { %v325_v8 = vpop.f32.mrf.mxu0 }
  0xcc   : > { %v396_v9 = vadd.f32 %v395_v4, %v325_v8  ;;  %v492_v11 = vsel %vm242_vm2, %v489_v59, %v491_v6  ;;  %v654_v12 = vsel %vm643_vm7, %v651_v60, %v653_v7  ;;  %v787_v59 = vld [vmem:[%s2326_s2 + $0xc8] sm:$0xff]  ;;  %v965_v4 = vld [vmem:[%s2326_s2 + $0x140] sm:$0xff] }
  0xce   : > { %v413_v14 = vadd.f32 %v1826_v57, %v396_v9  ;;  %1524 = vmatmul.msk.f32.gmra.mxu3 %vm201_vm3, %v492_v11  ;;  %1544 = vmatmul.msk.f32.gmra.mxu0 %vm201_vm3, %v654_v12  ;;  %v2040_v9 = vld [vmem:[%s2327_s3 + $0x1] ss:$0 sm:$0xff] }
  0xd0   : > { %v423_v16 = vmax.f32 %v413_v14, 0.0 }
  0xd1   : > { %v452_v17 = vld [vmem:[#allocation2 + $0x30] sm:$0xff] }
  0xd2   : > { %441 = vst.msk [vmem:[#allocation2 + $0x39] sm:$0x3] %vm429_vm5, %v423_v16  ;;  %v493_v18 = vrot.slane %v452_v17, 1  ;;  %v655_v19 = vrot.slane %v452_v17, 2 }
  0xd3   : > { %442 = vst.msk [vmem:[#allocation2 + $0x39] sm:$0xf0] %vm431_vm6, %v423_v16 }
  0xd4   : > { %v494_v20 = vsel %vm242_vm2, %v491_v6, %v493_v18  ;;  %v656_v57 = vsel %vm643_vm7, %v653_v7, %v655_v19 }
  0xd6   : > { %1525 = vmatmul.msk.f32.gmra.mxu3 %vm201_vm3, %v494_v20  ;;  %1545 = vmatmul.msk.f32.gmra.mxu0 %vm201_vm3, %v656_v57 }
  0xda   : > { %v453_v22 = vld [vmem:[#allocation2 + $0x38] sm:$0xff]  ;;  %v454_v27 = vld [vmem:[#allocation2 + $0x40] sm:$0xff] }
  0xdb   : > { %v495_v23 = vrot.slane %v453_v22, 1  ;;  %v657_v24 = vrot.slane %v453_v22, 2  ;;  %v497_v28 = vrot.slane %v454_v27, 1  ;;  %v659_v29 = vrot.slane %v454_v27, 2 }
  0xdd   : > { %v496_v25 = vsel %vm242_vm2, %v493_v18, %v495_v23  ;;  %v658_v26 = vsel %vm643_vm7, %v655_v19, %v657_v24  ;;  %v498_v31 = vsel %vm242_vm2, %v495_v23, %v497_v28  ;;  %v660_v32 = vsel %vm643_vm7, %v657_v24, %v659_v29 }
  0xde   : > { %1526 = vmatmul.msk.f32.gmra.mxu3 %vm201_vm3, %v496_v25  ;;  %1546 = vmatmul.msk.f32.gmra.mxu0 %vm201_vm3, %v658_v26  ;;  %v500_v36 = vsel %vm242_vm2, %v497_v28, %v499_v34  ;;  %v662_v37 = vsel %vm643_vm7, %v659_v29, %v661_v35 }
  0xe6   : > { %1527 = vmatmul.msk.f32.gmra.mxu3 %vm201_vm3, %v498_v31  ;;  %1547 = vmatmul.msk.f32.gmra.mxu0 %vm201_vm3, %v660_v32 }
  0xee   : > { %1528 = vmatmul.msk.f32.gmra.mxu3 %vm201_vm3, %v500_v36  ;;  %1548 = vmatmul.msk.f32.gmra.mxu0 %vm201_vm3, %v662_v37 }
  0xf6   : > { %1529 = vmatmul.msk.f32.gmra.mxu3 %vm201_vm3, %v499_v34  ;;  %1549 = vmatmul.msk.f32.gmra.mxu0 %vm201_vm3, %v661_v35 }
  0xfe   : > { %1530 = vmatmul.msk.f32.vlgmr.msrb.gmra.mxu3 %vm201_vm3, %v1836_v10  ;;  %v971_v10 = vld [vmem:[%s2326_s2 + $0x170] sm:$0xff] }
  0xff   : > { %1021 = vmatpush.msra.mxu3 %v971_v10 }
 0x101   : > { %1022 = vmatpush.msra.mxu3 %v970_v39 }
 0x103   : > { %1023 = vmatpush.msra.mxu3 %v969_v42 }
 0x105   : > { %1024 = vmatpush.msra.mxu3 %v968_v45 }
 0x106   : > { %1531 = vmatmul.msk.f32.gmra.mxu3 %vm201_vm3, %v1838_v13 }
 0x107   : > { %1025 = vmatpush.msra.mxu3 %v967_v48 }
 0x109   : > { %1026 = vmatpush.msra.mxu3 %v966_v0 }
 0x10b   : > { %1027 = vmatpush.msra.mxu3 %v965_v4 }
 0x10e   : > { %1532 = vmatmul.msk.f32.gmra.mxu3 %vm201_vm3, %v1857_v30  ;;  %v801_v30 = vld [vmem:[%s2326_s2 + $0x138] sm:$0xff] }
 0x10f   : > { %859 = vmatpush.msrb.mxu1 %v801_v30 }
 0x111   : > { %860 = vmatpush.msrb.mxu1 %v800_v41 }
 0x113   : > { %861 = vmatpush.msrb.mxu1 %v799_v44 }
 0x115   : > { %862 = vmatpush.msrb.mxu1 %v798_v47 }
 0x116   : > { %1533 = vmatmul.msk.f32.gmra.mxu3 %vm201_vm3, %v1877_v46 }
 0x117   : > { %863 = vmatpush.msrb.mxu1 %v797_v55 }
 0x119   : > { %864 = vmatpush.msrb.mxu1 %v796_v63 }
 0x11b   : > { %865 = vmatpush.msrb.mxu1 %v795_v2 }
 0x11e   : > { %1534 = vmatmul.msk.f32.gmra.mxu3 %vm201_vm3, %v1889_v58  ;;  %v788_v58 = vld [vmem:[%s2326_s2 + $0xd0] sm:$0xff] }
 0x11f   : > { %931 = vmatpush.msrb.mxu2 %v788_v58 }
 0x121   : > { %932 = vmatpush.msrb.mxu2 %v787_v59 }
 0x123   : > { %933 = vmatpush.msrb.mxu2 %v786_v62 }
 0x126   : > { %1535 = vmatmul.msk.f32.gmra.mxu3 %vm201_vm3, %v451_v5  ;;  %v794_v5 = vld [vmem:[%s2326_s2 + $0x100] sm:$0xff] }
 0x127   : > { %866 = vmatpush.msrb.mxu1 %v794_v5 }
 0x12a   : > { %v700_v60 = vpop.f32.mrf.mxu0 }
 0x12e   : > { %1536 = vmatmul.msk.f32.gmra.mxu3 %vm201_vm3, %v452_v17 }
 0x130   : > { %v538_v6 = vpop.f32.mrf.mxu2 }
 0x133   : > { %v703_v3 = vpop.f32.mrf.mxu0 }
 0x136   : > { %1537 = vmatmul.msk.f32.gmra.mxu3 %vm201_vm3, %v453_v22 }
 0x139   : > { %v541_v16 = vpop.f32.mrf.mxu2 }
 0x13b   : > { %v706_v12 = vpop.f32.mrf.mxu0 }
 0x13e   : > { %1538 = vmatmul.msk.f32.gmra.mxu3 %vm201_vm3, %v454_v27 }
 0x141   : > { %v1954_v13 = vpop.f32.mrf.mxu3 }
 0x143   : > { %v709_v57 = vpop.f32.mrf.mxu0 }
 0x146   : > { %1539 = vmatmul.msk.f32.gmra.mxu3 %vm201_vm3, %v455_v33 }
 0x149   : > { %v1963_v40 = vpop.f32.mrf.mxu3 }
 0x14b   : > { %v712_v28 = vpop.f32.mrf.mxu0 }
 0x151   : > { %v1971_v43 = vpop.f32.mrf.mxu3 }
 0x153   : > { %v715_v42 = vpop.f32.mrf.mxu0 }
 0x159   : > { %v1979_v46 = vpop.f32.mrf.mxu3 }
 0x161   : > { %v1987_v49 = vpop.f32.mrf.mxu3 }
 0x169   : > { %v1998_v53 = vpop.f32.mrf.mxu3 }
 0x171   : > { %v2015_v61 = vpop.f32.mrf.mxu3 }
 0x179   : > { %v2026_v1 = vpop.f32.mrf.mxu3 }
 0x181   : > { %v605_v7 = vpop.f32.mrf.mxu3 }
 0x182   : > { %v606_v8 = vadd.f32 %v605_v7, %v538_v6 }
 0x184   : > { %v730_v11 = vadd.f32 %v700_v60, %v606_v8  ;;  %v718_v60 = vpop.f32.mrf.mxu0 }
 0x186   : > { %v742_v14 = vadd.f32 %v2040_v9, %v730_v11 }
 0x188   : > { %v752_v15 = vmax.f32 %v742_v14, 0.0 }
 0x189   : > { %v608_v17 = vpop.f32.mrf.mxu3 }
 0x18a   : > { %762 = vst.msk [vmem:[#allocation2 + $0x1] sm:$0xff] %vm201_vm3, %v752_v15  ;;  %v609_v18 = vadd.f32 %v608_v17, %v541_v16 }
 0x18c   : > { %v731_v19 = vadd.f32 %v703_v3, %v609_v18  ;;  %v721_v14 = vpop.f32.mrf.mxu0 }
 0x18e   : > { %v743_v20 = vadd.f32 %v2040_v9, %v731_v19 }
 0x190   : > { %v753_v21 = vmax.f32 %v743_v20, 0.0 }
 0x191   : > { %v611_v22 = vpop.f32.mrf.mxu3  ;;  %v776_v23 = vld [vmem:[#allocation2] sm:$0xff] }
 0x192   : > { %763 = vst.msk [vmem:[#allocation2 + $0x9] sm:$0xfc] %vm427_vm4, %v753_v21  ;;  %v612_v24 = vadd.f32 %v611_v22, %v1954_v13  ;;  %1560 = vmatmul.msk.f32.vlgmr.msrb.gmra.mxu2 %vm201_vm3, %v776_v23  ;;  %v973_v29 = vrot.slane %v776_v23, 2  ;;  %v812_v34 = vrot.slane %v776_v23, 1 }
 0x194   : > { %v732_v25 = vadd.f32 %v706_v12, %v612_v24  ;;  %v724_v24 = vpop.f32.mrf.mxu0 }
 0x196   : > { %v744_v26 = vadd.f32 %v2040_v9, %v732_v25 }
 0x198   : > { %v754_v27 = vmax.f32 %v744_v26, 0.0 }
 0x199   : > { %v614_v31 = vpop.f32.mrf.mxu3  ;;  %v777_v32 = vld [vmem:[#allocation2 + $0x8] sm:$0xff] }
 0x19a   : > { %764 = vst.msk [vmem:[#allocation2 + $0x11] sm:$0x3] %vm429_vm5, %v754_v27  ;;  %v615_v33 = vadd.f32 %v614_v31, %v1963_v40  ;;  %1561 = vmatmul.msk.f32.gmra.mxu2 %vm201_vm3, %v777_v32  ;;  %v813_v35 = vrot.slane %v777_v32, 1  ;;  %v974_v36 = vrot.slane %v777_v32, 2 }
 0x19b   : > { %765 = vst.msk [vmem:[#allocation2 + $0x11] sm:$0xf0] %vm431_vm6, %v754_v27 }
 0x19c   : > { %v733_v37 = vadd.f32 %v709_v57, %v615_v33  ;;  %v814_v38 = vsel %vm242_vm2, %v812_v34, %v813_v35  ;;  %v975_v10 = vsel %vm643_vm7, %v973_v29, %v974_v36  ;;  %v1130_v34 = vld [vmem:[%s2326_s2 + $0x1f8] sm:$0xff] }
 0x19d   : > { %1550 = vmatmul.msk.f32.vlgmr.msrb.gmra.mxu1 %vm201_vm3, %v814_v38  ;;  %1570 = vmatmul.msk.f32.vlgmr.msra.gmra.mxu3 %vm201_vm3, %v975_v10  ;;  %v1121_v38 = vld [vmem:[%s2326_s2 + $0x1b0] sm:$0xff] }
 0x19e   : > { %v745_v13 = vadd.f32 %v2040_v9, %v733_v37  ;;  %1188 = vmatpush.msra.mxu0 %v1130_v34  ;;  %v1129_v37 = vld [vmem:[%s2326_s2 + $0x1f0] sm:$0xff] }
 0x1a0   : > { %v755_v30 = vmax.f32 %v745_v13, 0.0  ;;  %v1128_v13 = vld [vmem:[%s2326_s2 + $0x1e8] sm:$0xff]  ;;  %1189 = vmatpush.msra.mxu0 %v1129_v37 }
 0x1a1   : > { %v617_v39 = vpop.f32.mrf.mxu3 }
 0x1a2   : > { %766 = vst.msk [vmem:[#allocation2 + $0x19] sm:$0xf] %vm433_vm8, %v755_v30  ;;  %v618_v40 = vadd.f32 %v617_v39, %v1971_v43  ;;  %v778_v41 = vld [vmem:[#allocation2 + $0x10] sm:$0xff]  ;;  %v1299_v39 = vld [vmem:[%s2326_s2 + $0x228] sm:$0xff]  ;;  %1190 = vmatpush.msra.mxu0 %v1128_v13 }
 0x1a3   : > { %767 = vst.msk [vmem:[#allocation2 + $0x19] sm:$0xc0] %vm435_vm9, %v755_v30  ;;  %1562 = vmatmul.msk.f32.gmra.mxu2 %vm201_vm3, %v778_v41  ;;  %v815_v44 = vrot.slane %v778_v41, 1  ;;  %v976_v45 = vrot.slane %v778_v41, 2 }
 0x1a4   : > { %v734_v47 = vadd.f32 %v712_v28, %v618_v40  ;;  %v1120_v40 = vld [vmem:[%s2326_s2 + $0x1a8] sm:$0xff] }
 0x1a5   : > { %v816_v48 = vsel %vm242_vm2, %v813_v35, %v815_v44  ;;  %v977_v50 = vsel %vm643_vm7, %v974_v36, %v976_v45  ;;  %v1122_v35 = vld [vmem:[%s2326_s2 + $0x1b8] sm:$0xff]  ;;  %v1300_v36 = vld [vmem:[%s2326_s2 + $0x230] sm:$0xff] }
 0x1a6   : > { %v746_v51 = vadd.f32 %v2040_v9, %v734_v47  ;;  %1551 = vmatmul.msk.f32.gmra.mxu1 %vm201_vm3, %v816_v48  ;;  %1571 = vmatmul.msk.f32.gmra.mxu3 %vm201_vm3, %v977_v50 }
 0x1a7   : > { %1255 = vmatpush.msra.mxu1 %v1122_v35 }
 0x1a8   : > { %v756_v43 = vmax.f32 %v746_v51, 0.0  ;;  %v1119_v51 = vld [vmem:[%s2326_s2 + $0x1a0] sm:$0xff] }
 0x1a9   : > { %v620_v52 = vpop.f32.mrf.mxu3  ;;  %1256 = vmatpush.msra.mxu1 %v1121_v38 }
 0x1aa   : > { %768 = vst.msk [vmem:[#allocation2 + $0x21] sm:$0x3f] %vm437_vm10, %v756_v43  ;;  %v621_v54 = vadd.f32 %v620_v52, %v1979_v46  ;;  %v779_v55 = vld [vmem:[#allocation2 + $0x18] sm:$0xff] }
 0x1ab   : > { %1563 = vmatmul.msk.f32.gmra.mxu2 %vm201_vm3, %v779_v55  ;;  %v817_v56 = vrot.slane %v779_v55, 1  ;;  %v978_v58 = vrot.slane %v779_v55, 2  ;;  %1257 = vmatpush.msra.mxu1 %v1120_v40  ;;  %v1297_v55 = vld [vmem:[%s2326_s2 + $0x218] sm:$0xff] }
 0x1ac   : > { %v735_v59 = vadd.f32 %v715_v42, %v621_v54 }
 0x1ad   : > { %v818_v62 = vsel %vm242_vm2, %v815_v44, %v817_v56  ;;  %v979_v63 = vsel %vm643_vm7, %v976_v45, %v978_v58  ;;  %v1127_v44 = vld [vmem:[%s2326_s2 + $0x1e0] sm:$0xff]  ;;  %v727_v45 = vpop.f32.mrf.mxu0  ;;  %1258 = vmatpush.msra.mxu1 %v1119_v51 }
 0x1ae   : > { %v747_v0 = vadd.f32 %v2040_v9, %v735_v59  ;;  %1552 = vmatmul.msk.f32.gmra.mxu1 %vm201_vm3, %v818_v62  ;;  %1572 = vmatmul.msk.f32.gmra.mxu3 %vm201_vm3, %v979_v63 }
 0x1af   : > { %1191 = vmatpush.msra.mxu0 %v1127_v44 }
 0x1b0   : > { %v757_v2 = vmax.f32 %v747_v0, 0.0 }
 0x1b1   : > { %v623_v3 = vpop.f32.mrf.mxu3  ;;  %v780_v46 = vld [vmem:[#allocation2 + $0x20] sm:$0xff] }
 0x1b2   : > { %769 = vst.msk [vmem:[#allocation2 + $0x29] sm:$0xff] %vm201_vm3, %v757_v2  ;;  %v624_v4 = vadd.f32 %v623_v3, %v1987_v49  ;;  %v819_v5 = vrot.slane %v780_v46, 1  ;;  %v980_v6 = vrot.slane %v780_v46, 2 }
 0x1b3   : > { %1564 = vmatmul.msk.f32.gmra.mxu2 %vm201_vm3, %v780_v46 }
 0x1b4   : > { %v736_v7 = vadd.f32 %v718_v60, %v624_v4  ;;  %v820_v8 = vsel %vm242_vm2, %v817_v56, %v819_v5  ;;  %v981_v11 = vsel %vm643_vm7, %v978_v58, %v980_v6  ;;  %v1126_v4 = vld [vmem:[%s2326_s2 + $0x1d8] sm:$0xff] }
 0x1b5   : > { %1192 = vmatpush.msra.mxu0 %v1126_v4 }
 0x1b6   : > { %v748_v12 = vadd.f32 %v2040_v9, %v736_v7  ;;  %1553 = vmatmul.msk.f32.gmra.mxu1 %vm201_vm3, %v820_v8  ;;  %1573 = vmatmul.msk.f32.gmra.mxu3 %vm201_vm3, %v981_v11  ;;  %v1125_v7 = vld [vmem:[%s2326_s2 + $0x1d0] sm:$0xff]  ;;  %v1295_v11 = vld [vmem:[%s2326_s2 + $0x208] sm:$0xff] }
 0x1b7   : > { %v1117_v8 = vld [vmem:[%s2326_s2 + $0x190] sm:$0xff]  ;;  %1193 = vmatpush.msra.mxu0 %v1125_v7 }
 0x1b8   : > { %v758_v15 = vmax.f32 %v748_v12, 0.0  ;;  %v1116_v12 = vld [vmem:[%s2326_s2 + $0x188] sm:$0xff] }
 0x1b9   : > { %v626_v16 = vpop.f32.mrf.mxu3  ;;  %v781_v17 = vld [vmem:[#allocation2 + $0x28] sm:$0xff] }
 0x1ba   : > { %770 = vst.msk [vmem:[#allocation2 + $0x31] sm:$0xfc] %vm427_vm4, %v758_v15  ;;  %v627_v49 = vadd.f32 %v626_v16, %v1998_v53  ;;  %v821_v18 = vrot.slane %v781_v17, 1  ;;  %v982_v19 = vrot.slane %v781_v17, 2  ;;  %v1124_v15 = vld [vmem:[%s2326_s2 + $0x1c8] sm:$0xff] }
 0x1bb   : > { %1565 = vmatmul.msk.f32.gmra.mxu2 %vm201_vm3, %v781_v17  ;;  %1194 = vmatpush.msra.mxu0 %v1124_v15  ;;  %v1294_v17 = vld [vmem:[%s2326_s2 + $0x200] sm:$0xff] }
 0x1bc   : > { %v737_v20 = vadd.f32 %v721_v14, %v627_v49  ;;  %v822_v57 = vsel %vm242_vm2, %v819_v5, %v821_v18  ;;  %v983_v21 = vsel %vm643_vm7, %v980_v6, %v982_v19  ;;  %v1118_v5 = vld [vmem:[%s2326_s2 + $0x198] sm:$0xff]  ;;  %v1296_v6 = vld [vmem:[%s2326_s2 + $0x210] sm:$0xff]  ;;  %v1115_v14 = vld [vmem:[%s2326_s2 + $0x180] sm:$0xff] }
 0x1bd   : > { %1259 = vmatpush.msra.mxu1 %v1118_v5  ;;  %v1123_v49 = vld [vmem:[%s2326_s2 + $0x1c0] sm:$0xff] }
 0x1be   : > { %v749_v22 = vadd.f32 %v2040_v9, %v737_v20  ;;  %1554 = vmatmul.msk.f32.gmra.mxu1 %vm201_vm3, %v822_v57  ;;  %1574 = vmatmul.msk.f32.gmra.mxu3 %vm201_vm3, %v983_v21  ;;  %v2197_v57 = vld [vmem:[%s2327_s3 + $0x2] ss:$0 sm:$0xff] }
 0x1bf   : > { %1260 = vmatpush.msra.mxu1 %v1117_v8  ;;  %1195 = vmatpush.msra.mxu0 %v1123_v49 }
 0x1c0   : > { %v759_v23 = vmax.f32 %v749_v22, 0.0 }
 0x1c1   : > { %v629_v25 = vpop.f32.mrf.mxu3  ;;  %v782_v26 = vld [vmem:[#allocation2 + $0x30] sm:$0xff]  ;;  %1261 = vmatpush.msra.mxu1 %v1116_v12 }
 0x1c2   : > { %771 = vst.msk [vmem:[#allocation2 + $0x39] sm:$0x3] %vm429_vm5, %v759_v23  ;;  %v630_v53 = vadd.f32 %v629_v25, %v2015_v61  ;;  %v823_v27 = vrot.slane %v782_v26, 1  ;;  %v984_v28 = vrot.slane %v782_v26, 2  ;;  %v1301_v61 = vld [vmem:[%s2326_s2 + $0x238] sm:$0xff] }
 0x1c3   : > { %772 = vst.msk [vmem:[#allocation2 + $0x39] sm:$0xf0] %vm431_vm6, %v759_v23  ;;  %1566 = vmatmul.msk.f32.gmra.mxu2 %vm201_vm3, %v782_v26  ;;  %1262 = vmatpush.msra.mxu1 %v1115_v14 }
 0x1c4   : > { %v738_v29 = vadd.f32 %v724_v24, %v630_v53  ;;  %v824_v31 = vsel %vm242_vm2, %v821_v18, %v823_v27  ;;  %v985_v32 = vsel %vm643_vm7, %v982_v19, %v984_v28  ;;  %1349 = vmatpush.msra.mxu2 %v1301_v61 }
 0x1c6   : > { %v750_v33 = vadd.f32 %v2040_v9, %v738_v29  ;;  %1555 = vmatmul.msk.f32.gmra.mxu1 %vm201_vm3, %v824_v31  ;;  %1575 = vmatmul.msk.f32.gmra.mxu3 %vm201_vm3, %v985_v32 }
 0x1c7   : > { %1350 = vmatpush.msra.mxu2 %v1300_v36 }
 0x1c8   : > { %v760_v10 = vmax.f32 %v750_v33, 0.0 }
 0x1c9   : > { %v632_v30 = vpop.f32.mrf.mxu3  ;;  %1351 = vmatpush.msra.mxu2 %v1299_v39 }
 0x1ca   : > { %773 = vst.msk [vmem:[#allocation2 + $0x41] sm:$0xf] %vm433_vm8, %v760_v10  ;;  %v633_v41 = vadd.f32 %v632_v30, %v2026_v1  ;;  %v783_v42 = vld [vmem:[#allocation2 + $0x38] sm:$0xff]  ;;  %v1298_v1 = vld [vmem:[%s2326_s2 + $0x220] sm:$0xff] }
 0x1cb   : > { %774 = vst.msk [vmem:[#allocation2 + $0x41] sm:$0xc0] %vm435_vm9, %v760_v10  ;;  %1567 = vmatmul.msk.f32.gmra.mxu2 %vm201_vm3, %v783_v42  ;;  %v825_v47 = vrot.slane %v783_v42, 1  ;;  %v986_v48 = vrot.slane %v783_v42, 2 }
 0x1cc   : > { %v739_v50 = vadd.f32 %v727_v45, %v633_v41  ;;  %1352 = vmatpush.msra.mxu2 %v1298_v1 }
 0x1cd   : > { %v826_v43 = vsel %vm242_vm2, %v823_v27, %v825_v47  ;;  %v987_v52 = vsel %vm643_vm7, %v984_v28, %v986_v48 }
 0x1ce   : > { %v751_v54 = vadd.f32 %v2040_v9, %v739_v50  ;;  %1556 = vmatmul.msk.f32.gmra.mxu1 %vm201_vm3, %v826_v43  ;;  %1576 = vmatmul.msk.f32.gmra.mxu3 %vm201_vm3, %v987_v52 }
 0x1cf   : > { %1353 = vmatpush.msra.mxu2 %v1297_v55 }
 0x1d0   : > { %v761_v56 = vmax.f32 %v751_v54, 0.0 }
 0x1d1   : > { %1354 = vmatpush.msra.mxu2 %v1296_v6 }
 0x1d2   : > { %775 = vst.msk [vmem:[#allocation2 + $0x49] sm:$0x3f] %vm437_vm10, %v761_v56  ;;  %v784_v58 = vld [vmem:[#allocation2 + $0x40] sm:$0xff] }
 0x1d3   : > { %1568 = vmatmul.msk.f32.gmra.mxu2 %vm201_vm3, %v784_v58  ;;  %v827_v59 = vrot.slane %v784_v58, 1  ;;  %v988_v60 = vrot.slane %v784_v58, 2 }
 0x1d4   : > { %1355 = vmatpush.msra.mxu2 %v1295_v11 }
 0x1d5   : > { %v828_v9 = vsel %vm242_vm2, %v825_v47, %v827_v59  ;;  %v989_v62 = vsel %vm643_vm7, %v986_v48, %v988_v60 }
 0x1d6   : > { %1557 = vmatmul.msk.f32.gmra.mxu1 %vm201_vm3, %v828_v9  ;;  %1577 = vmatmul.msk.f32.gmra.mxu3 %vm201_vm3, %v989_v62 }
 0x1d7   : > { %1356 = vmatpush.msra.mxu2 %v1294_v17 }
 0x1d9   : > { %v785_v63 = vld [vmem:[#allocation2 + $0x48] sm:$0xff] }
 0x1da   : > { %v829_v0 = vrot.slane %v785_v63, 1  ;;  %v990_v2 = vrot.slane %v785_v63, 2 }
 0x1db   : > { %1569 = vmatmul.msk.f32.gmra.mxu2 %vm201_vm3, %v785_v63 }
 0x1dc   : > { %v830_v3 = vsel %vm242_vm2, %v827_v59, %v829_v0  ;;  %v991_v46 = vsel %vm643_vm7, %v988_v60, %v990_v2 }
 0x1de   : > { %1558 = vmatmul.msk.f32.gmra.mxu1 %vm201_vm3, %v830_v3  ;;  %1578 = vmatmul.msk.f32.gmra.mxu3 %vm201_vm3, %v991_v46 }
 0x1e6   : > { %1559 = vmatmul.msk.f32.gmra.mxu1 %vm201_vm3, %v829_v0  ;;  %1579 = vmatmul.msk.f32.gmra.mxu3 %vm201_vm3, %v990_v2 }
 0x215   : > { %v935_v16 = vpop.f32.mrf.mxu2 }
 0x21a   : > { %v868_v18 = vpop.f32.mrf.mxu1 }
 0x21b   : > { %v936_v20 = vadd.f32 %v935_v16, %v868_v18 }
 0x21d   : > { %v938_v19 = vpop.f32.mrf.mxu2 }
 0x220   : > { %v1029_v21 = vpop.f32.mrf.mxu3 }
 0x221   : > { %v1059_v22 = vadd.f32 %v1029_v21, %v936_v20 }
 0x223   : > { %v1071_v23 = vadd.f32 %v2197_v57, %v1059_v22  ;;  %v871_v24 = vpop.f32.mrf.mxu1 }
 0x224   : > { %v939_v53 = vadd.f32 %v938_v19, %v871_v24 }
 0x225   : > { %v1081_v25 = vmax.f32 %v1071_v23, 0.0 }
 0x226   : > { %v941_v26 = vpop.f32.mrf.mxu2 }
 0x227   : > { %1091 = vst.msk [vmem:[#allocation2 + $0x1] sm:$0xff] %vm201_vm3, %v1081_v25 }
 0x229   : > { %v1032_v27 = vpop.f32.mrf.mxu3 }
 0x22a   : > { %v1060_v28 = vadd.f32 %v1032_v27, %v939_v53 }
 0x22b   : > { %v874_v29 = vpop.f32.mrf.mxu1 }
 0x22c   : > { %v1072_v31 = vadd.f32 %v2197_v57, %v1060_v28  ;;  %v942_v34 = vadd.f32 %v941_v26, %v874_v29 }
 0x22e   : > { %v1082_v32 = vmax.f32 %v1072_v31, 0.0  ;;  %v944_v33 = vpop.f32.mrf.mxu2  ;;  %v1105_v61 = vld [vmem:[#allocation2] sm:$0xff] }
 0x22f   : > { %1590 = vmatmul.msk.f32.vlgmr.msra.gmra.mxu1 %vm201_vm3, %v1105_v61  ;;  %v1141_v30 = vrot.slane %v1105_v61, 1  ;;  %v1302_v40 = vrot.slane %v1105_v61, 2 }
 0x230   : > { %1092 = vst.msk [vmem:[#allocation2 + $0x9] sm:$0xfc] %vm427_vm4, %v1082_v32 }
 0x231   : > { %v1035_v35 = vpop.f32.mrf.mxu3 }
 0x232   : > { %v1061_v36 = vadd.f32 %v1035_v35, %v942_v34 }
 0x233   : > { %v877_v37 = vpop.f32.mrf.mxu1 }
 0x234   : > { %v1073_v38 = vadd.f32 %v2197_v57, %v1061_v36  ;;  %v945_v41 = vadd.f32 %v944_v33, %v877_v37 }
 0x236   : > { %v1083_v10 = vmax.f32 %v1073_v38, 0.0  ;;  %v947_v13 = vpop.f32.mrf.mxu2 }
 0x237   : > { %v1106_v39 = vld [vmem:[#allocation2 + $0x8] sm:$0xff] }
 0x238   : > { %1093 = vst.msk [vmem:[#allocation2 + $0x11] sm:$0x3] %vm429_vm5, %v1083_v10  ;;  %v1142_v42 = vrot.slane %v1106_v39, 1  ;;  %1591 = vmatmul.msk.f32.gmra.mxu1 %vm201_vm3, %v1106_v39  ;;  %v1303_v44 = vrot.slane %v1106_v39, 2 }
 0x239   : > { %1094 = vst.msk [vmem:[#allocation2 + $0x11] sm:$0xf0] %vm431_vm6, %v1083_v10  ;;  %v1038_v45 = vpop.f32.mrf.mxu3 }
 0x23a   : > { %v1062_v47 = vadd.f32 %v1038_v45, %v945_v41  ;;  %v1143_v48 = vsel %vm242_vm2, %v1141_v30, %v1142_v42  ;;  %v1304_v50 = vsel %vm643_vm7, %v1302_v40, %v1303_v44 }
 0x23b   : > { %v880_v1 = vpop.f32.mrf.mxu1  ;;  %1580 = vmatmul.msk.f32.vlgmr.msra.gmra.mxu0 %vm201_vm3, %v1143_v48  ;;  %1600 = vmatmul.msk.f32.vlgmr.msra.gmra.mxu2 %vm201_vm3, %v1304_v50 }
 0x23c   : > { %v1074_v51 = vadd.f32 %v2197_v57, %v1062_v47  ;;  %v948_v54 = vadd.f32 %v947_v13, %v880_v1 }
 0x23e   : > { %v1084_v43 = vmax.f32 %v1074_v51, 0.0  ;;  %v950_v52 = vpop.f32.mrf.mxu2 }
 0x240   : > { %1095 = vst.msk [vmem:[#allocation2 + $0x19] sm:$0xf] %vm433_vm8, %v1084_v43  ;;  %v1107_v55 = vld [vmem:[#allocation2 + $0x10] sm:$0xff] }
 0x241   : > { %1096 = vst.msk [vmem:[#allocation2 + $0x19] sm:$0xc0] %vm435_vm9, %v1084_v43  ;;  %v1144_v56 = vrot.slane %v1107_v55, 1  ;;  %1592 = vmatmul.msk.f32.gmra.mxu1 %vm201_vm3, %v1107_v55  ;;  %v1305_v58 = vrot.slane %v1107_v55, 2  ;;  %v1041_v59 = vpop.f32.mrf.mxu3 }
 0x242   : > { %v1063_v60 = vadd.f32 %v1041_v59, %v948_v54 }
 0x243   : > { %v883_v9 = vpop.f32.mrf.mxu1  ;;  %v1145_v62 = vsel %vm242_vm2, %v1142_v42, %v1144_v56  ;;  %v1306_v63 = vsel %vm643_vm7, %v1303_v44, %v1305_v58 }
 0x244   : > { %v1075_v0 = vadd.f32 %v2197_v57, %v1063_v60  ;;  %1581 = vmatmul.msk.f32.gmra.mxu0 %vm201_vm3, %v1145_v62  ;;  %1601 = vmatmul.msk.f32.gmra.mxu2 %vm201_vm3, %v1306_v63  ;;  %v951_v3 = vadd.f32 %v950_v52, %v883_v9 }
 0x246   : > { %v1085_v2 = vmax.f32 %v1075_v0, 0.0  ;;  %v953_v4 = vpop.f32.mrf.mxu2 }
 0x248   : > { %1097 = vst.msk [vmem:[#allocation2 + $0x21] sm:$0x3f] %vm437_vm10, %v1085_v2  ;;  %v1108_v46 = vld [vmem:[#allocation2 + $0x18] sm:$0xff] }
 0x249   : > { %v1146_v5 = vrot.slane %v1108_v46, 1  ;;  %1593 = vmatmul.msk.f32.gmra.mxu1 %vm201_vm3, %v1108_v46  ;;  %v1307_v6 = vrot.slane %v1108_v46, 2  ;;  %v1044_v7 = vpop.f32.mrf.mxu3 }
 0x24a   : > { %v1064_v8 = vadd.f32 %v1044_v7, %v951_v3 }
 0x24b   : > { %v886_v11 = vpop.f32.mrf.mxu1  ;;  %v1147_v12 = vsel %vm242_vm2, %v1144_v56, %v1146_v5  ;;  %v1308_v14 = vsel %vm643_vm7, %v1305_v58, %v1307_v6 }
 0x24c   : > { %v1076_v15 = vadd.f32 %v2197_v57, %v1064_v8  ;;  %1582 = vmatmul.msk.f32.gmra.mxu0 %vm201_vm3, %v1147_v12  ;;  %1602 = vmatmul.msk.f32.gmra.mxu2 %vm201_vm3, %v1308_v14  ;;  %v954_v49 = vadd.f32 %v953_v4, %v886_v11  ;;  %v2276_v12 = vld [vmem:[%s2327_s3 + $0x3] ss:$0 sm:$0xff] }
 0x24e   : > { %v1086_v16 = vmax.f32 %v1076_v15, 0.0  ;;  %v956_v24 = vpop.f32.mrf.mxu2 }
 0x24f   : > { %v1109_v17 = vld [vmem:[#allocation2 + $0x20] sm:$0xff] }
 0x250   : > { %1098 = vst.msk [vmem:[#allocation2 + $0x29] sm:$0xff] %vm201_vm3, %v1086_v16  ;;  %v1148_v18 = vrot.slane %v1109_v17, 1  ;;  %v1309_v19 = vrot.slane %v1109_v17, 2 }
 0x251   : > { %1594 = vmatmul.msk.f32.gmra.mxu1 %vm201_vm3, %v1109_v17  ;;  %v1047_v20 = vpop.f32.mrf.mxu3 }
 0x252   : > { %v1065_v21 = vadd.f32 %v1047_v20, %v954_v49  ;;  %v1149_v22 = vsel %vm242_vm2, %v1146_v5, %v1148_v18  ;;  %v1310_v23 = vsel %vm643_vm7, %v1307_v6, %v1309_v19 }
 0x253   : > { %v889_v25 = vpop.f32.mrf.mxu1 }
 0x254   : > { %v1077_v26 = vadd.f32 %v2197_v57, %v1065_v21  ;;  %1583 = vmatmul.msk.f32.gmra.mxu0 %vm201_vm3, %v1149_v22  ;;  %1603 = vmatmul.msk.f32.gmra.mxu2 %vm201_vm3, %v1310_v23  ;;  %v957_v28 = vadd.f32 %v956_v24, %v889_v25 }
 0x256   : > { %v1087_v53 = vmax.f32 %v1077_v26, 0.0  ;;  %v959_v37 = vpop.f32.mrf.mxu2 }
 0x257   : > { %v1110_v27 = vld [vmem:[#allocation2 + $0x28] sm:$0xff] }
 0x258   : > { %1099 = vst.msk [vmem:[#allocation2 + $0x31] sm:$0xfc] %vm427_vm4, %v1087_v53  ;;  %v1150_v29 = vrot.slane %v1110_v27, 1  ;;  %v1311_v31 = vrot.slane %v1110_v27, 2 }
 0x259   : > { %1595 = vmatmul.msk.f32.gmra.mxu1 %vm201_vm3, %v1110_v27  ;;  %v1050_v32 = vpop.f32.mrf.mxu3 }
 0x25a   : > { %v1066_v33 = vadd.f32 %v1050_v32, %v957_v28  ;;  %v1151_v61 = vsel %vm242_vm2, %v1148_v18, %v1150_v29  ;;  %v1312_v34 = vsel %vm643_vm7, %v1309_v19, %v1311_v31 }
 0x25b   : > { %v892_v35 = vpop.f32.mrf.mxu1 }
 0x25c   : > { %v1078_v36 = vadd.f32 %v2197_v57, %v1066_v33  ;;  %1584 = vmatmul.msk.f32.gmra.mxu0 %vm201_vm3, %v1151_v61  ;;  %1604 = vmatmul.msk.f32.gmra.mxu2 %vm201_vm3, %v1312_v34  ;;  %v960_v13 = vadd.f32 %v959_v37, %v892_v35 }
 0x25e   : > { %v1088_v38 = vmax.f32 %v1078_v36, 0.0  ;;  %v962_v50 = vpop.f32.mrf.mxu2 }
 0x25f   : > { %v1111_v10 = vld [vmem:[#allocation2 + $0x30] sm:$0xff] }
 0x260   : > { %1100 = vst.msk [vmem:[#allocation2 + $0x39] sm:$0x3] %vm429_vm5, %v1088_v38  ;;  %v1152_v30 = vrot.slane %v1111_v10, 1  ;;  %v1313_v39 = vrot.slane %v1111_v10, 2 }
 0x261   : > { %1101 = vst.msk [vmem:[#allocation2 + $0x39] sm:$0xf0] %vm431_vm6, %v1088_v38  ;;  %1596 = vmatmul.msk.f32.gmra.mxu1 %vm201_vm3, %v1111_v10  ;;  %v1053_v40 = vpop.f32.mrf.mxu3 }
 0x262   : > { %v1067_v41 = vadd.f32 %v1053_v40, %v960_v13  ;;  %v1153_v42 = vsel %vm242_vm2, %v1150_v29, %v1152_v30  ;;  %v1314_v44 = vsel %vm643_vm7, %v1311_v31, %v1313_v39 }
 0x263   : > { %v895_v47 = vpop.f32.mrf.mxu1 }
 0x264   : > { %v1079_v45 = vadd.f32 %v2197_v57, %v1067_v41  ;;  %1585 = vmatmul.msk.f32.gmra.mxu0 %vm201_vm3, %v1153_v42  ;;  %1605 = vmatmul.msk.f32.gmra.mxu2 %vm201_vm3, %v1314_v44  ;;  %v963_v1 = vadd.f32 %v962_v50, %v895_v47 }
 0x266   : > { %v1089_v48 = vmax.f32 %v1079_v45, 0.0 }
 0x268   : > { %1102 = vst.msk [vmem:[#allocation2 + $0x41] sm:$0xf] %vm433_vm8, %v1089_v48  ;;  %v1112_v51 = vld [vmem:[#allocation2 + $0x38] sm:$0xff] }
 0x269   : > { %1103 = vst.msk [vmem:[#allocation2 + $0x41] sm:$0xc0] %vm435_vm9, %v1089_v48  ;;  %v1154_v43 = vrot.slane %v1112_v51, 1  ;;  %1597 = vmatmul.msk.f32.gmra.mxu1 %vm201_vm3, %v1112_v51  ;;  %v1315_v52 = vrot.slane %v1112_v51, 2  ;;  %v1056_v54 = vpop.f32.mrf.mxu3 }
 0x26a   : > { %v1068_v55 = vadd.f32 %v1056_v54, %v963_v1 }
 0x26b   : > { %v1155_v56 = vsel %vm242_vm2, %v1152_v30, %v1154_v43  ;;  %v1316_v58 = vsel %vm643_vm7, %v1313_v39, %v1315_v52 }
 0x26c   : > { %v1080_v59 = vadd.f32 %v2197_v57, %v1068_v55  ;;  %1586 = vmatmul.msk.f32.gmra.mxu0 %vm201_vm3, %v1155_v56  ;;  %1606 = vmatmul.msk.f32.gmra.mxu2 %vm201_vm3, %v1316_v58 }
 0x26e   : > { %v1090_v60 = vmax.f32 %v1080_v59, 0.0 }
 0x270   : > { %1104 = vst.msk [vmem:[#allocation2 + $0x49] sm:$0x3f] %vm437_vm10, %v1090_v60  ;;  %v1113_v9 = vld [vmem:[#allocation2 + $0x40] sm:$0xff] }
 0x271   : > { %v1156_v62 = vrot.slane %v1113_v9, 1  ;;  %1598 = vmatmul.msk.f32.gmra.mxu1 %vm201_vm3, %v1113_v9  ;;  %v1317_v63 = vrot.slane %v1113_v9, 2 }
 0x273   : > { %v1157_v0 = vsel %vm242_vm2, %v1154_v43, %v1156_v62  ;;  %v1318_v2 = vsel %vm643_vm7, %v1315_v52, %v1317_v63 }
 0x274   : > { %1587 = vmatmul.msk.f32.gmra.mxu0 %vm201_vm3, %v1157_v0  ;;  %1607 = vmatmul.msk.f32.gmra.mxu2 %vm201_vm3, %v1318_v2 }
 0x277   : > { %v1114_v57 = vld [vmem:[#allocation2 + $0x48] sm:$0xff] }
 0x278   : > { %v1158_v3 = vrot.slane %v1114_v57, 1  ;;  %v1319_v46 = vrot.slane %v1114_v57, 2 }
 0x279   : > { %1599 = vmatmul.msk.f32.gmra.mxu1 %vm201_vm3, %v1114_v57 }
 0x27a   : > { %v1159_v4 = vsel %vm242_vm2, %v1156_v62, %v1158_v3  ;;  %v1320_v5 = vsel %vm643_vm7, %v1317_v63, %v1319_v46 }
 0x27c   : > { %1588 = vmatmul.msk.f32.gmra.mxu0 %vm201_vm3, %v1159_v4  ;;  %1608 = vmatmul.msk.f32.gmra.mxu2 %vm201_vm3, %v1320_v5 }
 0x284   : > { %1589 = vmatmul.msk.f32.gmra.mxu0 %vm201_vm3, %v1158_v3  ;;  %1609 = vmatmul.msk.f32.gmra.mxu2 %vm201_vm3, %v1319_v46 }
 0x2ac   : > { %v1264_v6 = vpop.f32.mrf.mxu1 }
 0x2b5   : > { %v1267_v7 = vpop.f32.mrf.mxu1 }
 0x2b8   : > { %v1197_v8 = vpop.f32.mrf.mxu0 }
 0x2b9   : > { %v1265_v11 = vadd.f32 %v1264_v6, %v1197_v8 }
 0x2be   : > { %v1358_v14 = vpop.f32.mrf.mxu2  ;;  %v1270_v15 = vpop.f32.mrf.mxu1 }
 0x2bf   : > { %v1388_v16 = vadd.f32 %v1358_v14, %v1265_v11 }
 0x2c1   : > { %v1400_v17 = vadd.f32 %v2276_v12, %v1388_v16  ;;  %v1200_v49 = vpop.f32.mrf.mxu0 }
 0x2c2   : > { %v1268_v19 = vadd.f32 %v1267_v7, %v1200_v49 }
 0x2c3   : > { %v1410_v18 = vmax.f32 %v1400_v17, 0.0 }
 0x2c5   : > { %1420 = vst.msk [vmem:[%s2282_s16] sm:$0xff] %vm201_vm3, %v1410_v18 }
 0x2c6   : > { %v1273_v22 = vpop.f32.mrf.mxu1 }
 0x2c7   : > { %v1361_v20 = vpop.f32.mrf.mxu2 }
 0x2c8   : > { %v1389_v21 = vadd.f32 %v1361_v20, %v1268_v19 }
 0x2c9   : > { %v1203_v23 = vpop.f32.mrf.mxu0 }
 0x2ca   : > { %v1401_v24 = vadd.f32 %v2276_v12, %v1389_v21  ;;  %v1271_v26 = vadd.f32 %v1270_v15, %v1203_v23 }
 0x2cc   : > { %v1411_v25 = vmax.f32 %v1401_v24, 0.0 }
 0x2ce   : > { %1421 = vst.msk [vmem:[%s2282_s16 + $0x6] sm:$0xfc] %vm427_vm4, %v1411_v25  ;;  %v1276_v31 = vpop.f32.mrf.mxu1 }
 0x2cf   : > { %v1364_v53 = vpop.f32.mrf.mxu2 }
 0x2d0   : > { %v1390_v27 = vadd.f32 %v1364_v53, %v1271_v26 }
 0x2d1   : > { %v1206_v28 = vpop.f32.mrf.mxu0 }
 0x2d2   : > { %v1402_v29 = vadd.f32 %v2276_v12, %v1390_v27  ;;  %v1274_v33 = vadd.f32 %v1273_v22, %v1206_v28 }
 0x2d4   : > { %v1412_v32 = vmax.f32 %v1402_v29, 0.0 }
 0x2d6   : > { %1422 = vst.msk [vmem:[%s2282_s16 + $0xe] sm:$0x3] %vm429_vm5, %v1412_v32  ;;  %v1279_v38 = vpop.f32.mrf.mxu1 }
 0x2d7   : > { %1423 = vst.msk [vmem:[%s2282_s16 + $0xc] sm:$0xf0] %vm431_vm6, %v1412_v32  ;;  %v1367_v61 = vpop.f32.mrf.mxu2 }
 0x2d8   : > { %v1391_v34 = vadd.f32 %v1367_v61, %v1274_v33 }
 0x2d9   : > { %v1209_v35 = vpop.f32.mrf.mxu0 }
 0x2da   : > { %v1403_v36 = vadd.f32 %v2276_v12, %v1391_v34  ;;  %v1277_v10 = vadd.f32 %v1276_v31, %v1209_v35 }
 0x2dc   : > { %v1413_v37 = vmax.f32 %v1403_v36, 0.0 }
 0x2de   : > { %1424 = vst.msk [vmem:[%s2282_s16 + $0x14] sm:$0xf] %vm433_vm8, %v1413_v37  ;;  %v1282_v44 = vpop.f32.mrf.mxu1 }
 0x2df   : > { %1425 = vst.msk [vmem:[%s2282_s16 + $0x12] sm:$0xc0] %vm435_vm9, %v1413_v37  ;;  %v1370_v13 = vpop.f32.mrf.mxu2 }
 0x2e0   : > { %v1392_v30 = vadd.f32 %v1370_v13, %v1277_v10 }
 0x2e1   : > { %v1212_v39 = vpop.f32.mrf.mxu0 }
 0x2e2   : > { %v1404_v40 = vadd.f32 %v2276_v12, %v1392_v30  ;;  %v1280_v42 = vadd.f32 %v1279_v38, %v1212_v39 }
 0x2e4   : > { %v1414_v41 = vmax.f32 %v1404_v40, 0.0 }
 0x2e6   : > { %1426 = vst.msk [vmem:[%s2282_s16 + $0x1a] sm:$0x3f] %vm437_vm10, %v1414_v41  ;;  %v1285_v54 = vpop.f32.mrf.mxu1 }
 0x2e7   : > { %v1373_v45 = vpop.f32.mrf.mxu2 }
 0x2e8   : > { %v1393_v47 = vadd.f32 %v1373_v45, %v1280_v42 }
 0x2e9   : > { %v1215_v48 = vpop.f32.mrf.mxu0 }
 0x2ea   : > { %v1405_v50 = vadd.f32 %v2276_v12, %v1393_v47  ;;  %v1283_v51 = vadd.f32 %v1282_v44, %v1215_v48 }
 0x2ec   : > { %v1415_v1 = vmax.f32 %v1405_v50, 0.0 }
 0x2ee   : > { %1427 = vst.msk [vmem:[%s2282_s16 + $0x20] sm:$0xff] %vm201_vm3, %v1415_v1  ;;  %v1288_v0 = vpop.f32.mrf.mxu1 }
 0x2ef   : > { %v1376_v43 = vpop.f32.mrf.mxu2 }
 0x2f0   : > { %v1394_v52 = vadd.f32 %v1376_v43, %v1283_v51 }
 0x2f1   : > { %v1218_v55 = vpop.f32.mrf.mxu0 }
 0x2f2   : > { %v1406_v56 = vadd.f32 %v2276_v12, %v1394_v52  ;;  %v1286_v59 = vadd.f32 %v1285_v54, %v1218_v55 }
 0x2f4   : > { %v1416_v58 = vmax.f32 %v1406_v56, 0.0 }
 0x2f6   : > { %1428 = vst.msk [vmem:[%s2282_s16 + $0x26] sm:$0xfc] %vm427_vm4, %v1416_v58  ;;  %v1291_v7 = vpop.f32.mrf.mxu1 }
 0x2f7   : > { %v1379_v60 = vpop.f32.mrf.mxu2 }
 0x2f8   : > { %v1395_v9 = vadd.f32 %v1379_v60, %v1286_v59 }
 0x2f9   : > { %v1221_v62 = vpop.f32.mrf.mxu0 }
 0x2fa   : > { %v1407_v63 = vadd.f32 %v2276_v12, %v1395_v9  ;;  %v1289_v57 = vadd.f32 %v1288_v0, %v1221_v62 }
 0x2fc   : > { %v1417_v2 = vmax.f32 %v1407_v63, 0.0 }
 0x2fe   : > { %1429 = vst.msk [vmem:[%s2282_s16 + $0x2e] sm:$0x3] %vm429_vm5, %v1417_v2 }
 0x2ff   : > { %1430 = vst.msk [vmem:[%s2282_s16 + $0x2c] sm:$0xf0] %vm431_vm6, %v1417_v2  ;;  %v1382_v3 = vpop.f32.mrf.mxu2 }
 0x300   : > { %v1396_v46 = vadd.f32 %v1382_v3, %v1289_v57 }
 0x301   : > { %v1224_v5 = vpop.f32.mrf.mxu0 }
 0x302   : > { %v1408_v4 = vadd.f32 %v2276_v12, %v1396_v46  ;;  %v1292_v8 = vadd.f32 %v1291_v7, %v1224_v5 }
 0x304   : > { %v1418_v6 = vmax.f32 %v1408_v4, 0.0 }
 0x306   : > { %1431 = vst.msk [vmem:[%s2282_s16 + $0x34] sm:$0xf] %vm433_vm8, %v1418_v6 }
 0x307   : > { %1432 = vst.msk [vmem:[%s2282_s16 + $0x32] sm:$0xc0] %vm435_vm9, %v1418_v6  ;;  %v1385_v11 = vpop.f32.mrf.mxu2 }
 0x308   : > { %v1397_v14 = vadd.f32 %v1385_v11, %v1292_v8 }
 0x30a   : > { %v1409_v15 = vadd.f32 %v2276_v12, %v1397_v14 }
 0x30c   : > { %v1419_v16 = vmax.f32 %v1409_v15, 0.0 }
 0x30e   : > { %1433 = vst.msk [vmem:[%s2282_s16 + $0x3a] sm:$0x3f] %vm437_vm10, %v1419_v16 }
 0x30f PF: > { %s14_s15 = sadd.s32 1, %s1649_s15  }
 0x310   : > { %p11_p5 = scmp.ge.s32.totalorder %s14_s15, 5  }
 0x312   :  { %13 = sbr.rel (!%p11_p5) target bundleno = 1 (0x1), region = 66 }

</bundles_post_ra>
